<compile_context>
chip_gen: v7x
topology: tpu7x:2x2x1
jax: 0.10.0
libtpu: 0.0.40
codegen_flags: <defaults>
</compile_context>

<pallas_src>
import jax
import jax.numpy as jnp
from jax.experimental import pallas as pl
from jax.experimental.pallas import tpu as pltpu


def _round_up(x, m):
    return (x + m - 1) // m * m


def _conv2d_pallas(x, weight, bias, *, stride, padding, dilation, groups,
                   matmul_dtype=jnp.bfloat16, out_dtype=None):
    """2-D convolution (NCHW x, OIHW weight -> NCHW y) as a Pallas TPU kernel."""
    N, C_in, H, W = x.shape
    C_out, C_in_g, k, k2 = weight.shape
    assert k == k2
    s, d, p = int(stride), int(dilation), int(padding)
    assert p >= 0, f"negative padding {p}: SubConv requires op.padding[0] >= 2"
    assert s >= 1 and d >= 1
    if out_dtype is None:
        out_dtype = x.dtype

    # ---- grouped-conv handling ---------------------------------------------
    depthwise = (groups > 1 and groups == C_in and C_out == C_in and C_in_g == 1)
    if groups > 1 and not depthwise:
        # General grouped conv: densify to a block-diagonal (C_out, C_in) weight
        # (exact, wastes ~groups x FLOPs; depthwise never takes this path).
        assert C_in_g * groups == C_in and C_out % groups == 0
        og = C_out // groups
        wd = jnp.zeros((C_out, C_in, k, k), weight.dtype)
        for g in range(groups):
            wd = wd.at[g * og:(g + 1) * og, g * C_in_g:(g + 1) * C_in_g].set(
                weight[g * og:(g + 1) * og])
        weight = wd
    elif not depthwise:
        assert C_in_g == C_in

    if bias is None:
        bias = jnp.zeros((C_out,), jnp.float32)

    # ---- geometry ------------------------------------------------------------
    H_pad, W_pad = H + 2 * p, W + 2 * p
    H_v = H_pad - d * (k - 1)          # stride-1 output rows (computed in-kernel)
    W_v = W_pad - d * (k - 1)          # stride-1 output cols
    assert H_v > 0 and W_v > 0
    H_out = (H_v - 1) // s + 1
    W_out = (W_v - 1) // s + 1

    C_in_pad = _round_up(C_in, 8)                       # sublane-aligned tap rows
    tap_offsets = tuple(d * (ki * W_pad + kj)
                        for ki in range(k) for kj in range(k))
    max_off = tap_offsets[-1]
    extra_rows = (-(-max_off // W_pad)) if max_off else 0   # guard rows at bottom
    rows_tot = H_pad + extra_rows
    Lp = rows_tot * W_pad                               # flat per-image slab length

    # ---- host prep: ONE pad (channel + spatial + guard rows) + free reshape ---
    x_slab = jnp.pad(x.astype(matmul_dtype),
                     ((0, 0), (0, C_in_pad - C_in),
                      (p, p + extra_rows), (p, p))).reshape(N, C_in_pad, Lp)
    bias2d = bias.reshape(C_out, 1).astype(jnp.float32)

    if depthwise:
        # (C_in_pad, k*k): w_dw[c, t] = w[c, 0, ki, kj]; VPU path.
        w_arg = jnp.pad(weight[:, 0].reshape(C_in, k * k),
                        ((0, C_in_pad - C_in), (0, 0))).astype(matmul_dtype)
        K = k * k
        acc_rows = C_in_pad
    else:
        # (C_out, k*k*C_in_pad), tap-major / channel-minor: matches the patch rows.
        wp = jnp.pad(weight, ((0, 0), (0, C_in_pad - C_in), (0, 0), (0, 0)))
        w_arg = wp.reshape(C_out, C_in_pad, k * k).transpose(0, 2, 1)
        w_arg = w_arg.reshape(C_out, k * k * C_in_pad).astype(matmul_dtype)
        K = k * k * C_in_pad
        acc_rows = C_out

    # ---- tiling ---------------------------------------------------------------
    # Row block: keep the f32 accumulator <= ~128 KiB but spans >= ~128 lanes.
    acc_budget = 128 * 1024
    Rb = max(1, acc_budget // max(1, acc_rows * W_pad * 4))
    Rb = max(Rb, -(-128 // W_pad))
    Rb = min(Rb, H_v)
    n_row_blocks = -(-H_v // Rb)
    span_cap = Rb * W_pad

    # Images per grid step: amortize the ~0.35us/step pipeline overhead.
    mm_bytes = jnp.dtype(matmul_dtype).itemsize
    out_bytes_e = jnp.dtype(out_dtype).itemsize
    per_img = C_in_pad * Lp * mm_bytes + C_out * H_v * W_v * out_bytes_e
    Nb = 1
    for cand in range(min(N, 8), 1, -1):
        if N % cand == 0 and cand * per_img <= (1 << 20):
            Nb = cand
            break

    def kernel(x_ref, w_ref, b_ref, o_ref, *scratch):
        # x_ref: (Nb, C_in_pad, Lp)         w_ref: (C_out, K) or (C_in_pad, k*k)
        # b_ref: (C_out, 1) f32             o_ref: (Nb, C_out, H_v, W_v)
        patch_ref = scratch[0] if scratch else None
        for b in range(Nb):                              # static unroll
            for rb in range(n_row_blocks):               # static unroll
                r0 = rb * Rb
                rows = min(Rb, H_v - r0)
                span = rows * W_pad
                base = r0 * W_pad
                if depthwise:
                    # VPU per-channel MAC: w[c, t] broadcast over lanes.
                    acc = jnp.zeros((C_in_pad, span), jnp.float32)
                    for t, off in enumerate(tap_offsets):
                        acc = acc + (
                            w_ref[:, t:t + 1].astype(jnp.float32)
                            * x_ref[b, :, base + off:base + off + span]
                            .astype(jnp.float32))
                else:
                    # Pack the k*k taps into the contraction dim -> ONE matmul.
                    for t, off in enumerate(tap_offsets):
                        patch_ref[t * C_in_pad:(t + 1) * C_in_pad, :span] = (
                            x_ref[b, :, base + off:base + off + span])
                    acc = jnp.dot(w_ref[...], patch_ref[:, :span],
                                  preferred_element_type=jnp.float32)
                out_blk = (acc[:C_out] + b_ref[...]).astype(o_ref.dtype)
                # Fused crop of the wrap-around columns: compact NCHW stores.
                for r in range(rows):
                    o_ref[b, :, r0 + r, :] = out_blk[:, r * W_pad:r * W_pad + W_v]

    scratch_shapes = [] if depthwise else [pltpu.VMEM((K, span_cap), matmul_dtype)]

    flops = 2 * N * acc_rows * K * H_v * W_pad
    bytes_accessed = (x_slab.size * mm_bytes + w_arg.size * mm_bytes
                      + bias2d.size * 4 + N * C_out * H_v * W_v * out_bytes_e)
    vmem_need = (2 * Nb * per_img + w_arg.size * mm_bytes
                 + K * span_cap * mm_bytes + acc_rows * span_cap * 4 + (4 << 20))
    vmem_limit = None if vmem_need <= (16 << 20) else int(
        min(max(vmem_need, 32 << 20), 64 << 20))

    y = pl.pallas_call(
        kernel,
        out_shape=jax.ShapeDtypeStruct((N, C_out, H_v, W_v), out_dtype),
        grid=(N // Nb,),
        in_specs=[
            pl.BlockSpec((Nb, C_in_pad, Lp), lambda n: (n, 0, 0)),
            pl.BlockSpec(w_arg.shape, lambda n: (0, 0)),      # resident weights
            pl.BlockSpec((C_out, 1), lambda n: (0, 0)),        # resident bias
        ],
        out_specs=pl.BlockSpec((Nb, C_out, H_v, W_v), lambda n: (n, 0, 0, 0)),
        scratch_shapes=scratch_shapes,
        compiler_params=pltpu.CompilerParams(
            dimension_semantics=("parallel",),                 # split batch on v7x
            vmem_limit_bytes=vmem_limit),
        cost_estimate=pl.CostEstimate(flops=flops, transcendentals=0,
                                      bytes_accessed=bytes_accessed),
    )(x_slab, w_arg, bias2d)

    if s > 1:
        # TODO(synk): fuse the stride-s subsample into the kernel epilogue.
        y = y[:, :, ::s, ::s][:, :, :H_out, :W_out]
    return y


def sub_conv_forward(x, op_weight, op_bias, *, kernel_size, op_stride,
                     op_padding, op_dilation, op_groups,
                     matmul_dtype=jnp.bfloat16, out_dtype=None):
    """Pallas port of SubConv.forward: slice the parent conv weight, adjust padding."""
    kk = kernel_size
    w_sub = op_weight[:, :, 1:1 + kk, 1:1 + kk]
    if op_padding == 2:
        pad, dil = op_padding - 1, 1
    else:
        assert op_padding >= 2, "SubConv requires op.padding[0] >= 2"
        pad, dil = op_padding - 2, op_dilation
    return _conv2d_pallas(x, w_sub, op_bias, stride=op_stride, padding=pad,
                          dilation=dil, groups=op_groups,
                          matmul_dtype=matmul_dtype, out_dtype=out_dtype)


def _reference(x, op_weight, op_bias, *, kernel_size, op_stride, op_padding,
               op_dilation, op_groups):
    kk = kernel_size
    w_sub = op_weight[:, :, 1:1 + kk, 1:1 + kk]
    if op_padding == 2:
        pad, dil = op_padding - 1, 1
    else:
        pad, dil = op_padding - 2, op_dilation
    y = jax.lax.conv_general_dilated(
        x, w_sub, window_strides=(op_stride, op_stride),
        padding=((pad, pad), (pad, pad)), rhs_dilation=(dil, dil),
        dimension_numbers=("NCHW", "OIHW", "NCHW"),
        feature_group_count=op_groups,
        precision=jax.lax.Precision.HIGHEST)
    if op_bias is not None:
        y = y + op_bias.reshape(1, op_weight.shape[0], 1, 1)
    return y


if __name__ == "__main__":
    def run_case(name, *, N, C_in, C_out, H, W, full_k, kernel_size,
                 op_stride, op_padding, op_dilation, op_groups, key):
        kx, kw, kb = jax.random.split(key, 3)
        x = jax.random.normal(kx, (N, C_in, H, W), jnp.float32)
        w = jax.random.normal(kw, (C_out, C_in // op_groups, full_k, full_k),
                              jnp.float32) * 0.1
        b = jax.random.normal(kb, (C_out,), jnp.float32) * 0.1
        y = sub_conv_forward(x, w, b, kernel_size=kernel_size,
                             op_stride=op_stride, op_padding=op_padding,
                             op_dilation=op_dilation, op_groups=op_groups)
        y = jax.block_until_ready(y)
        ref = _reference(x, w, b, kernel_size=kernel_size, op_stride=op_stride,
                         op_padding=op_padding, op_dilation=op_dilation,
                         op_groups=op_groups)
        assert y.shape == ref.shape, (name, y.shape, ref.shape)
        assert bool(jnp.all(jnp.isfinite(y))), name
        err = float(jnp.max(jnp.abs(y.astype(jnp.float32) - ref)))
        assert err < 5e-2, f"{name}: max abs error vs reference = {err}"

    k0, k1, k2 = jax.random.split(jax.random.PRNGKey(0), 3)
    # 1) Dense 3x3 sub-conv of a 5x5 op (padding==2 branch), stride 1.
    run_case("dense_s1", N=2, C_in=4, C_out=8, H=16, W=16, full_k=5,
             kernel_size=3, op_stride=1, op_padding=2, op_dilation=1,
             op_groups=1, key=k0)
    # 2) Depthwise dilated 3x3 sub-conv of a 5x5 op (DARTS dil_conv style).
    run_case("depthwise_d2", N=2, C_in=8, C_out=8, H=16, W=16, full_k=5,
             kernel_size=3, op_stride=1, op_padding=4, op_dilation=2,
             op_groups=8, key=k1)
    # 3) Strided dense sub-conv (reduction cell), padding==2 branch, stride 2.
    run_case("dense_s2", N=2, C_in=4, C_out=8, H=16, W=16, full_k=5,
             kernel_size=3, op_stride=2, op_padding=2, op_dilation=1,
             op_groups=1, key=k2)

    print("KERNEL_OK")
</pallas_src>

<mosaic_0001>
module attributes {stable_mosaic.version = 11 : i64} {
  func.func @kernel(%arg0: i32, %arg1: memref<2x8x378xbf16, #tpu.memory_space<vmem>>, %arg2: memref<8x72xbf16, #tpu.memory_space<vmem>>, %arg3: memref<8x1xf32, #tpu.memory_space<vmem>>, %arg4: memref<2x8x16x16xf32, #tpu.memory_space<vmem>>, %arg5: memref<72x288xbf16, #tpu.memory_space<vmem>>) attributes {dimension_semantics = [#tpu.dimension_semantics<parallel>], iteration_bounds = array<i64: 1>, scalar_prefetch = 0 : i64, scratch_operands = 1 : i64, tpu.core_type = #tpu.core_type<tc>, window_params = [{transform_indices = @transform_0, window_bounds = array<i64: 2, 8, 378>}, {pipeline_mode = #tpu.pipeline_mode<synchronous>, transform_indices = @transform_1, window_bounds = array<i64: 8, 72>}, {pipeline_mode = #tpu.pipeline_mode<synchronous>, transform_indices = @transform_2, window_bounds = array<i64: 8, 1>}, {transform_indices = @transform_3, window_bounds = array<i64: 2, 8, 16, 16>}]} {
    %c0 = arith.constant 0 : index
    %c0_0 = arith.constant 0 : index
    %c0_1 = arith.constant 0 : index
    %0 = vector.load %arg1[%c0, %c0_0, %c0_1] : memref<2x8x378xbf16, #tpu.memory_space<vmem>>, vector<1x8x288xbf16>
    %1 = vector.shape_cast %0 : vector<1x8x288xbf16> to vector<8x288xbf16>
    %c0_2 = arith.constant 0 : index
    %c0_3 = arith.constant 0 : index
    %2 = vector.load %arg5[%c0_2, %c0_3] : memref<72x288xbf16, #tpu.memory_space<vmem>>, vector<8x288xbf16>
    tpu.vector_store %arg5[%c0_2, %c0_3], %1 {strides = array<i32>} : memref<72x288xbf16, #tpu.memory_space<vmem>>, vector<8x288xbf16>,
    %c0_4 = arith.constant 0 : index
    %c0_5 = arith.constant 0 : index
    %c1 = arith.constant 1 : index
    %3 = vector.load %arg1[%c0_4, %c0_5, %c1] : memref<2x8x378xbf16, #tpu.memory_space<vmem>>, vector<1x8x288xbf16>
    %4 = vector.shape_cast %3 : vector<1x8x288xbf16> to vector<8x288xbf16>
    %c8 = arith.constant 8 : index
    %c0_6 = arith.constant 0 : index
    %5 = vector.load %arg5[%c8, %c0_6] : memref<72x288xbf16, #tpu.memory_space<vmem>>, vector<8x288xbf16>
    tpu.vector_store %arg5[%c8, %c0_6], %4 {strides = array<i32>} : memref<72x288xbf16, #tpu.memory_space<vmem>>, vector<8x288xbf16>,
    %c0_7 = arith.constant 0 : index
    %c0_8 = arith.constant 0 : index
    %c2 = arith.constant 2 : index
    %6 = vector.load %arg1[%c0_7, %c0_8, %c2] : memref<2x8x378xbf16, #tpu.memory_space<vmem>>, vector<1x8x288xbf16>
    %7 = vector.shape_cast %6 : vector<1x8x288xbf16> to vector<8x288xbf16>
    %c16 = arith.constant 16 : index
    %c0_9 = arith.constant 0 : index
    %8 = vector.load %arg5[%c16, %c0_9] : memref<72x288xbf16, #tpu.memory_space<vmem>>, vector<8x288xbf16>
    tpu.vector_store %arg5[%c16, %c0_9], %7 {strides = array<i32>} : memref<72x288xbf16, #tpu.memory_space<vmem>>, vector<8x288xbf16>,
    %c0_10 = arith.constant 0 : index
    %c0_11 = arith.constant 0 : index
    %c18 = arith.constant 18 : index
    %9 = vector.load %arg1[%c0_10, %c0_11, %c18] : memref<2x8x378xbf16, #tpu.memory_space<vmem>>, vector<1x8x288xbf16>
    %10 = vector.shape_cast %9 : vector<1x8x288xbf16> to vector<8x288xbf16>
    %c24 = arith.constant 24 : index
    %c0_12 = arith.constant 0 : index
    %11 = vector.load %arg5[%c24, %c0_12] : memref<72x288xbf16, #tpu.memory_space<vmem>>, vector<8x288xbf16>
    tpu.vector_store %arg5[%c24, %c0_12], %10 {strides = array<i32>} : memref<72x288xbf16, #tpu.memory_space<vmem>>, vector<8x288xbf16>,
    %c0_13 = arith.constant 0 : index
    %c0_14 = arith.constant 0 : index
    %c19 = arith.constant 19 : index
    %12 = vector.load %arg1[%c0_13, %c0_14, %c19] : memref<2x8x378xbf16, #tpu.memory_space<vmem>>, vector<1x8x288xbf16>
    %13 = vector.shape_cast %12 : vector<1x8x288xbf16> to vector<8x288xbf16>
    %c32 = arith.constant 32 : index
    %c0_15 = arith.constant 0 : index
    %14 = vector.load %arg5[%c32, %c0_15] : memref<72x288xbf16, #tpu.memory_space<vmem>>, vector<8x288xbf16>
    tpu.vector_store %arg5[%c32, %c0_15], %13 {strides = array<i32>} : memref<72x288xbf16, #tpu.memory_space<vmem>>, vector<8x288xbf16>,
    %c0_16 = arith.constant 0 : index
    %c0_17 = arith.constant 0 : index
    %c20 = arith.constant 20 : index
    %15 = vector.load %arg1[%c0_16, %c0_17, %c20] : memref<2x8x378xbf16, #tpu.memory_space<vmem>>, vector<1x8x288xbf16>
    %16 = vector.shape_cast %15 : vector<1x8x288xbf16> to vector<8x288xbf16>
    %c40 = arith.constant 40 : index
    %c0_18 = arith.constant 0 : index
    %17 = vector.load %arg5[%c40, %c0_18] : memref<72x288xbf16, #tpu.memory_space<vmem>>, vector<8x288xbf16>
    tpu.vector_store %arg5[%c40, %c0_18], %16 {strides = array<i32>} : memref<72x288xbf16, #tpu.memory_space<vmem>>, vector<8x288xbf16>,
    %c0_19 = arith.constant 0 : index
    %c0_20 = arith.constant 0 : index
    %c36 = arith.constant 36 : index
    %18 = vector.load %arg1[%c0_19, %c0_20, %c36] : memref<2x8x378xbf16, #tpu.memory_space<vmem>>, vector<1x8x288xbf16>
    %19 = vector.shape_cast %18 : vector<1x8x288xbf16> to vector<8x288xbf16>
    %c48 = arith.constant 48 : index
    %c0_21 = arith.constant 0 : index
    %20 = vector.load %arg5[%c48, %c0_21] : memref<72x288xbf16, #tpu.memory_space<vmem>>, vector<8x288xbf16>
    tpu.vector_store %arg5[%c48, %c0_21], %19 {strides = array<i32>} : memref<72x288xbf16, #tpu.memory_space<vmem>>, vector<8x288xbf16>,
    %c0_22 = arith.constant 0 : index
    %c0_23 = arith.constant 0 : index
    %c37 = arith.constant 37 : index
    %21 = vector.load %arg1[%c0_22, %c0_23, %c37] : memref<2x8x378xbf16, #tpu.memory_space<vmem>>, vector<1x8x288xbf16>
    %22 = vector.shape_cast %21 : vector<1x8x288xbf16> to vector<8x288xbf16>
    %c56 = arith.constant 56 : index
    %c0_24 = arith.constant 0 : index
    %23 = vector.load %arg5[%c56, %c0_24] : memref<72x288xbf16, #tpu.memory_space<vmem>>, vector<8x288xbf16>
    tpu.vector_store %arg5[%c56, %c0_24], %22 {strides = array<i32>} : memref<72x288xbf16, #tpu.memory_space<vmem>>, vector<8x288xbf16>,
    %c0_25 = arith.constant 0 : index
    %c0_26 = arith.constant 0 : index
    %c38 = arith.constant 38 : index
    %24 = vector.load %arg1[%c0_25, %c0_26, %c38] : memref<2x8x378xbf16, #tpu.memory_space<vmem>>, vector<1x8x288xbf16>
    %25 = vector.shape_cast %24 : vector<1x8x288xbf16> to vector<8x288xbf16>
    %c64 = arith.constant 64 : index
    %c0_27 = arith.constant 0 : index
    %26 = vector.load %arg5[%c64, %c0_27] : memref<72x288xbf16, #tpu.memory_space<vmem>>, vector<8x288xbf16>
    tpu.vector_store %arg5[%c64, %c0_27], %25 {strides = array<i32>} : memref<72x288xbf16, #tpu.memory_space<vmem>>, vector<8x288xbf16>,
    %c0_28 = arith.constant 0 : index
    %c0_29 = arith.constant 0 : index
    %27 = vector.load %arg2[%c0_28, %c0_29] : memref<8x72xbf16, #tpu.memory_space<vmem>>, vector<8x72xbf16>
    %c0_30 = arith.constant 0 : index
    %c0_31 = arith.constant 0 : index
    %28 = vector.load %arg5[%c0_30, %c0_31] : memref<72x288xbf16, #tpu.memory_space<vmem>>, vector<72x288xbf16>
    %cst = arith.constant dense<0.000000e+00> : vector<8x288xf32>
    %29 = tpu.matmul %27, %28, %cst {dimension_numbers = #tpu.dot_dimension_numbers<[1], [0], [0], [1], [0, 0, 1, 1], [], []>} : vector<8x72xbf16>, vector<72x288xbf16>, vector<8x288xf32> -> vector<8x288xf32>
    %c0_32 = arith.constant 0 : index
    %c0_33 = arith.constant 0 : index
    %30 = vector.load %arg3[%c0_32, %c0_33] : memref<8x1xf32, #tpu.memory_space<vmem>>, vector<8x1xf32>
    %31 = vector.broadcast %30 : vector<8x1xf32> to vector<8x288xf32>
    %32 = arith.addf %29, %31 : vector<8x288xf32>
    %33 = vector.extract_strided_slice %32 {offsets = [0, 0], sizes = [8, 16], strides = [1, 1]} : vector<8x288xf32> to vector<8x16xf32>
    %c0_34 = arith.constant 0 : index
    %c0_35 = arith.constant 0 : index
    %c0_36 = arith.constant 0 : index
    %c0_37 = arith.constant 0 : index
    %34 = vector.load %arg4[%c0_34, %c0_35, %c0_36, %c0_37] : memref<2x8x16x16xf32, #tpu.memory_space<vmem>>, vector<1x8x1x16xf32>
    %35 = vector.shape_cast %34 : vector<1x8x1x16xf32> to vector<8x16xf32>
    %36 = vector.shape_cast %33 : vector<8x16xf32> to vector<1x8x1x16xf32>
    tpu.vector_store %arg4[%c0_34, %c0_35, %c0_36, %c0_37], %36 {strides = array<i32>} : memref<2x8x16x16xf32, #tpu.memory_space<vmem>>, vector<1x8x1x16xf32>,
    %37 = vector.extract_strided_slice %32 {offsets = [0, 18], sizes = [8, 16], strides = [1, 1]} : vector<8x288xf32> to vector<8x16xf32>
    %c0_38 = arith.constant 0 : index
    %c0_39 = arith.constant 0 : index
    %c1_40 = arith.constant 1 : index
    %c0_41 = arith.constant 0 : index
    %38 = vector.load %arg4[%c0_38, %c0_39, %c1_40, %c0_41] : memref<2x8x16x16xf32, #tpu.memory_space<vmem>>, vector<1x8x1x16xf32>
    %39 = vector.shape_cast %38 : vector<1x8x1x16xf32> to vector<8x16xf32>
    %40 = vector.shape_cast %37 : vector<8x16xf32> to vector<1x8x1x16xf32>
    tpu.vector_store %arg4[%c0_38, %c0_39, %c1_40, %c0_41], %40 {strides = array<i32>} : memref<2x8x16x16xf32, #tpu.memory_space<vmem>>, vector<1x8x1x16xf32>,
    %41 = vector.extract_strided_slice %32 {offsets = [0, 36], sizes = [8, 16], strides = [1, 1]} : vector<8x288xf32> to vector<8x16xf32>
    %c0_42 = arith.constant 0 : index
    %c0_43 = arith.constant 0 : index
    %c2_44 = arith.constant 2 : index
    %c0_45 = arith.constant 0 : index
    %42 = vector.load %arg4[%c0_42, %c0_43, %c2_44, %c0_45] : memref<2x8x16x16xf32, #tpu.memory_space<vmem>>, vector<1x8x1x16xf32>
    %43 = vector.shape_cast %42 : vector<1x8x1x16xf32> to vector<8x16xf32>
    %44 = vector.shape_cast %41 : vector<8x16xf32> to vector<1x8x1x16xf32>
    tpu.vector_store %arg4[%c0_42, %c0_43, %c2_44, %c0_45], %44 {strides = array<i32>} : memref<2x8x16x16xf32, #tpu.memory_space<vmem>>, vector<1x8x1x16xf32>,
    %45 = vector.extract_strided_slice %32 {offsets = [0, 54], sizes = [8, 16], strides = [1, 1]} : vector<8x288xf32> to vector<8x16xf32>
    %c0_46 = arith.constant 0 : index
    %c0_47 = arith.constant 0 : index
    %c3 = arith.constant 3 : index
    %c0_48 = arith.constant 0 : index
    %46 = vector.load %arg4[%c0_46, %c0_47, %c3, %c0_48] : memref<2x8x16x16xf32, #tpu.memory_space<vmem>>, vector<1x8x1x16xf32>
    %47 = vector.shape_cast %46 : vector<1x8x1x16xf32> to vector<8x16xf32>
    %48 = vector.shape_cast %45 : vector<8x16xf32> to vector<1x8x1x16xf32>
    tpu.vector_store %arg4[%c0_46, %c0_47, %c3, %c0_48], %48 {strides = array<i32>} : memref<2x8x16x16xf32, #tpu.memory_space<vmem>>, vector<1x8x1x16xf32>,
    %49 = vector.extract_strided_slice %32 {offsets = [0, 72], sizes = [8, 16], strides = [1, 1]} : vector<8x288xf32> to vector<8x16xf32>
    %c0_49 = arith.constant 0 : index
    %c0_50 = arith.constant 0 : index
    %c4 = arith.constant 4 : index
    %c0_51 = arith.constant 0 : index
    %50 = vector.load %arg4[%c0_49, %c0_50, %c4, %c0_51] : memref<2x8x16x16xf32, #tpu.memory_space<vmem>>, vector<1x8x1x16xf32>
    %51 = vector.shape_cast %50 : vector<1x8x1x16xf32> to vector<8x16xf32>
    %52 = vector.shape_cast %49 : vector<8x16xf32> to vector<1x8x1x16xf32>
    tpu.vector_store %arg4[%c0_49, %c0_50, %c4, %c0_51], %52 {strides = array<i32>} : memref<2x8x16x16xf32, #tpu.memory_space<vmem>>, vector<1x8x1x16xf32>,
    %53 = vector.extract_strided_slice %32 {offsets = [0, 90], sizes = [8, 16], strides = [1, 1]} : vector<8x288xf32> to vector<8x16xf32>
    %c0_52 = arith.constant 0 : index
    %c0_53 = arith.constant 0 : index
    %c5 = arith.constant 5 : index
    %c0_54 = arith.constant 0 : index
    %54 = vector.load %arg4[%c0_52, %c0_53, %c5, %c0_54] : memref<2x8x16x16xf32, #tpu.memory_space<vmem>>, vector<1x8x1x16xf32>
    %55 = vector.shape_cast %54 : vector<1x8x1x16xf32> to vector<8x16xf32>
    %56 = vector.shape_cast %53 : vector<8x16xf32> to vector<1x8x1x16xf32>
    tpu.vector_store %arg4[%c0_52, %c0_53, %c5, %c0_54], %56 {strides = array<i32>} : memref<2x8x16x16xf32, #tpu.memory_space<vmem>>, vector<1x8x1x16xf32>,
    %57 = vector.extract_strided_slice %32 {offsets = [0, 108], sizes = [8, 16], strides = [1, 1]} : vector<8x288xf32> to vector<8x16xf32>
    %c0_55 = arith.constant 0 : index
    %c0_56 = arith.constant 0 : index
    %c6 = arith.constant 6 : index
    %c0_57 = arith.constant 0 : index
    %58 = vector.load %arg4[%c0_55, %c0_56, %c6, %c0_57] : memref<2x8x16x16xf32, #tpu.memory_space<vmem>>, vector<1x8x1x16xf32>
    %59 = vector.shape_cast %58 : vector<1x8x1x16xf32> to vector<8x16xf32>
    %60 = vector.shape_cast %57 : vector<8x16xf32> to vector<1x8x1x16xf32>
    tpu.vector_store %arg4[%c0_55, %c0_56, %c6, %c0_57], %60 {strides = array<i32>} : memref<2x8x16x16xf32, #tpu.memory_space<vmem>>, vector<1x8x1x16xf32>,
    %61 = vector.extract_strided_slice %32 {offsets = [0, 126], sizes = [8, 16], strides = [1, 1]} : vector<8x288xf32> to vector<8x16xf32>
    %c0_58 = arith.constant 0 : index
    %c0_59 = arith.constant 0 : index
    %c7 = arith.constant 7 : index
    %c0_60 = arith.constant 0 : index
    %62 = vector.load %arg4[%c0_58, %c0_59, %c7, %c0_60] : memref<2x8x16x16xf32, #tpu.memory_space<vmem>>, vector<1x8x1x16xf32>
    %63 = vector.shape_cast %62 : vector<1x8x1x16xf32> to vector<8x16xf32>
    %64 = vector.shape_cast %61 : vector<8x16xf32> to vector<1x8x1x16xf32>
    tpu.vector_store %arg4[%c0_58, %c0_59, %c7, %c0_60], %64 {strides = array<i32>} : memref<2x8x16x16xf32, #tpu.memory_space<vmem>>, vector<1x8x1x16xf32>,
    %65 = vector.extract_strided_slice %32 {offsets = [0, 144], sizes = [8, 16], strides = [1, 1]} : vector<8x288xf32> to vector<8x16xf32>
    %c0_61 = arith.constant 0 : index
    %c0_62 = arith.constant 0 : index
    %c8_63 = arith.constant 8 : index
    %c0_64 = arith.constant 0 : index
    %66 = vector.load %arg4[%c0_61, %c0_62, %c8_63, %c0_64] : memref<2x8x16x16xf32, #tpu.memory_space<vmem>>, vector<1x8x1x16xf32>
    %67 = vector.shape_cast %66 : vector<1x8x1x16xf32> to vector<8x16xf32>
    %68 = vector.shape_cast %65 : vector<8x16xf32> to vector<1x8x1x16xf32>
    tpu.vector_store %arg4[%c0_61, %c0_62, %c8_63, %c0_64], %68 {strides = array<i32>} : memref<2x8x16x16xf32, #tpu.memory_space<vmem>>, vector<1x8x1x16xf32>,
    %69 = vector.extract_strided_slice %32 {offsets = [0, 162], sizes = [8, 16], strides = [1, 1]} : vector<8x288xf32> to vector<8x16xf32>
    %c0_65 = arith.constant 0 : index
    %c0_66 = arith.constant 0 : index
    %c9 = arith.constant 9 : index
    %c0_67 = arith.constant 0 : index
    %70 = vector.load %arg4[%c0_65, %c0_66, %c9, %c0_67] : memref<2x8x16x16xf32, #tpu.memory_space<vmem>>, vector<1x8x1x16xf32>
    %71 = vector.shape_cast %70 : vector<1x8x1x16xf32> to vector<8x16xf32>
    %72 = vector.shape_cast %69 : vector<8x16xf32> to vector<1x8x1x16xf32>
    tpu.vector_store %arg4[%c0_65, %c0_66, %c9, %c0_67], %72 {strides = array<i32>} : memref<2x8x16x16xf32, #tpu.memory_space<vmem>>, vector<1x8x1x16xf32>,
    %73 = vector.extract_strided_slice %32 {offsets = [0, 180], sizes = [8, 16], strides = [1, 1]} : vector<8x288xf32> to vector<8x16xf32>
    %c0_68 = arith.constant 0 : index
    %c0_69 = arith.constant 0 : index
    %c10 = arith.constant 10 : index
    %c0_70 = arith.constant 0 : index
    %74 = vector.load %arg4[%c0_68, %c0_69, %c10, %c0_70] : memref<2x8x16x16xf32, #tpu.memory_space<vmem>>, vector<1x8x1x16xf32>
    %75 = vector.shape_cast %74 : vector<1x8x1x16xf32> to vector<8x16xf32>
    %76 = vector.shape_cast %73 : vector<8x16xf32> to vector<1x8x1x16xf32>
    tpu.vector_store %arg4[%c0_68, %c0_69, %c10, %c0_70], %76 {strides = array<i32>} : memref<2x8x16x16xf32, #tpu.memory_space<vmem>>, vector<1x8x1x16xf32>,
    %77 = vector.extract_strided_slice %32 {offsets = [0, 198], sizes = [8, 16], strides = [1, 1]} : vector<8x288xf32> to vector<8x16xf32>
    %c0_71 = arith.constant 0 : index
    %c0_72 = arith.constant 0 : index
    %c11 = arith.constant 11 : index
    %c0_73 = arith.constant 0 : index
    %78 = vector.load %arg4[%c0_71, %c0_72, %c11, %c0_73] : memref<2x8x16x16xf32, #tpu.memory_space<vmem>>, vector<1x8x1x16xf32>
    %79 = vector.shape_cast %78 : vector<1x8x1x16xf32> to vector<8x16xf32>
    %80 = vector.shape_cast %77 : vector<8x16xf32> to vector<1x8x1x16xf32>
    tpu.vector_store %arg4[%c0_71, %c0_72, %c11, %c0_73], %80 {strides = array<i32>} : memref<2x8x16x16xf32, #tpu.memory_space<vmem>>, vector<1x8x1x16xf32>,
    %81 = vector.extract_strided_slice %32 {offsets = [0, 216], sizes = [8, 16], strides = [1, 1]} : vector<8x288xf32> to vector<8x16xf32>
    %c0_74 = arith.constant 0 : index
    %c0_75 = arith.constant 0 : index
    %c12 = arith.constant 12 : index
    %c0_76 = arith.constant 0 : index
    %82 = vector.load %arg4[%c0_74, %c0_75, %c12, %c0_76] : memref<2x8x16x16xf32, #tpu.memory_space<vmem>>, vector<1x8x1x16xf32>
    %83 = vector.shape_cast %82 : vector<1x8x1x16xf32> to vector<8x16xf32>
    %84 = vector.shape_cast %81 : vector<8x16xf32> to vector<1x8x1x16xf32>
    tpu.vector_store %arg4[%c0_74, %c0_75, %c12, %c0_76], %84 {strides = array<i32>} : memref<2x8x16x16xf32, #tpu.memory_space<vmem>>, vector<1x8x1x16xf32>,
    %85 = vector.extract_strided_slice %32 {offsets = [0, 234], sizes = [8, 16], strides = [1, 1]} : vector<8x288xf32> to vector<8x16xf32>
    %c0_77 = arith.constant 0 : index
    %c0_78 = arith.constant 0 : index
    %c13 = arith.constant 13 : index
    %c0_79 = arith.constant 0 : index
    %86 = vector.load %arg4[%c0_77, %c0_78, %c13, %c0_79] : memref<2x8x16x16xf32, #tpu.memory_space<vmem>>, vector<1x8x1x16xf32>
    %87 = vector.shape_cast %86 : vector<1x8x1x16xf32> to vector<8x16xf32>
    %88 = vector.shape_cast %85 : vector<8x16xf32> to vector<1x8x1x16xf32>
    tpu.vector_store %arg4[%c0_77, %c0_78, %c13, %c0_79], %88 {strides = array<i32>} : memref<2x8x16x16xf32, #tpu.memory_space<vmem>>, vector<1x8x1x16xf32>,
    %89 = vector.extract_strided_slice %32 {offsets = [0, 252], sizes = [8, 16], strides = [1, 1]} : vector<8x288xf32> to vector<8x16xf32>
    %c0_80 = arith.constant 0 : index
    %c0_81 = arith.constant 0 : index
    %c14 = arith.constant 14 : index
    %c0_82 = arith.constant 0 : index
    %90 = vector.load %arg4[%c0_80, %c0_81, %c14, %c0_82] : memref<2x8x16x16xf32, #tpu.memory_space<vmem>>, vector<1x8x1x16xf32>
    %91 = vector.shape_cast %90 : vector<1x8x1x16xf32> to vector<8x16xf32>
    %92 = vector.shape_cast %89 : vector<8x16xf32> to vector<1x8x1x16xf32>
    tpu.vector_store %arg4[%c0_80, %c0_81, %c14, %c0_82], %92 {strides = array<i32>} : memref<2x8x16x16xf32, #tpu.memory_space<vmem>>, vector<1x8x1x16xf32>,
    %93 = vector.extract_strided_slice %32 {offsets = [0, 270], sizes = [8, 16], strides = [1, 1]} : vector<8x288xf32> to vector<8x16xf32>
    %c0_83 = arith.constant 0 : index
    %c0_84 = arith.constant 0 : index
    %c15 = arith.constant 15 : index
    %c0_85 = arith.constant 0 : index
    %94 = vector.load %arg4[%c0_83, %c0_84, %c15, %c0_85] : memref<2x8x16x16xf32, #tpu.memory_space<vmem>>, vector<1x8x1x16xf32>
    %95 = vector.shape_cast %94 : vector<1x8x1x16xf32> to vector<8x16xf32>
    %96 = vector.shape_cast %93 : vector<8x16xf32> to vector<1x8x1x16xf32>
    tpu.vector_store %arg4[%c0_83, %c0_84, %c15, %c0_85], %96 {strides = array<i32>} : memref<2x8x16x16xf32, #tpu.memory_space<vmem>>, vector<1x8x1x16xf32>,
    %c1_86 = arith.constant 1 : index
    %c0_87 = arith.constant 0 : index
    %c0_88 = arith.constant 0 : index
    %97 = vector.load %arg1[%c1_86, %c0_87, %c0_88] : memref<2x8x378xbf16, #tpu.memory_space<vmem>>, vector<1x8x288xbf16>
    %98 = vector.shape_cast %97 : vector<1x8x288xbf16> to vector<8x288xbf16>
    %c0_89 = arith.constant 0 : index
    %c0_90 = arith.constant 0 : index
    %99 = vector.load %arg5[%c0_89, %c0_90] : memref<72x288xbf16, #tpu.memory_space<vmem>>, vector<8x288xbf16>
    tpu.vector_store %arg5[%c0_89, %c0_90], %98 {strides = array<i32>} : memref<72x288xbf16, #tpu.memory_space<vmem>>, vector<8x288xbf16>,
    %c1_91 = arith.constant 1 : index
    %c0_92 = arith.constant 0 : index
    %c1_93 = arith.constant 1 : index
    %100 = vector.load %arg1[%c1_91, %c0_92, %c1_93] : memref<2x8x378xbf16, #tpu.memory_space<vmem>>, vector<1x8x288xbf16>
    %101 = vector.shape_cast %100 : vector<1x8x288xbf16> to vector<8x288xbf16>
    %c8_94 = arith.constant 8 : index
    %c0_95 = arith.constant 0 : index
    %102 = vector.load %arg5[%c8_94, %c0_95] : memref<72x288xbf16, #tpu.memory_space<vmem>>, vector<8x288xbf16>
    tpu.vector_store %arg5[%c8_94, %c0_95], %101 {strides = array<i32>} : memref<72x288xbf16, #tpu.memory_space<vmem>>, vector<8x288xbf16>,
    %c1_96 = arith.constant 1 : index
    %c0_97 = arith.constant 0 : index
    %c2_98 = arith.constant 2 : index
    %103 = vector.load %arg1[%c1_96, %c0_97, %c2_98] : memref<2x8x378xbf16, #tpu.memory_space<vmem>>, vector<1x8x288xbf16>
    %104 = vector.shape_cast %103 : vector<1x8x288xbf16> to vector<8x288xbf16>
    %c16_99 = arith.constant 16 : index
    %c0_100 = arith.constant 0 : index
    %105 = vector.load %arg5[%c16_99, %c0_100] : memref<72x288xbf16, #tpu.memory_space<vmem>>, vector<8x288xbf16>
    tpu.vector_store %arg5[%c16_99, %c0_100], %104 {strides = array<i32>} : memref<72x288xbf16, #tpu.memory_space<vmem>>, vector<8x288xbf16>,
    %c1_101 = arith.constant 1 : index
    %c0_102 = arith.constant 0 : index
    %c18_103 = arith.constant 18 : index
    %106 = vector.load %arg1[%c1_101, %c0_102, %c18_103] : memref<2x8x378xbf16, #tpu.memory_space<vmem>>, vector<1x8x288xbf16>
    %107 = vector.shape_cast %106 : vector<1x8x288xbf16> to vector<8x288xbf16>
    %c24_104 = arith.constant 24 : index
    %c0_105 = arith.constant 0 : index
    %108 = vector.load %arg5[%c24_104, %c0_105] : memref<72x288xbf16, #tpu.memory_space<vmem>>, vector<8x288xbf16>
    tpu.vector_store %arg5[%c24_104, %c0_105], %107 {strides = array<i32>} : memref<72x288xbf16, #tpu.memory_space<vmem>>, vector<8x288xbf16>,
    %c1_106 = arith.constant 1 : index
    %c0_107 = arith.constant 0 : index
    %c19_108 = arith.constant 19 : index
    %109 = vector.load %arg1[%c1_106, %c0_107, %c19_108] : memref<2x8x378xbf16, #tpu.memory_space<vmem>>, vector<1x8x288xbf16>
    %110 = vector.shape_cast %109 : vector<1x8x288xbf16> to vector<8x288xbf16>
    %c32_109 = arith.constant 32 : index
    %c0_110 = arith.constant 0 : index
    %111 = vector.load %arg5[%c32_109, %c0_110] : memref<72x288xbf16, #tpu.memory_space<vmem>>, vector<8x288xbf16>
    tpu.vector_store %arg5[%c32_109, %c0_110], %110 {strides = array<i32>} : memref<72x288xbf16, #tpu.memory_space<vmem>>, vector<8x288xbf16>,
    %c1_111 = arith.constant 1 : index
    %c0_112 = arith.constant 0 : index
    %c20_113 = arith.constant 20 : index
    %112 = vector.load %arg1[%c1_111, %c0_112, %c20_113] : memref<2x8x378xbf16, #tpu.memory_space<vmem>>, vector<1x8x288xbf16>
    %113 = vector.shape_cast %112 : vector<1x8x288xbf16> to vector<8x288xbf16>
    %c40_114 = arith.constant 40 : index
    %c0_115 = arith.constant 0 : index
    %114 = vector.load %arg5[%c40_114, %c0_115] : memref<72x288xbf16, #tpu.memory_space<vmem>>, vector<8x288xbf16>
    tpu.vector_store %arg5[%c40_114, %c0_115], %113 {strides = array<i32>} : memref<72x288xbf16, #tpu.memory_space<vmem>>, vector<8x288xbf16>,
    %c1_116 = arith.constant 1 : index
    %c0_117 = arith.constant 0 : index
    %c36_118 = arith.constant 36 : index
    %115 = vector.load %arg1[%c1_116, %c0_117, %c36_118] : memref<2x8x378xbf16, #tpu.memory_space<vmem>>, vector<1x8x288xbf16>
    %116 = vector.shape_cast %115 : vector<1x8x288xbf16> to vector<8x288xbf16>
    %c48_119 = arith.constant 48 : index
    %c0_120 = arith.constant 0 : index
    %117 = vector.load %arg5[%c48_119, %c0_120] : memref<72x288xbf16, #tpu.memory_space<vmem>>, vector<8x288xbf16>
    tpu.vector_store %arg5[%c48_119, %c0_120], %116 {strides = array<i32>} : memref<72x288xbf16, #tpu.memory_space<vmem>>, vector<8x288xbf16>,
    %c1_121 = arith.constant 1 : index
    %c0_122 = arith.constant 0 : index
    %c37_123 = arith.constant 37 : index
    %118 = vector.load %arg1[%c1_121, %c0_122, %c37_123] : memref<2x8x378xbf16, #tpu.memory_space<vmem>>, vector<1x8x288xbf16>
    %119 = vector.shape_cast %118 : vector<1x8x288xbf16> to vector<8x288xbf16>
    %c56_124 = arith.constant 56 : index
    %c0_125 = arith.constant 0 : index
    %120 = vector.load %arg5[%c56_124, %c0_125] : memref<72x288xbf16, #tpu.memory_space<vmem>>, vector<8x288xbf16>
    tpu.vector_store %arg5[%c56_124, %c0_125], %119 {strides = array<i32>} : memref<72x288xbf16, #tpu.memory_space<vmem>>, vector<8x288xbf16>,
    %c1_126 = arith.constant 1 : index
    %c0_127 = arith.constant 0 : index
    %c38_128 = arith.constant 38 : index
    %121 = vector.load %arg1[%c1_126, %c0_127, %c38_128] : memref<2x8x378xbf16, #tpu.memory_space<vmem>>, vector<1x8x288xbf16>
    %122 = vector.shape_cast %121 : vector<1x8x288xbf16> to vector<8x288xbf16>
    %c64_129 = arith.constant 64 : index
    %c0_130 = arith.constant 0 : index
    %123 = vector.load %arg5[%c64_129, %c0_130] : memref<72x288xbf16, #tpu.memory_space<vmem>>, vector<8x288xbf16>
    tpu.vector_store %arg5[%c64_129, %c0_130], %122 {strides = array<i32>} : memref<72x288xbf16, #tpu.memory_space<vmem>>, vector<8x288xbf16>,
    %c0_131 = arith.constant 0 : index
    %c0_132 = arith.constant 0 : index
    %124 = vector.load %arg2[%c0_131, %c0_132] : memref<8x72xbf16, #tpu.memory_space<vmem>>, vector<8x72xbf16>
    %c0_133 = arith.constant 0 : index
    %c0_134 = arith.constant 0 : index
    %125 = vector.load %arg5[%c0_133, %c0_134] : memref<72x288xbf16, #tpu.memory_space<vmem>>, vector<72x288xbf16>
    %cst_135 = arith.constant dense<0.000000e+00> : vector<8x288xf32>
    %126 = tpu.matmul %124, %125, %cst_135 {dimension_numbers = #tpu.dot_dimension_numbers<[1], [0], [0], [1], [0, 0, 1, 1], [], []>} : vector<8x72xbf16>, vector<72x288xbf16>, vector<8x288xf32> -> vector<8x288xf32>
    %c0_136 = arith.constant 0 : index
    %c0_137 = arith.constant 0 : index
    %127 = vector.load %arg3[%c0_136, %c0_137] : memref<8x1xf32, #tpu.memory_space<vmem>>, vector<8x1xf32>
    %128 = vector.broadcast %127 : vector<8x1xf32> to vector<8x288xf32>
    %129 = arith.addf %126, %128 : vector<8x288xf32>
    %130 = vector.extract_strided_slice %129 {offsets = [0, 0], sizes = [8, 16], strides = [1, 1]} : vector<8x288xf32> to vector<8x16xf32>
    %c1_138 = arith.constant 1 : index
    %c0_139 = arith.constant 0 : index
    %c0_140 = arith.constant 0 : index
    %c0_141 = arith.constant 0 : index
    %131 = vector.load %arg4[%c1_138, %c0_139, %c0_140, %c0_141] : memref<2x8x16x16xf32, #tpu.memory_space<vmem>>, vector<1x8x1x16xf32>
    %132 = vector.shape_cast %131 : vector<1x8x1x16xf32> to vector<8x16xf32>
    %133 = vector.shape_cast %130 : vector<8x16xf32> to vector<1x8x1x16xf32>
    tpu.vector_store %arg4[%c1_138, %c0_139, %c0_140, %c0_141], %133 {strides = array<i32>} : memref<2x8x16x16xf32, #tpu.memory_space<vmem>>, vector<1x8x1x16xf32>,
    %134 = vector.extract_strided_slice %129 {offsets = [0, 18], sizes = [8, 16], strides = [1, 1]} : vector<8x288xf32> to vector<8x16xf32>
    %c1_142 = arith.constant 1 : index
    %c0_143 = arith.constant 0 : index
    %c1_144 = arith.constant 1 : index
    %c0_145 = arith.constant 0 : index
    %135 = vector.load %arg4[%c1_142, %c0_143, %c1_144, %c0_145] : memref<2x8x16x16xf32, #tpu.memory_space<vmem>>, vector<1x8x1x16xf32>
    %136 = vector.shape_cast %135 : vector<1x8x1x16xf32> to vector<8x16xf32>
    %137 = vector.shape_cast %134 : vector<8x16xf32> to vector<1x8x1x16xf32>
    tpu.vector_store %arg4[%c1_142, %c0_143, %c1_144, %c0_145], %137 {strides = array<i32>} : memref<2x8x16x16xf32, #tpu.memory_space<vmem>>, vector<1x8x1x16xf32>,
    %138 = vector.extract_strided_slice %129 {offsets = [0, 36], sizes = [8, 16], strides = [1, 1]} : vector<8x288xf32> to vector<8x16xf32>
    %c1_146 = arith.constant 1 : index
    %c0_147 = arith.constant 0 : index
    %c2_148 = arith.constant 2 : index
    %c0_149 = arith.constant 0 : index
    %139 = vector.load %arg4[%c1_146, %c0_147, %c2_148, %c0_149] : memref<2x8x16x16xf32, #tpu.memory_space<vmem>>, vector<1x8x1x16xf32>
    %140 = vector.shape_cast %139 : vector<1x8x1x16xf32> to vector<8x16xf32>
    %141 = vector.shape_cast %138 : vector<8x16xf32> to vector<1x8x1x16xf32>
    tpu.vector_store %arg4[%c1_146, %c0_147, %c2_148, %c0_149], %141 {strides = array<i32>} : memref<2x8x16x16xf32, #tpu.memory_space<vmem>>, vector<1x8x1x16xf32>,
    %142 = vector.extract_strided_slice %129 {offsets = [0, 54], sizes = [8, 16], strides = [1, 1]} : vector<8x288xf32> to vector<8x16xf32>
    %c1_150 = arith.constant 1 : index
    %c0_151 = arith.constant 0 : index
    %c3_152 = arith.constant 3 : index
    %c0_153 = arith.constant 0 : index
    %143 = vector.load %arg4[%c1_150, %c0_151, %c3_152, %c0_153] : memref<2x8x16x16xf32, #tpu.memory_space<vmem>>, vector<1x8x1x16xf32>
    %144 = vector.shape_cast %143 : vector<1x8x1x16xf32> to vector<8x16xf32>
    %145 = vector.shape_cast %142 : vector<8x16xf32> to vector<1x8x1x16xf32>
    tpu.vector_store %arg4[%c1_150, %c0_151, %c3_152, %c0_153], %145 {strides = array<i32>} : memref<2x8x16x16xf32, #tpu.memory_space<vmem>>, vector<1x8x1x16xf32>,
    %146 = vector.extract_strided_slice %129 {offsets = [0, 72], sizes = [8, 16], strides = [1, 1]} : vector<8x288xf32> to vector<8x16xf32>
    %c1_154 = arith.constant 1 : index
    %c0_155 = arith.constant 0 : index
    %c4_156 = arith.constant 4 : index
    %c0_157 = arith.constant 0 : index
    %147 = vector.load %arg4[%c1_154, %c0_155, %c4_156, %c0_157] : memref<2x8x16x16xf32, #tpu.memory_space<vmem>>, vector<1x8x1x16xf32>
    %148 = vector.shape_cast %147 : vector<1x8x1x16xf32> to vector<8x16xf32>
    %149 = vector.shape_cast %146 : vector<8x16xf32> to vector<1x8x1x16xf32>
    tpu.vector_store %arg4[%c1_154, %c0_155, %c4_156, %c0_157], %149 {strides = array<i32>} : memref<2x8x16x16xf32, #tpu.memory_space<vmem>>, vector<1x8x1x16xf32>,
    %150 = vector.extract_strided_slice %129 {offsets = [0, 90], sizes = [8, 16], strides = [1, 1]} : vector<8x288xf32> to vector<8x16xf32>
    %c1_158 = arith.constant 1 : index
    %c0_159 = arith.constant 0 : index
    %c5_160 = arith.constant 5 : index
    %c0_161 = arith.constant 0 : index
    %151 = vector.load %arg4[%c1_158, %c0_159, %c5_160, %c0_161] : memref<2x8x16x16xf32, #tpu.memory_space<vmem>>, vector<1x8x1x16xf32>
    %152 = vector.shape_cast %151 : vector<1x8x1x16xf32> to vector<8x16xf32>
    %153 = vector.shape_cast %150 : vector<8x16xf32> to vector<1x8x1x16xf32>
    tpu.vector_store %arg4[%c1_158, %c0_159, %c5_160, %c0_161], %153 {strides = array<i32>} : memref<2x8x16x16xf32, #tpu.memory_space<vmem>>, vector<1x8x1x16xf32>,
    %154 = vector.extract_strided_slice %129 {offsets = [0, 108], sizes = [8, 16], strides = [1, 1]} : vector<8x288xf32> to vector<8x16xf32>
    %c1_162 = arith.constant 1 : index
    %c0_163 = arith.constant 0 : index
    %c6_164 = arith.constant 6 : index
    %c0_165 = arith.constant 0 : index
    %155 = vector.load %arg4[%c1_162, %c0_163, %c6_164, %c0_165] : memref<2x8x16x16xf32, #tpu.memory_space<vmem>>, vector<1x8x1x16xf32>
    %156 = vector.shape_cast %155 : vector<1x8x1x16xf32> to vector<8x16xf32>
    %157 = vector.shape_cast %154 : vector<8x16xf32> to vector<1x8x1x16xf32>
    tpu.vector_store %arg4[%c1_162, %c0_163, %c6_164, %c0_165], %157 {strides = array<i32>} : memref<2x8x16x16xf32, #tpu.memory_space<vmem>>, vector<1x8x1x16xf32>,
    %158 = vector.extract_strided_slice %129 {offsets = [0, 126], sizes = [8, 16], strides = [1, 1]} : vector<8x288xf32> to vector<8x16xf32>
    %c1_166 = arith.constant 1 : index
    %c0_167 = arith.constant 0 : index
    %c7_168 = arith.constant 7 : index
    %c0_169 = arith.constant 0 : index
    %159 = vector.load %arg4[%c1_166, %c0_167, %c7_168, %c0_169] : memref<2x8x16x16xf32, #tpu.memory_space<vmem>>, vector<1x8x1x16xf32>
    %160 = vector.shape_cast %159 : vector<1x8x1x16xf32> to vector<8x16xf32>
    %161 = vector.shape_cast %158 : vector<8x16xf32> to vector<1x8x1x16xf32>
    tpu.vector_store %arg4[%c1_166, %c0_167, %c7_168, %c0_169], %161 {strides = array<i32>} : memref<2x8x16x16xf32, #tpu.memory_space<vmem>>, vector<1x8x1x16xf32>,
    %162 = vector.extract_strided_slice %129 {offsets = [0, 144], sizes = [8, 16], strides = [1, 1]} : vector<8x288xf32> to vector<8x16xf32>
    %c1_170 = arith.constant 1 : index
    %c0_171 = arith.constant 0 : index
    %c8_172 = arith.constant 8 : index
    %c0_173 = arith.constant 0 : index
    %163 = vector.load %arg4[%c1_170, %c0_171, %c8_172, %c0_173] : memref<2x8x16x16xf32, #tpu.memory_space<vmem>>, vector<1x8x1x16xf32>
    %164 = vector.shape_cast %163 : vector<1x8x1x16xf32> to vector<8x16xf32>
    %165 = vector.shape_cast %162 : vector<8x16xf32> to vector<1x8x1x16xf32>
    tpu.vector_store %arg4[%c1_170, %c0_171, %c8_172, %c0_173], %165 {strides = array<i32>} : memref<2x8x16x16xf32, #tpu.memory_space<vmem>>, vector<1x8x1x16xf32>,
    %166 = vector.extract_strided_slice %129 {offsets = [0, 162], sizes = [8, 16], strides = [1, 1]} : vector<8x288xf32> to vector<8x16xf32>
    %c1_174 = arith.constant 1 : index
    %c0_175 = arith.constant 0 : index
    %c9_176 = arith.constant 9 : index
    %c0_177 = arith.constant 0 : index
    %167 = vector.load %arg4[%c1_174, %c0_175, %c9_176, %c0_177] : memref<2x8x16x16xf32, #tpu.memory_space<vmem>>, vector<1x8x1x16xf32>
    %168 = vector.shape_cast %167 : vector<1x8x1x16xf32> to vector<8x16xf32>
    %169 = vector.shape_cast %166 : vector<8x16xf32> to vector<1x8x1x16xf32>
    tpu.vector_store %arg4[%c1_174, %c0_175, %c9_176, %c0_177], %169 {strides = array<i32>} : memref<2x8x16x16xf32, #tpu.memory_space<vmem>>, vector<1x8x1x16xf32>,
    %170 = vector.extract_strided_slice %129 {offsets = [0, 180], sizes = [8, 16], strides = [1, 1]} : vector<8x288xf32> to vector<8x16xf32>
    %c1_178 = arith.constant 1 : index
    %c0_179 = arith.constant 0 : index
    %c10_180 = arith.constant 10 : index
    %c0_181 = arith.constant 0 : index
    %171 = vector.load %arg4[%c1_178, %c0_179, %c10_180, %c0_181] : memref<2x8x16x16xf32, #tpu.memory_space<vmem>>, vector<1x8x1x16xf32>
    %172 = vector.shape_cast %171 : vector<1x8x1x16xf32> to vector<8x16xf32>
    %173 = vector.shape_cast %170 : vector<8x16xf32> to vector<1x8x1x16xf32>
    tpu.vector_store %arg4[%c1_178, %c0_179, %c10_180, %c0_181], %173 {strides = array<i32>} : memref<2x8x16x16xf32, #tpu.memory_space<vmem>>, vector<1x8x1x16xf32>,
    %174 = vector.extract_strided_slice %129 {offsets = [0, 198], sizes = [8, 16], strides = [1, 1]} : vector<8x288xf32> to vector<8x16xf32>
    %c1_182 = arith.constant 1 : index
    %c0_183 = arith.constant 0 : index
    %c11_184 = arith.constant 11 : index
    %c0_185 = arith.constant 0 : index
    %175 = vector.load %arg4[%c1_182, %c0_183, %c11_184, %c0_185] : memref<2x8x16x16xf32, #tpu.memory_space<vmem>>, vector<1x8x1x16xf32>
    %176 = vector.shape_cast %175 : vector<1x8x1x16xf32> to vector<8x16xf32>
    %177 = vector.shape_cast %174 : vector<8x16xf32> to vector<1x8x1x16xf32>
    tpu.vector_store %arg4[%c1_182, %c0_183, %c11_184, %c0_185], %177 {strides = array<i32>} : memref<2x8x16x16xf32, #tpu.memory_space<vmem>>, vector<1x8x1x16xf32>,
    %178 = vector.extract_strided_slice %129 {offsets = [0, 216], sizes = [8, 16], strides = [1, 1]} : vector<8x288xf32> to vector<8x16xf32>
    %c1_186 = arith.constant 1 : index
    %c0_187 = arith.constant 0 : index
    %c12_188 = arith.constant 12 : index
    %c0_189 = arith.constant 0 : index
    %179 = vector.load %arg4[%c1_186, %c0_187, %c12_188, %c0_189] : memref<2x8x16x16xf32, #tpu.memory_space<vmem>>, vector<1x8x1x16xf32>
    %180 = vector.shape_cast %179 : vector<1x8x1x16xf32> to vector<8x16xf32>
    %181 = vector.shape_cast %178 : vector<8x16xf32> to vector<1x8x1x16xf32>
    tpu.vector_store %arg4[%c1_186, %c0_187, %c12_188, %c0_189], %181 {strides = array<i32>} : memref<2x8x16x16xf32, #tpu.memory_space<vmem>>, vector<1x8x1x16xf32>,
    %182 = vector.extract_strided_slice %129 {offsets = [0, 234], sizes = [8, 16], strides = [1, 1]} : vector<8x288xf32> to vector<8x16xf32>
    %c1_190 = arith.constant 1 : index
    %c0_191 = arith.constant 0 : index
    %c13_192 = arith.constant 13 : index
    %c0_193 = arith.constant 0 : index
    %183 = vector.load %arg4[%c1_190, %c0_191, %c13_192, %c0_193] : memref<2x8x16x16xf32, #tpu.memory_space<vmem>>, vector<1x8x1x16xf32>
    %184 = vector.shape_cast %183 : vector<1x8x1x16xf32> to vector<8x16xf32>
    %185 = vector.shape_cast %182 : vector<8x16xf32> to vector<1x8x1x16xf32>
    tpu.vector_store %arg4[%c1_190, %c0_191, %c13_192, %c0_193], %185 {strides = array<i32>} : memref<2x8x16x16xf32, #tpu.memory_space<vmem>>, vector<1x8x1x16xf32>,
    %186 = vector.extract_strided_slice %129 {offsets = [0, 252], sizes = [8, 16], strides = [1, 1]} : vector<8x288xf32> to vector<8x16xf32>
    %c1_194 = arith.constant 1 : index
    %c0_195 = arith.constant 0 : index
    %c14_196 = arith.constant 14 : index
    %c0_197 = arith.constant 0 : index
    %187 = vector.load %arg4[%c1_194, %c0_195, %c14_196, %c0_197] : memref<2x8x16x16xf32, #tpu.memory_space<vmem>>, vector<1x8x1x16xf32>
    %188 = vector.shape_cast %187 : vector<1x8x1x16xf32> to vector<8x16xf32>
    %189 = vector.shape_cast %186 : vector<8x16xf32> to vector<1x8x1x16xf32>
    tpu.vector_store %arg4[%c1_194, %c0_195, %c14_196, %c0_197], %189 {strides = array<i32>} : memref<2x8x16x16xf32, #tpu.memory_space<vmem>>, vector<1x8x1x16xf32>,
    %190 = vector.extract_strided_slice %129 {offsets = [0, 270], sizes = [8, 16], strides = [1, 1]} : vector<8x288xf32> to vector<8x16xf32>
    %c1_198 = arith.constant 1 : index
    %c0_199 = arith.constant 0 : index
    %c15_200 = arith.constant 15 : index
    %c0_201 = arith.constant 0 : index
    %191 = vector.load %arg4[%c1_198, %c0_199, %c15_200, %c0_201] : memref<2x8x16x16xf32, #tpu.memory_space<vmem>>, vector<1x8x1x16xf32>
    %192 = vector.shape_cast %191 : vector<1x8x1x16xf32> to vector<8x16xf32>
    %193 = vector.shape_cast %190 : vector<8x16xf32> to vector<1x8x1x16xf32>
    tpu.vector_store %arg4[%c1_198, %c0_199, %c15_200, %c0_201], %193 {strides = array<i32>} : memref<2x8x16x16xf32, #tpu.memory_space<vmem>>, vector<1x8x1x16xf32>,
    return
  }
  func.func @transform_0(%arg0: i32) -> (i32, i32, i32) {
    %c0_i32 = arith.constant 0 : i32
    %c0_i32_0 = arith.constant 0 : i32
    %c0_i32_1 = arith.constant 0 : i32
    return %arg0, %c0_i32, %c0_i32_0 : i32, i32, i32
  }
  func.func @transform_1(%arg0: i32) -> (i32, i32) {
    %c0_i32 = arith.constant 0 : i32
    %c0_i32_0 = arith.constant 0 : i32
    %c0_i32_1 = arith.constant 0 : i32
    return %c0_i32, %c0_i32_0 : i32, i32
  }
  func.func @transform_2(%arg0: i32) -> (i32, i32) {
    %c0_i32 = arith.constant 0 : i32
    %c0_i32_0 = arith.constant 0 : i32
    %c0_i32_1 = arith.constant 0 : i32
    return %c0_i32, %c0_i32_0 : i32, i32
  }
  func.func @transform_3(%arg0: i32) -> (i32, i32, i32, i32) {
    %c0_i32 = arith.constant 0 : i32
    %c0_i32_0 = arith.constant 0 : i32
    %c0_i32_1 = arith.constant 0 : i32
    %c0_i32_2 = arith.constant 0 : i32
    return %arg0, %c0_i32, %c0_i32_0, %c0_i32_1 : i32, i32, i32, i32
  }
}

</mosaic_0001>

<bundles_post_ra>
// kernel: tpu_custom_call.1
= control target key start
LH: loop header
LB: loop body
LE: loop exit
PB: predicated region body
PF: predicated region fallthrough
CT: control target
= control target key end

     0   :  { %8 = vsyncpa [#allocation4], 0  ;;  %s4310_s0 = inlined_call_operand.hbm [shape: bf16[2,8,378], index: 0, kind: input, shape index: {}]   ;;  %s4311_s1 = inlined_call_operand.vmem [shape: bf16[8,72], index: 1, kind: input, shape index: {}]   ;;  %s4312_s2 = inlined_call_operand.vmem [shape: f32[8,1], index: 2, kind: input, shape index: {}]   ;;  %s4313_s3 = inlined_call_operand.hbm [shape: f32[2,8,16,16], index: 3, kind: output, shape index: {}]  }
   0x1   :  { %9 = vsyncpa [#allocation5], 0  ;;  %s2910_s12 = smov [#allocation3]   ;;  %s2862_s16 = scalar_lea.hbm %s4310_s0, 384 }
   0x2   :  { %s15_s13 = sshll.u32 %s2910_s12, 4  ;;  %p2863_p0 = scmp.ne.s32.totalorder %s4310_s0, %s2862_s16  ;;  %s16_s13 = int_to_ptr.vmem [resolvable:$true] %s15_s13 }
   0x3   :  { %p2866_p1 = scmp.lt.u32.totalorder %s2862_s16, %s4310_s0 }
   0x5   :  { %p2868_p2 = pnand %p2866_p1, %p2863_p0 }
   0x7   :  { %2871 = shalt.err (!%p2868_p2)
}
   0x8   :  { %s2872_s21 = scalar_lea.vmem %s16_s13, 384  ;;  %p2877_p4 = scmp.lt.s32.totalorder %s16_s13, %s16_s13 }
   0x9   :  { %p2873_p3 = scmp.ne.s32.totalorder %s16_s13, %s2872_s21  ;;  %p2878_p5 = scmp.lt.s32.totalorder %s2872_s21, %s2872_s21 }
   0xb   :  { %p2879_p6 = por %p2878_p5, %p2877_p4 }
   0xd   :  { %p2880_p7 = pnand %p2879_p6, %p2873_p3 }
   0xf   :  { %2883 = shalt.err (!%p2880_p7)
}
  0x10   :  { %s2911_s22 = smov 192   ;;  %s2912_s23 = smov 12  }
  0x11   :  { %21 = dma.hbm_to_vmem [thread:$0]  %s4310_s0, 384, %s16_s13, [#allocation4], %s2911_s22, %s2911_s22, %s2912_s23  }
  0x12   :  { %2906 = dma.done.wait [#allocation4], 384  }
  0x13   :  { %2907 = vsyncadd [#allocation4], 4294966912  ;;  %v2913_v0 = vmov 0   ;;  %v2975_v1 = vld [vmem:[#allocation3] sm:$0xff]  ;;  %v2914_v2 = vmov 0.0   ;;  %s2915_s26 = smov 126  }
  0x14   :  { %2851 = vset.pattern.permute.xlu0 %v2913_v0  ;;  %315 = vmatprep.mubr.bf16.mxu0 %v2913_v0  ;;  %s2916_s27 = smov 127   ;;  %v54_v3 = vld [vmem:[#allocation3 + $0x8] sm:$0xf]  ;;  %v2982_v5 = vld [vmem:[#allocation3 + $0xc] sm:$0xff]  ;;  %vm33_vm0 = vcmask 257024   ;;  %s2917_s0 = smov 110  }
  0x15   :  { %2792 = vmatprep.subr.bf16.mxu1 %v2914_v2  ;;  %57 = vrot.lane.b32.xlu1 %v2975_v1, %s2915_s26  ;;  %v36_v4 = vld [vmem:[#allocation3 + $0x8] sm:$0xf]  ;;  %s2918_s28 = smov 109   ;;  %s2919_s29 = smov 108   ;;  %vm2922_vm1 = vmmov 0   ;;  %v191_v13 = vld [vmem:[%s4312_s2] sm:$0xff] }
  0x16   :  { %39 = vrot.lane.b32.xlu0 %v2975_v1, %s2916_s27  ;;  %v71_v6 = vld [vmem:[#allocation3 + $0x8] sm:$0xf]  ;;  %s2920_s30 = smov 92   ;;  %s2921_s4 = smov 91   ;;  %2802 = vmatprep.mubr.msk.bf16.mxu1 %vm2922_vm1, %v2914_v2  ;;  %v1391_v14 = vld [vmem:[#allocation3 + $0x14] sm:$0xf] }
  0x17   :  { %v31_v7 = vld [vmem:[#allocation3 + $0x8] sm:$0xf]  ;;  %s2923_s5 = smov 90   ;;  %v1407_v15 = vld [vmem:[#allocation3 + $0x14] sm:$0xf]  ;;  %vm45_vm2 = vcmask 1043456  }
  0x18   :  { %34 = vst.msk [vmem:[#allocation2 + $0x8] sm:$0xf] %vm33_vm0, %v31_v7  ;;  %v88_v8 = vld [vmem:[#allocation3 + $0x8] sm:$0xf]  ;;  %v1423_v16 = vld [vmem:[#allocation3 + $0x14] sm:$0xf] }
  0x19   :  { %59 = vrot.lane.b32.xlu1 %v54_v3, %s2915_s26  ;;  %v105_v9 = vld [vmem:[#allocation3 + $0x8] sm:$0xf]  ;;  %v1439_v17 = vld [vmem:[#allocation3 + $0x14] sm:$0xf]  ;;  %vm47_vm3 = vcmask 1039360   ;;  %vm64_vm4 = vcmask 1031168  }
  0x1a   :  { %41 = vrot.lane.b32.xlu0 %v36_v4, %s2916_s27  ;;  %v122_v10 = vld [vmem:[#allocation3 + $0x8] sm:$0xf]  ;;  %v1455_v18 = vld [vmem:[#allocation3 + $0x14] sm:$0xf]  ;;  %vm81_vm5 = vcmask 900096   ;;  %vm98_vm6 = vcmask 891904  }
  0x1b   :  { %v139_v11 = vld [vmem:[#allocation3 + $0x8] sm:$0xf]  ;;  %v1471_v19 = vld [vmem:[#allocation3 + $0x14] sm:$0xf]  ;;  %vm115_vm7 = vcmask 883712   ;;  %vm132_vm8 = vcmask 752640  }
  0x1c   :  { %v156_v12 = vld [vmem:[#allocation3 + $0x8] sm:$0xf]  ;;  %v1487_v20 = vld [vmem:[#allocation3 + $0x14] sm:$0xf]  ;;  %vm149_vm9 = vcmask 744448   ;;  %vm166_vm10 = vcmask 736256  }
  0x1d   :  { %76 = vrot.lane.b32.xlu1 %v71_v6, %s2917_s0  ;;  %v1503_v21 = vld [vmem:[#allocation3 + $0x14] sm:$0xf]  ;;  %vm269_vm11 = vcmask 588800   ;;  %vm422_vm12 = vcmask 122880   ;;  %s2926_s11 = smov 74   ;;  %s2927_s12 = smov 56  }
  0x1e   :  { %74 = vrot.lane.b32.xlu0 %v2975_v1, %s2917_s0  ;;  %v1387_v39 = vld [vmem:[#allocation3 + $0x14] sm:$0xf]  ;;  %s2928_s13 = smov 38   ;;  %s2929_s14 = smov 20   ;;  %vm802_vm13 = vcmask 15360   ;;  %vm1247_vm14 = vcmask 31744  }
  0x1f   :  { %s2930_s15 = smov 112   ;;  %s2931_s16 = smov 94  }
  0x20   :  { %s2932_s17 = smov 76   ;;  %s2933_s18 = smov 2  }
  0x21   :  { %93 = vrot.lane.b32.xlu1 %v88_v8, %s2918_s28  ;;  %s2934_s19 = smov 58   ;;  %s2935_s20 = smov 40  }
  0x22   :  { %91 = vrot.lane.b32.xlu0 %v2975_v1, %s2918_s28  ;;  %s2936_s21 = smov 22   ;;  %s2937_s22 = smov 4  }
  0x23   :  { %s2938_s23 = smov [#allocation6]  }
  0x24   :  { %s2732_s24 = sshll.u32 %s2938_s23, 4  ;;  %s2733_s24 = int_to_ptr.vmem [resolvable:$true] %s2732_s24 }
  0x25   :  { %110 = vrot.lane.b32.xlu1 %v105_v9, %s2919_s29  ;;  %s2884_s25 = scalar_lea.vmem %s2733_s24, 4096  ;;  %p2889_p9 = scmp.lt.s32.totalorder %s2733_s24, %s2733_s24 }
  0x26   :  { %108 = vrot.lane.b32.xlu0 %v2975_v1, %s2919_s29  ;;  %p2885_p8 = scmp.ne.s32.totalorder %s2733_s24, %s2884_s25  ;;  %p2890_p10 = scmp.lt.s32.totalorder %s2884_s25, %s2884_s25 }
  0x28   :  { %p2891_p11 = por %p2890_p10, %p2889_p9 }
  0x29   :  { %127 = vrot.lane.b32.xlu1 %v122_v10, %s2920_s30 }
  0x2a   :  { %125 = vrot.lane.b32.xlu0 %v2975_v1, %s2920_s30  ;;  %p2892_p12 = pnand %p2891_p11, %p2885_p8 }
  0x2d   :  { %144 = vrot.lane.b32.xlu1 %v139_v11, %s2921_s4 }
  0x2e   :  { %142 = vrot.lane.b32.xlu0 %v2975_v1, %s2921_s4 }
  0x31   :  { %161 = vrot.lane.b32.xlu1 %v156_v12, %s2923_s5 }
  0x32   :  { %159 = vrot.lane.b32.xlu0 %v2975_v1, %s2923_s5 }
  0x35   :  { %1394 = vrot.lane.b32.xlu1 %v2982_v5, %s2916_s27 }
  0x36   :  { %194 = vperm.xlu0 %2851, %v191_v13  }
  0x39   :  { %1410 = vrot.lane.b32.xlu1 %v2982_v5, %s2915_s26 }
  0x3a   :  { %1396 = vrot.lane.b32.xlu0 %v1391_v14, %s2916_s27 }
  0x3d   :  { %1426 = vrot.lane.b32.xlu1 %v2982_v5, %s2917_s0 }
  0x3e   :  { %1412 = vrot.lane.b32.xlu0 %v1407_v15, %s2915_s26 }
  0x41   :  { %1442 = vrot.lane.b32.xlu1 %v2982_v5, %s2918_s28 }
  0x42   :  { %1428 = vrot.lane.b32.xlu0 %v1423_v16, %s2917_s0 }
  0x45   :  { %1458 = vrot.lane.b32.xlu1 %v2982_v5, %s2919_s29 }
  0x46   :  { %1444 = vrot.lane.b32.xlu0 %v1439_v17, %s2918_s28 }
  0x49   :  { %1474 = vrot.lane.b32.xlu1 %v2982_v5, %s2920_s30 }
  0x4a   :  { %1460 = vrot.lane.b32.xlu0 %v1455_v18, %s2919_s29 }
  0x4d   :  { %1490 = vrot.lane.b32.xlu1 %v2982_v5, %s2921_s4 }
  0x4e   :  { %1476 = vrot.lane.b32.xlu0 %v1471_v19, %s2920_s30 }
  0x51   :  { %1506 = vrot.lane.b32.xlu1 %v2982_v5, %s2923_s5 }
  0x52   :  { %1492 = vrot.lane.b32.xlu0 %v1487_v20, %s2921_s4 }
  0x56   :  { %1508 = vrot.lane.b32.xlu0 %v1503_v21, %s2923_s5 }
  0x5a   :  { %1540 = vperm.xlu0 %2851, %v191_v13  }
  0x87   :  { %v58_v22 = vpop.permute.xlu1 %57 }
  0x88   :  { %v40_v23 = vpop.permute.xlu0 %39  ;;  %v61_v29 = vrot.slane %v58_v22, 4 }
  0x89   :  { %v43_v24 = vrot.slane %v40_v23, 4 }
  0x8b   :  { %v60_v25 = vpop.permute.xlu1 %59 }
  0x8c   :  { %v42_v26 = vpop.permute.xlu0 %41  ;;  %v62_v27 = vrot.slane %v60_v25, 4  ;;  %69 = vst.msk [vmem:[#allocation2 + $0x20] sm:$0xf] %vm33_vm0, %v60_v25  ;;  %v172_v25 = vld [vmem:[%s4311_s1] sm:$0xf] }
  0x8d   :  { %v44_v28 = vrot.slane %v42_v26, 4  ;;  %52 = vst.msk [vmem:[#allocation2 + $0x14] sm:$0xf] %vm33_vm0, %v42_v26 }
  0x8e   :  { %v63_v31 = vsel %vm45_vm2, %v61_v29, %v62_v27 }
  0x8f   :  { %v46_v30 = vsel %vm45_vm2, %v43_v24, %v44_v28  ;;  %v77_v33 = vpop.permute.xlu1 %76  ;;  %v65_v41 = vsel %vm64_vm4, %v58_v22, %v63_v31 }
  0x90   :  { %v48_v32 = vsel %vm47_vm3, %v40_v23, %v46_v30  ;;  %v75_v34 = vpop.permute.xlu0 %74  ;;  %v79_v35 = vrot.slane %v77_v33, 4  ;;  %86 = vst.msk [vmem:[#allocation2 + $0x2c] sm:$0xf] %vm33_vm0, %v77_v33 }
  0x91   :  { %v78_v36 = vrot.slane %v75_v34, 4  ;;  %v2745_v37 = vcombine.high %v2975_v1, %v48_v32  ;;  %v2744_v38 = vcombine.low %v2975_v1, %v48_v32 }
  0x93   :  { %v80_v40 = vsel %vm45_vm2, %v78_v36, %v79_v35  ;;  %283 = vmatprep.subr.bf16.mxu0 %v2745_v37  ;;  %v94_v43 = vpop.permute.xlu1 %93 }
  0x94   :  { %v82_v42 = vsel %vm81_vm5, %v75_v34, %v80_v40  ;;  %v92_v44 = vpop.permute.xlu0 %91  ;;  %v2852_v45 = vld [vmem:[#allocation2 + $0x8] ss:$12 sps:$4 sm:$0xff]   ;;  %284 = vmatpush1.bf16.msra.mxu0 %v2744_v38  ;;  %v96_v46 = vrot.slane %v94_v43, 4  ;;  %103 = vst.msk [vmem:[#allocation2 + $0x38] sm:$0xf] %vm33_vm0, %v94_v43 }
  0x95   :  { %v95_v47 = vrot.slane %v92_v44, 4  ;;  %1389 = vst.msk [vmem:[#allocation2 + $0x8] sm:$0xf] %vm33_vm0, %v1387_v39  ;;  %v2748_v48 = vcombine.high %v65_v41, %v82_v42  ;;  %v2747_v49 = vcombine.low %v65_v41, %v82_v42  ;;  %2793 = vmatpush3.bf16.msra.mxu1 %v2852_v45 }
  0x96   :  { %2794 = vmatprep.subr.bf16.mxu1 %v2914_v2 }
  0x97   :  { %285 = vmatprep.subr.bf16.mxu0 %v2748_v48  ;;  %v111_v50 = vpop.permute.xlu1 %110  ;;  %v2853_v52 = vld [vmem:[#allocation2 + $0x20] ss:$12 sps:$4 sm:$0xff]   ;;  %v97_v53 = vsel %vm45_vm2, %v95_v47, %v96_v46 }
  0x98   :  { %v109_v51 = vpop.permute.xlu0 %108  ;;  %286 = vmatpush1.bf16.msra.mxu0 %v2747_v49  ;;  %v113_v54 = vrot.slane %v111_v50, 4  ;;  %120 = vst.msk [vmem:[#allocation2 + $0x44] sm:$0xf] %vm33_vm0, %v111_v50  ;;  %v99_v57 = vsel %vm98_vm6, %v92_v44, %v97_v53 }
  0x99   :  { %v112_v55 = vrot.slane %v109_v51, 4  ;;  %2795 = vmatpush3.bf16.msra.mxu1 %v2853_v52 }
  0x9a   :  { %2796 = vmatprep.subr.bf16.mxu1 %v2914_v2 }
  0x9b   :  { %v114_v56 = vsel %vm45_vm2, %v112_v55, %v113_v54  ;;  %v128_v59 = vpop.permute.xlu1 %127 }
  0x9c   :  { %v116_v58 = vsel %vm115_vm7, %v109_v51, %v114_v56  ;;  %v126_v60 = vpop.permute.xlu0 %125  ;;  %v130_v61 = vrot.slane %v128_v59, 4  ;;  %137 = vst.msk [vmem:[#allocation2 + $0x50] sm:$0xf] %vm33_vm0, %v128_v59 }
  0x9d   :  { %v129_v62 = vrot.slane %v126_v60, 4  ;;  %v2751_v63 = vcombine.high %v99_v57, %v116_v58  ;;  %v2750_v1 = vcombine.low %v99_v57, %v116_v58 }
  0x9f   :  { %287 = vmatprep.subr.bf16.mxu0 %v2751_v63  ;;  %v145_v3 = vpop.permute.xlu1 %144  ;;  %v2854_v6 = vld [vmem:[#allocation2 + $0x38] ss:$12 sps:$4 sm:$0xff]   ;;  %v131_v7 = vsel %vm45_vm2, %v129_v62, %v130_v61 }
  0xa0   :  { %v143_v4 = vpop.permute.xlu0 %142  ;;  %288 = vmatpush1.bf16.msra.mxu0 %v2750_v1  ;;  %v147_v8 = vrot.slane %v145_v3, 4  ;;  %154 = vst.msk [vmem:[#allocation2 + $0x5c] sm:$0xf] %vm33_vm0, %v145_v3  ;;  %2797 = vmatpush3.bf16.msra.mxu1 %v2854_v6  ;;  %v133_v11 = vsel %vm132_vm8, %v126_v60, %v131_v7 }
  0xa1   :  { %v146_v9 = vrot.slane %v143_v4, 4  ;;  %2798 = vmatprep.subr.bf16.mxu1 %v2914_v2 }
  0xa3   :  { %v148_v10 = vsel %vm45_vm2, %v146_v9, %v147_v8  ;;  %v162_v13 = vpop.permute.xlu1 %161 }
  0xa4   :  { %v150_v12 = vsel %vm149_vm9, %v143_v4, %v148_v10  ;;  %v160_v14 = vpop.permute.xlu0 %159  ;;  %v164_v15 = vrot.slane %v162_v13, 4  ;;  %171 = vst.msk [vmem:[#allocation2 + $0x68] sm:$0xf] %vm33_vm0, %v162_v13 }
  0xa5   :  { %v163_v16 = vrot.slane %v160_v14, 4  ;;  %v2754_v17 = vcombine.high %v133_v11, %v150_v12  ;;  %v2753_v18 = vcombine.low %v133_v11, %v150_v12 }
  0xa7   :  { %v165_v19 = vsel %vm45_vm2, %v163_v16, %v164_v15  ;;  %289 = vmatprep.subr.bf16.mxu0 %v2754_v17  ;;  %v2855_v21 = vld [vmem:[#allocation2 + $0x50] ss:$12 sps:$4 sm:$0xff]   ;;  %v1395_v22 = vpop.permute.xlu1 %1394 }
  0xa8   :  { %v167_v20 = vsel %vm166_vm10, %v160_v14, %v165_v19  ;;  %290 = vmatpush1.bf16.msra.mxu0 %v2753_v18  ;;  %2799 = vmatpush3.bf16.msra.mxu1 %v2855_v21  ;;  %v1398_v32 = vrot.slane %v1395_v22, 4 }
  0xa9   :  { %v2757_v23 = vcombine.high %v167_v20, %v167_v20  ;;  %v2756_v24 = vcombine.low %v167_v20, %v167_v20  ;;  %2800 = vmatprep.subr.bf16.mxu1 %v2914_v2 }
  0xab   :  { %2759 = vmatprep.subr.msk.bf16.mxu0 %vm45_vm2, %v2757_v23  ;;  %v275_v26 = vsel %vm45_vm2, %v2756_v24, 0  ;;  %v2856_v27 = vld [vmem:[#allocation2 + $0x68] ss:$0 sps:$4 sm:$0xff]   ;;  %v1411_v28 = vpop.permute.xlu1 %1410 }
  0xac   :  { %292 = vmatpush1.bf16.msra.mxu0 %v275_v26  ;;  %v281_v29 = vsel %vm45_vm2, %v2856_v27, 0  ;;  %v1414_v37 = vrot.slane %v1411_v28, 4 }
  0xad   :  { %2801 = vmatpush3.bf16.msra.mxu1 %v281_v29 }
  0xae   :  { %2806 = vmatprep.subr.bf16.mxu1 %v2914_v2 }
  0xaf   :  { %2760 = vmatmul.mubr.msk.bf16.vlgmr.msra.gmra.mrb[0].mxu0 %vm269_vm11, %v172_v25  ;;  %v1427_v30 = vpop.permute.xlu1 %1426 }
  0xb0   :  { %1659 = vmatprep.mubr.bf16.mxu0 %v2913_v0  ;;  %2803 = vmatmul.mubr.msk.bf16.vlgmr.msra.gmra.mrb[0].mxu1 %vm269_vm11, %v172_v25  ;;  %v1430_v44 = vrot.slane %v1427_v30, 4 }
  0xb1   :  { %2816 = vmatprep.mubr.msk.bf16.mxu1 %vm2922_vm1, %v2914_v2 }
  0xb3   :  { %v1443_v34 = vpop.permute.xlu1 %1442 }
  0xb4   :  { %v1446_v50 = vrot.slane %v1443_v34, 4 }
  0xb5   :  { %v3073_v31 = vpop.permute.xlu0 %194 }
  0xb7   :  { %v1459_v42 = vpop.permute.xlu1 %1458 }
  0xb8   :  { %v1462_v57 = vrot.slane %v1459_v42, 4 }
  0xb9   :  { %v1397_v33 = vpop.permute.xlu0 %1396 }
  0xba   :  { %v1399_v35 = vrot.slane %v1397_v33, 4  ;;  %1405 = vst.msk [vmem:[#allocation2 + $0x14] sm:$0xf] %vm33_vm0, %v1397_v33  ;;  %v2924_v33 = vmov 1966171168  }
  0xbb   :  { %v1475_v52 = vpop.permute.xlu1 %1474 }
  0xbc   :  { %v1400_v36 = vsel %vm45_vm2, %v1398_v32, %v1399_v35  ;;  %v1478_v1 = vrot.slane %v1475_v52, 4 }
  0xbd   :  { %v1401_v38 = vsel %vm47_vm3, %v1395_v22, %v1400_v36  ;;  %v1413_v0 = vpop.permute.xlu0 %1412 }
  0xbe   :  { %v1415_v39 = vrot.slane %v1413_v0, 4  ;;  %1421 = vst.msk [vmem:[#allocation2 + $0x20] sm:$0xf] %vm33_vm0, %v1413_v0  ;;  %v2762_v40 = vcombine.low %v2982_v5, %v1401_v38  ;;  %v2763_v41 = vcombine.high %v2982_v5, %v1401_v38 }
  0xbf   :  { %v1491_v62 = vpop.permute.xlu1 %1490 }
  0xc0   :  { %v1416_v43 = vsel %vm45_vm2, %v1414_v37, %v1415_v39  ;;  %1627 = vmatprep.subr.bf16.mxu0 %v2763_v41  ;;  %v1494_v10 = vrot.slane %v1491_v62, 4 }
  0xc1   :  { %v1417_v45 = vsel %vm64_vm4, %v1411_v28, %v1416_v43  ;;  %v1429_v46 = vpop.permute.xlu0 %1428  ;;  %v2857_v47 = vld [vmem:[#allocation2 + $0x8] ss:$12 sps:$4 sm:$0xff]   ;;  %1628 = vmatpush1.bf16.msra.mxu0 %v2762_v40 }
  0xc2   :  { %v1431_v48 = vrot.slane %v1429_v46, 4  ;;  %1437 = vst.msk [vmem:[#allocation2 + $0x2c] sm:$0xf] %vm33_vm0, %v1429_v46  ;;  %2807 = vmatpush3.bf16.msra.mxu1 %v2857_v47 }
  0xc3   :  { %2808 = vmatprep.subr.bf16.mxu1 %v2914_v2  ;;  %v1507_v13 = vpop.permute.xlu1 %1506 }
  0xc4   :  { %v1432_v49 = vsel %vm45_vm2, %v1430_v44, %v1431_v48  ;;  %v1510_v17 = vrot.slane %v1507_v13, 4 }
  0xc5   :  { %v1433_v5 = vsel %vm81_vm5, %v1427_v30, %v1432_v49  ;;  %v1445_v51 = vpop.permute.xlu0 %1444  ;;  %v1518_v30 = vld [vmem:[%s4311_s1] sm:$0xf]  ;;  %s2925_s1 = smov 114  }
  0xc6   :  { %v1447_v53 = vrot.slane %v1445_v51, 4  ;;  %1453 = vst.msk [vmem:[#allocation2 + $0x38] sm:$0xf] %vm33_vm0, %v1445_v51  ;;  %v2765_v54 = vcombine.low %v1417_v45, %v1433_v5  ;;  %v2766_v55 = vcombine.high %v1417_v45, %v1433_v5 }
  0xc8   :  { %v1448_v56 = vsel %vm45_vm2, %v1446_v50, %v1447_v53  ;;  %1629 = vmatprep.subr.bf16.mxu0 %v2766_v55 }
  0xc9   :  { %v1449_v58 = vsel %vm98_vm6, %v1443_v34, %v1448_v56  ;;  %v1461_v59 = vpop.permute.xlu0 %1460  ;;  %v2858_v60 = vld [vmem:[#allocation2 + $0x20] ss:$12 sps:$4 sm:$0xff]   ;;  %1630 = vmatpush1.bf16.msra.mxu0 %v2765_v54  ;;  %v367_v34 = vunpack.c.l.s4 %v2924_v33 }
  0xca   :  { %v1463_v61 = vrot.slane %v1461_v59, 4  ;;  %1469 = vst.msk [vmem:[#allocation2 + $0x44] sm:$0xf] %vm33_vm0, %v1461_v59  ;;  %2809 = vmatpush3.bf16.msra.mxu1 %v2858_v60 }
  0xcb   :  { %2810 = vmatprep.subr.bf16.mxu1 %v2914_v2  ;;  %v368_v35 = vunpack.c.0.s8 %v367_v34 }
  0xcc   :  { %v1464_v63 = vsel %vm45_vm2, %v1462_v57, %v1463_v61 }
  0xcd   :  { %v1465_v3 = vsel %vm115_vm7, %v1459_v42, %v1464_v63  ;;  %v1477_v4 = vpop.permute.xlu0 %1476 }
  0xce   :  { %v1479_v6 = vrot.slane %v1477_v4, 4  ;;  %1485 = vst.msk [vmem:[#allocation2 + $0x50] sm:$0xf] %vm33_vm0, %v1477_v4  ;;  %v2768_v7 = vcombine.low %v1449_v58, %v1465_v3  ;;  %v2769_v8 = vcombine.high %v1449_v58, %v1465_v3 }
  0xd0   :  { %v1480_v9 = vsel %vm45_vm2, %v1478_v1, %v1479_v6  ;;  %1631 = vmatprep.subr.bf16.mxu0 %v2769_v8 }
  0xd1   :  { %v1481_v11 = vsel %vm132_vm8, %v1475_v52, %v1480_v9  ;;  %v1493_v12 = vpop.permute.xlu0 %1492  ;;  %v2859_v14 = vld [vmem:[#allocation2 + $0x38] ss:$12 sps:$4 sm:$0xff]   ;;  %1632 = vmatpush1.bf16.msra.mxu0 %v2768_v7 }
  0xd2   :  { %v1495_v15 = vrot.slane %v1493_v12, 4  ;;  %1501 = vst.msk [vmem:[#allocation2 + $0x5c] sm:$0xf] %vm33_vm0, %v1493_v12  ;;  %2811 = vmatpush3.bf16.msra.mxu1 %v2859_v14 }
  0xd3   :  { %2812 = vmatprep.subr.bf16.mxu1 %v2914_v2 }
  0xd4   :  { %v1496_v16 = vsel %vm45_vm2, %v1494_v10, %v1495_v15 }
  0xd5   :  { %v1497_v18 = vsel %vm149_vm9, %v1491_v62, %v1496_v16  ;;  %v1509_v19 = vpop.permute.xlu0 %1508 }
  0xd6   :  { %v1511_v20 = vrot.slane %v1509_v19, 4  ;;  %1517 = vst.msk [vmem:[#allocation2 + $0x68] sm:$0xf] %vm33_vm0, %v1509_v19  ;;  %v2771_v21 = vcombine.low %v1481_v11, %v1497_v18  ;;  %v2772_v22 = vcombine.high %v1481_v11, %v1497_v18 }
  0xd8   :  { %v1512_v23 = vsel %vm45_vm2, %v1510_v17, %v1511_v20  ;;  %1633 = vmatprep.subr.bf16.mxu0 %v2772_v22 }
  0xd9   :  { %v1513_v24 = vsel %vm166_vm10, %v1507_v13, %v1512_v23  ;;  %v2860_v25 = vld [vmem:[#allocation2 + $0x50] ss:$12 sps:$4 sm:$0xff]   ;;  %1634 = vmatpush1.bf16.msra.mxu0 %v2771_v21 }
  0xda   :  { %v2775_v26 = vcombine.high %v1513_v24, %v1513_v24  ;;  %v2774_v27 = vcombine.low %v1513_v24, %v1513_v24  ;;  %2813 = vmatpush3.bf16.msra.mxu1 %v2860_v25 }
  0xdb   :  { %2814 = vmatprep.subr.bf16.mxu1 %v2914_v2  ;;  %v369_v2 = vlaneseq }
  0xdc   :  { %2777 = vmatprep.subr.msk.bf16.mxu0 %vm45_vm2, %v2775_v26  ;;  %v1619_v28 = vsel %vm45_vm2, %v2774_v27, 0 }
  0xdd   :  { %v2861_v29 = vld [vmem:[#allocation2 + $0x68] ss:$0 sps:$4 sm:$0xff]   ;;  %1636 = vmatpush1.bf16.msra.mxu0 %v1619_v28  ;;  %v3113_v36 = vshrl.u32 %v369_v2, 7 }
  0xde   :  { %v1625_v32 = vsel %vm45_vm2, %v2861_v29, 0 }
  0xdf   :  { %2815 = vmatpush3.bf16.msra.mxu1 %v1625_v32  ;;  %v3116_v37 = vsub.s32 %v368_v35, %v3113_v36 }
  0xe0   :  { %2778 = vmatmul.mubr.msk.bf16.vlgmr.msra.gmra.mrb[4].mxu0 %vm269_vm11, %v1518_v30 }
  0xe2   :  { %2817 = vmatmul.mubr.msk.bf16.vlgmr.msra.gmra.mrb[4].mxu1 %vm269_vm11, %v1518_v30  ;;  %v1541_v30 = vpop.permute.xlu0 %1540 }
 0x182   :  { %v317_v38 = vpop.f32.mrb[0].mxu0 }
 0x183   :  { %v3119_v0 = vadd.f32 %v317_v38, %v3073_v31  ;;  %v319_v39 = vpop.f32.mrb[1].mxu0  ;;  %v358_v42 = vpop.f32.mrb[0].mxu1  ;;  %v3241_v38 = vsub.s32 1, %v3113_v36 }
 0x184   :  { %v3122_v40 = vadd.f32 %v319_v39, %v3073_v31  ;;  %v321_v41 = vpop.f32.mrb[2].mxu0  ;;  %v3129_v46 = vadd.f32 %v358_v42, %v3073_v31  ;;  %v2804_v47 = vpop.f32.mrb[1].mxu1  ;;  %v3140_v31 = vsub.s32 0, %v3113_v36 }
 0x185   :  { %v365_v43 = vcombine.high %v3119_v0, %v3119_v0  ;;  %v372_v44 = vrot.slane %v3119_v0, %v3116_v37  ;;  %v322_v45 = vpop.f32.mrb[3].mxu0  ;;  %v361_v49 = vpop.f32.mrb[2].mxu1 }
 0x186   :  { %v656_v48 = vcombine.low %v3119_v0, %v3122_v40  ;;  %v657_v52 = vcombine.high %v3119_v0, %v3122_v40  ;;  %v1272_v53 = vcombine.high %v3129_v46, %v3129_v46  ;;  %v2805_v54 = vpop.f32.mrb[3].mxu1  ;;  %v1279_v55 = vrot.slane %v3129_v46, %v3116_v37 }
 0x187   :  { %v379_v50 = vrot.slane %v365_v43, %v3116_v37  ;;  %v380_v5 = vcombine.high %v372_v44, %v372_v44  ;;  %v388_v51 = vrot.slane %v372_v44, %v3116_v37  ;;  %v1101_v16 = vcombine.low %v3122_v40, %v3129_v46 }
 0x188   :  { %v1295_v60 = vrot.slane %v1279_v55, %v3116_v37  ;;  %v1287_v61 = vcombine.high %v1279_v55, %v1279_v55  ;;  %v1286_v62 = vrot.slane %v1272_v53, %v3116_v37  ;;  %v1102_v17 = vcombine.high %v3122_v40, %v3129_v46 }
 0x189   :  { %v381_v56 = vcombine.high %v379_v50, %v379_v50  ;;  %v3145_v57 = vrot.slane %v379_v50, %v3116_v37  ;;  %v402_v58 = vrot.slane %v380_v5, %v3116_v37  ;;  %v3148_v59 = vcombine.high %v388_v51, %v388_v51  ;;  %423 = vst.msk [vmem:[#allocation6] sm:$0x1] %vm422_vm12, %v388_v51 }
 0x18a   :  { %v1324_v4 = vrot.slane %v1295_v60, %v3140_v31  ;;  %v1309_v6 = vrot.slane %v1287_v61, %v3116_v37  ;;  %v1317_v8 = vcombine.high %v1295_v60, %v1295_v60  ;;  %v1288_v11 = vcombine.high %v1286_v62, %v1286_v62 }
 0x18b   :  { %v3154_v63 = vrot.slane %v381_v56, %v3116_v37  ;;  %v3158_v1 = vcombine.high %v3145_v57, %v3145_v57  ;;  %v3160_v3 = vcombine.high %v402_v58, %v402_v58  ;;  %424 = vst.msk [vmem:[#allocation6 + $0x10] sm:$0x1] %vm422_vm12, %v402_v58  ;;  %425 = vst.msk [vmem:[#allocation6 + $0x20] sm:$0x1] %vm422_vm12, %v3148_v59 }
 0x18c   :  { %427 = vst.msk [vmem:[#allocation6 + $0x40] sm:$0x1] %vm422_vm12, %v3145_v57  ;;  %1353 = vrot.lane.b32.xlu0 %v1324_v4, %s2925_s1  ;;  %v1328_v9 = vrot.slane %v1309_v6, %v3140_v31  ;;  %v1319_v10 = vcombine.high %v1309_v6, %v1309_v6  ;;  %v1332_v12 = vrot.slane %v1317_v8, %v3140_v31 }
 0x18d   :  { %v3171_v7 = vcombine.high %v3154_v63, %v3154_v63  ;;  %426 = vst.msk [vmem:[#allocation6 + $0x30] sm:$0x1] %vm422_vm12, %v3160_v3  ;;  %428 = vst.msk [vmem:[#allocation6 + $0x50] sm:$0x1] %vm422_vm12, %v3154_v63  ;;  %v1302_v13 = vrot.slane %v1286_v62, %v3116_v37  ;;  %v1316_v15 = vrot.slane %v1288_v11, %v3116_v37 }
 0x18e   :  { %429 = vst.msk [vmem:[#allocation6 + $0x60] sm:$0x1] %vm422_vm12, %v3158_v1  ;;  %1355 = vrot.lane.b32.xlu1 %v1328_v9, %s2925_s1  ;;  %v1336_v14 = vrot.slane %v1319_v10, %v3140_v31  ;;  %v434_v22 = vrot.slane %v388_v51, %v3140_v31  ;;  %v438_v25 = vrot.slane %v402_v58, %v3140_v31 }
 0x18f   :  { %430 = vst.msk [vmem:[#allocation6 + $0x70] sm:$0x1] %vm422_vm12, %v3171_v7  ;;  %v1340_v18 = vrot.slane %v1302_v13, %v3140_v31  ;;  %v1318_v19 = vcombine.high %v1302_v13, %v1302_v13  ;;  %v1344_v20 = vrot.slane %v1316_v15, %v3140_v31  ;;  %v1320_v23 = vcombine.high %v1316_v15, %v1316_v15 }
 0x190   :  { %1357 = vrot.lane.b32.xlu0 %v1332_v12, %s2925_s1  ;;  %v3211_v26 = vrot.slane %v3122_v40, %v3116_v37  ;;  %v3228_v29 = vrot.slane %v656_v48, %v3116_v37  ;;  %v3247_v39 = vrot.slane %v657_v52, %v3116_v37  ;;  %v442_v12 = vrot.slane %v3148_v59, %v3140_v31 }
 0x191   :  { %v1348_v21 = vrot.slane %v1318_v19, %v3140_v31  ;;  %v1352_v24 = vrot.slane %v1320_v23, %v3140_v31  ;;  %v450_v15 = vrot.slane %v3145_v57, %v3140_v31  ;;  %v3346_v59 = vrot.slane %v1101_v16, %v3116_v37 }
 0x192   :  { %1359 = vrot.lane.b32.xlu1 %v1336_v14, %s2925_s1  ;;  %v3218_v27 = vrot.slane %v3211_v26, %v3116_v37  ;;  %v3238_v35 = vrot.slane %v3228_v29, %v3116_v37  ;;  %v842_v51 = vcombine.high %v3211_v26, %v3211_v26  ;;  %v3269_v53 = vrot.slane %v3247_v39, %v3116_v37 }
 0x193   :  { %v3352_v57 = vrot.slane %v3346_v59, %v3116_v37 }
 0x194   :  { %1361 = vrot.lane.b32.xlu0 %v1340_v18, %s2925_s1  ;;  %v879_v28 = vrot.slane %v3218_v27, %v3140_v31  ;;  %v713_v52 = vrot.slane %v3238_v35, %v3241_v38  ;;  %v745_v8 = vrot.slane %v3269_v53, %v3241_v38  ;;  %v3316_v9 = vrot.slane %v842_v51, %v3116_v37 }
 0x195   :  { %v3358_v18 = vrot.slane %v1102_v17, %v3116_v37  ;;  %v1158_v16 = vrot.slane %v3352_v57, %v3241_v38  ;;  %v446_v17 = vrot.slane %v3160_v3, %v3140_v31  ;;  %v827_v3 = vcombine.high %v3122_v40, %v3122_v40 }
 0x196   :  { %1363 = vrot.lane.b32.xlu1 %v1344_v20, %s2925_s1  ;;  %v883_v10 = vrot.slane %v3316_v9, %v3140_v31  ;;  %v454_v20 = vrot.slane %v3154_v63, %v3140_v31  ;;  %v709_v63 = vrot.slane %v3238_v35, %v3140_v31  ;;  %v872_v23 = vcombine.high %v3218_v27, %v3218_v27 }
 0x197   :  { %v3366_v19 = vrot.slane %v3358_v18, %v3116_v37 }
 0x198   :  { %1365 = vrot.lane.b32.xlu0 %v1348_v21, %s2925_s1  ;;  %v3395_v21 = vrot.slane %v827_v3, %v3116_v37 }
 0x199   :  { %v1190_v46 = vrot.slane %v3366_v19, %v3241_v38 }
 0x19a   :  { %463 = vrot.lane.b32.xlu1 %v434_v22, %s2917_s0 }
 0x19c   :  { %495 = vrot.lane.b32.xlu0 %v434_v22, %s2920_s30 }
 0x19e   :  { %1367 = vrot.lane.b32.xlu1 %v1352_v24, %s2925_s1  ;;  %v3405_v24 = vrot.slane %v872_v23, %v3140_v31 }
 0x1a0   :  { %527 = vrot.lane.b32.xlu0 %v434_v22, %s2926_s11 }
 0x1a2   :  { %465 = vrot.lane.b32.xlu1 %v438_v25, %s2917_s0 }
 0x1a4   :  { %559 = vrot.lane.b32.xlu0 %v434_v22, %s2927_s12 }
 0x1a6   :  { %497 = vrot.lane.b32.xlu1 %v438_v25, %s2920_s30 }
 0x1a8   :  { %591 = vrot.lane.b32.xlu0 %v434_v22, %s2928_s13 }
 0x1aa   :  { %529 = vrot.lane.b32.xlu1 %v438_v25, %s2926_s11 }
 0x1ac   :  { %623 = vrot.lane.b32.xlu0 %v434_v22, %s2929_s14  ;;  %v741_v22 = vrot.slane %v3269_v53, %v3140_v31 }
 0x1ae   :  { %561 = vrot.lane.b32.xlu1 %v438_v25, %s2927_s12 }
 0x1b0   :  { %908 = vrot.lane.b32.xlu0 %v879_v28, %s2930_s15 }
 0x1b2   :  { %593 = vrot.lane.b32.xlu1 %v438_v25, %s2928_s13 }
 0x1b3   :  { %v1661_v32 = vpop.f32.mrb[4].mxu0 }
 0x1b4   :  { %v3232_v33 = vadd.f32 %v1661_v32, %v1541_v30  ;;  %v1663_v34 = vpop.f32.mrb[5].mxu0  ;;  %940 = vrot.lane.b32.xlu0 %v879_v28, %s2931_s16 }
 0x1b5   :  { %v3234_v2 = vadd.f32 %v1663_v34, %v1541_v30  ;;  %v1665_v41 = vpop.f32.mrb[6].mxu0  ;;  %v1702_v42 = vpop.f32.mrb[4].mxu1  ;;  %v672_v34 = vcombine.high %v3228_v29, %v3228_v29 }
 0x1b6   :  { %v1709_v43 = vcombine.high %v3232_v33, %v3232_v33  ;;  %v1716_v44 = vrot.slane %v3232_v33, %v3116_v37  ;;  %v1666_v45 = vpop.f32.mrb[7].mxu0  ;;  %v2818_v47 = vpop.f32.mrb[5].mxu1  ;;  %625 = vrot.lane.b32.xlu1 %v438_v25, %s2929_s14  ;;  %v3324_v11 = vadd.f32 %v1702_v42, %v1541_v30  ;;  %v3409_v25 = vrot.slane %v3395_v21, %v3116_v37 }
 0x1b7   :  { %v2000_v36 = vcombine.low %v3232_v33, %v3234_v2  ;;  %v2001_v50 = vcombine.high %v3232_v33, %v3234_v2  ;;  %v1705_v5 = vpop.f32.mrb[6].mxu1  ;;  %v673_v45 = vcombine.high %v3247_v39, %v3247_v39 }
 0x1b8   :  { %v1723_v0 = vrot.slane %v1709_v43, %v3116_v37  ;;  %v1724_v48 = vcombine.high %v1716_v44, %v1716_v44  ;;  %v3259_v49 = vrot.slane %v1716_v44, %v3116_v37  ;;  %v2819_v54 = vpop.f32.mrb[7].mxu1  ;;  %972 = vrot.lane.b32.xlu0 %v879_v28, %s2932_s17  ;;  %v2444_v13 = vcombine.low %v3234_v2, %v3324_v11 }
 0x1b9   :  { %v2445_v14 = vcombine.high %v3234_v2, %v3324_v11  ;;  %v3436_v44 = vrot.slane %v672_v34, %v3116_v37 }
 0x1ba   :  { %v1725_v55 = vcombine.high %v1723_v0, %v1723_v0  ;;  %v3272_v56 = vrot.slane %v1723_v0, %v3116_v37  ;;  %v3275_v58 = vrot.slane %v1724_v48, %v3116_v37  ;;  %v3279_v60 = vcombine.high %v3259_v49, %v3259_v49  ;;  %1767 = vst.msk [vmem:[#allocation6 + $0x80] sm:$0x1] %vm422_vm12, %v3259_v49 }
 0x1bb   :  { %772 = vrot.lane.b32.xlu1 %v713_v52, %s2933_s18  ;;  %v721_v0 = vrot.slane %v3436_v44, %v3241_v38  ;;  %v3449_v48 = vcombine.high %v3238_v35, %v3238_v35  ;;  %v3459_v52 = vrot.slane %v673_v45, %v3116_v37 }
 0x1bc   :  { %v3285_v61 = vrot.slane %v1725_v55, %v3116_v37  ;;  %v3289_v62 = vcombine.high %v3272_v56, %v3272_v56  ;;  %v3293_v4 = vcombine.high %v3275_v58, %v3275_v58  ;;  %1768 = vst.msk [vmem:[#allocation6 + $0x90] sm:$0x1] %vm422_vm12, %v3275_v58  ;;  %1769 = vst.msk [vmem:[#allocation6 + $0xa0] sm:$0x1] %vm422_vm12, %v3279_v60  ;;  %1004 = vrot.lane.b32.xlu0 %v879_v28, %s2934_s19 }
 0x1bd   :  { %1771 = vst.msk [vmem:[#allocation6 + $0xc0] sm:$0x1] %vm422_vm12, %v3272_v56  ;;  %v729_v39 = vrot.slane %v3449_v48, %v3241_v38  ;;  %v753_v55 = vrot.slane %v3459_v52, %v3241_v38 }
 0x1be   :  { %v3304_v6 = vcombine.high %v3285_v61, %v3285_v61  ;;  %1770 = vst.msk [vmem:[#allocation6 + $0xb0] sm:$0x1] %vm422_vm12, %v3293_v4  ;;  %1772 = vst.msk [vmem:[#allocation6 + $0xd0] sm:$0x1] %vm422_vm12, %v3285_v61 }
 0x1bf   :  { %1773 = vst.msk [vmem:[#allocation6 + $0xe0] sm:$0x1] %vm422_vm12, %v3289_v62  ;;  %788 = vrot.lane.b32.xlu1 %v745_v8, %s2933_s18  ;;  %v3470_v8 = vcombine.high %v3269_v53, %v3269_v53  ;;  %v843_v53 = vcombine.high %v3395_v21, %v3395_v21 }
 0x1c0   :  { %1774 = vst.msk [vmem:[#allocation6 + $0xf0] sm:$0x1] %vm422_vm12, %v3304_v6  ;;  %1036 = vrot.lane.b32.xlu0 %v879_v28, %s2935_s20 }
 0x1c1   :  { %v3492_v3 = vrot.slane %v843_v53, %v3116_v37 }
 0x1c3   :  { %910 = vrot.lane.b32.xlu1 %v883_v10, %s2930_s15  ;;  %v3502_v21 = vrot.slane %v3492_v3, %v3140_v31 }
 0x1c4   :  { %1068 = vrot.lane.b32.xlu0 %v879_v28, %s2936_s21  ;;  %v3418_v28 = vrot.slane %v3409_v25, %v3140_v31 }
 0x1c7   :  { %942 = vrot.lane.b32.xlu1 %v883_v10, %s2931_s16 }
 0x1c8   :  { %467 = vrot.lane.b32.xlu0 %v442_v12, %s2917_s0 }
 0x1cb   :  { %974 = vrot.lane.b32.xlu1 %v883_v10, %s2932_s17 }
 0x1cc   :  { %471 = vrot.lane.b32.xlu0 %v450_v15, %s2917_s0 }
 0x1cf   :  { %1006 = vrot.lane.b32.xlu1 %v883_v10, %s2934_s19 }
 0x1d0   :  { %499 = vrot.lane.b32.xlu0 %v442_v12, %s2920_s30 }
 0x1d3   :  { %1038 = vrot.lane.b32.xlu1 %v883_v10, %s2935_s20 }
 0x1d4   :  { %503 = vrot.lane.b32.xlu0 %v450_v15, %s2920_s30 }
 0x1d7   :  { %1070 = vrot.lane.b32.xlu1 %v883_v10, %s2936_s21 }
 0x1d8   :  { %531 = vrot.lane.b32.xlu0 %v442_v12, %s2926_s11 }
 0x1db   :  { %1217 = vrot.lane.b32.xlu1 %v1158_v16, %s2937_s22  ;;  %v874_v16 = vcombine.high %v3316_v9, %v3316_v9 }
 0x1dc   :  { %535 = vrot.lane.b32.xlu0 %v450_v15, %s2926_s11 }
 0x1df   :  { %1233 = vrot.lane.b32.xlu1 %v1190_v46, %s2937_s22 }
 0x1e0   :  { %563 = vrot.lane.b32.xlu0 %v442_v12, %s2927_s12 }
 0x1e3   :  { %469 = vrot.lane.b32.xlu1 %v446_v17, %s2917_s0 }
 0x1e4   :  { %567 = vrot.lane.b32.xlu0 %v450_v15, %s2927_s12 }
 0x1e7   :  { %473 = vrot.lane.b32.xlu1 %v454_v20, %s2917_s0 }
 0x1e8   :  { %595 = vrot.lane.b32.xlu0 %v442_v12, %s2928_s13 }
 0x1eb   :  { %501 = vrot.lane.b32.xlu1 %v446_v17, %s2920_s30 }
 0x1ec   :  { %599 = vrot.lane.b32.xlu0 %v450_v15, %s2928_s13 }
 0x1ef   :  { %505 = vrot.lane.b32.xlu1 %v454_v20, %s2920_s30 }
 0x1f0   :  { %627 = vrot.lane.b32.xlu0 %v442_v12, %s2929_s14 }
 0x1f3   :  { %533 = vrot.lane.b32.xlu1 %v446_v17, %s2926_s11 }
 0x1f4   :  { %631 = vrot.lane.b32.xlu0 %v450_v15, %s2929_s14  ;;  %v761_v15 = vrot.slane %v3470_v8, %v3241_v38 }
 0x1f7   :  { %537 = vrot.lane.b32.xlu1 %v454_v20, %s2926_s11 }
 0x1f8   :  { %770 = vrot.lane.b32.xlu0 %v709_v63, %s2933_s18 }
 0x1fb   :  { %565 = vrot.lane.b32.xlu1 %v446_v17, %s2927_s12 }
 0x1fc   :  { %786 = vrot.lane.b32.xlu0 %v741_v22, %s2933_s18 }
 0x1fe   :  { %v1354_v40 = vpop.permute.xlu0 %1353 }
 0x1ff   :  { %569 = vrot.lane.b32.xlu1 %v454_v20, %s2927_s12  ;;  %1377 = vst.msk [vmem:[#allocation6 + $0xf] sm:$0x1] %vm422_vm12, %v1354_v40 }
 0x200   :  { %v1356_v26 = vpop.permute.xlu1 %1355  ;;  %912 = vrot.lane.b32.xlu0 %v3405_v24, %s2930_s15 }
 0x201   :  { %1378 = vst.msk [vmem:[#allocation6 + $0x1f] sm:$0x1] %vm422_vm12, %v1356_v26 }
 0x202   :  { %v1358_v27 = vpop.permute.xlu0 %1357 }
 0x203   :  { %597 = vrot.lane.b32.xlu1 %v446_v17, %s2928_s13  ;;  %1379 = vst.msk [vmem:[#allocation6 + $0x2f] sm:$0x1] %vm422_vm12, %v1358_v27 }
 0x204   :  { %v1360_v30 = vpop.permute.xlu1 %1359  ;;  %916 = vrot.lane.b32.xlu0 %v3418_v28, %s2930_s15 }
 0x205   :  { %1380 = vst.msk [vmem:[#allocation6 + $0x3f] sm:$0x1] %vm422_vm12, %v1360_v30 }
 0x206   :  { %v1362_v32 = vpop.permute.xlu0 %1361 }
 0x207   :  { %601 = vrot.lane.b32.xlu1 %v454_v20, %s2928_s13  ;;  %1381 = vst.msk [vmem:[#allocation6 + $0x4f] sm:$0x1] %vm422_vm12, %v1362_v32 }
 0x208   :  { %v1364_v41 = vpop.permute.xlu1 %1363  ;;  %944 = vrot.lane.b32.xlu0 %v3405_v24, %s2931_s16 }
 0x209   :  { %1382 = vst.msk [vmem:[#allocation6 + $0x5f] sm:$0x1] %vm422_vm12, %v1364_v41 }
 0x20a   :  { %v1366_v42 = vpop.permute.xlu0 %1365 }
 0x20b   :  { %629 = vrot.lane.b32.xlu1 %v446_v17, %s2929_s14  ;;  %1383 = vst.msk [vmem:[#allocation6 + $0x6f] sm:$0x1] %vm422_vm12, %v1366_v42  ;;  %v458_v42 = vrot.slane %v3158_v1, %v3140_v31 }
 0x20c   :  { %v464_v43 = vpop.permute.xlu1 %463  ;;  %948 = vrot.lane.b32.xlu0 %v3418_v28, %s2931_s16 }
 0x20d   :  { %487 = vst.msk [vmem:[#allocation6 + $0x1] sm:$0x1] %vm422_vm12, %v464_v43 }
 0x20e   :  { %v496_v29 = vpop.permute.xlu0 %495 }
 0x20f   :  { %633 = vrot.lane.b32.xlu1 %v454_v20, %s2929_s14  ;;  %519 = vst.msk [vmem:[#allocation6 + $0x2] sm:$0x1] %vm422_vm12, %v496_v29  ;;  %v3489_v20 = vrot.slane %v874_v16, %v3140_v31 }
 0x210   :  { %v1368_v47 = vpop.permute.xlu1 %1367  ;;  %976 = vrot.lane.b32.xlu0 %v3405_v24, %s2932_s17 }
 0x211   :  { %1384 = vst.msk [vmem:[#allocation6 + $0x7f] sm:$0x1] %vm422_vm12, %v1368_v47 }
 0x212   :  { %v528_v5 = vpop.permute.xlu0 %527 }
 0x213   :  { %776 = vrot.lane.b32.xlu1 %v721_v0, %s2933_s18  ;;  %551 = vst.msk [vmem:[#allocation6 + $0x3] sm:$0x1] %vm422_vm12, %v528_v5 }
 0x214   :  { %v466_v51 = vpop.permute.xlu1 %465  ;;  %980 = vrot.lane.b32.xlu0 %v3418_v28, %s2932_s17 }
 0x215   :  { %488 = vst.msk [vmem:[#allocation6 + $0x11] sm:$0x1] %vm422_vm12, %v466_v51 }
 0x216   :  { %v560_v35 = vpop.permute.xlu0 %559 }
 0x217   :  { %780 = vrot.lane.b32.xlu1 %v729_v39, %s2933_s18  ;;  %583 = vst.msk [vmem:[#allocation6 + $0x4] sm:$0x1] %vm422_vm12, %v560_v35  ;;  %v1117_v39 = vcombine.high %v3346_v59, %v3346_v59  ;;  %v717_v59 = vrot.slane %v3436_v44, %v3140_v31 }
 0x218   :  { %v498_v54 = vpop.permute.xlu1 %497  ;;  %1008 = vrot.lane.b32.xlu0 %v3405_v24, %s2934_s19 }
 0x219   :  { %520 = vst.msk [vmem:[#allocation6 + $0x12] sm:$0x1] %vm422_vm12, %v498_v54 }
 0x21a   :  { %v592_v10 = vpop.permute.xlu0 %591 }
 0x21b   :  { %792 = vrot.lane.b32.xlu1 %v753_v55, %s2933_s18  ;;  %615 = vst.msk [vmem:[#allocation6 + $0x5] sm:$0x1] %vm422_vm12, %v592_v10  ;;  %v3569_v10 = vrot.slane %v1117_v39, %v3116_v37  ;;  %v704_v39 = vcombine.high %v3436_v44, %v3436_v44 }
 0x21c   :  { %v530_v12 = vpop.permute.xlu1 %529  ;;  %1012 = vrot.lane.b32.xlu0 %v3418_v28, %s2934_s19 }
 0x21d   :  { %552 = vst.msk [vmem:[#allocation6 + $0x13] sm:$0x1] %vm422_vm12, %v530_v12  ;;  %v1166_v53 = vrot.slane %v3569_v10, %v3241_v38 }
 0x21e   :  { %v624_v46 = vpop.permute.xlu0 %623 }
 0x21f   :  { %796 = vrot.lane.b32.xlu1 %v761_v15, %s2933_s18  ;;  %647 = vst.msk [vmem:[#allocation6 + $0x6] sm:$0x1] %vm422_vm12, %v624_v46  ;;  %v1118_v15 = vcombine.high %v3358_v18, %v3358_v18  ;;  %v3585_v46 = vcombine.high %v3352_v57, %v3352_v57 }
 0x220   :  { %v562_v17 = vpop.permute.xlu1 %561  ;;  %1040 = vrot.lane.b32.xlu0 %v3405_v24, %s2935_s20 }
 0x221   :  { %584 = vst.msk [vmem:[#allocation6 + $0x14] sm:$0x1] %vm422_vm12, %v562_v17 }
 0x222   :  { %v909_v9 = vpop.permute.xlu0 %908 }
 0x223   :  { %914 = vrot.lane.b32.xlu1 %v3489_v20, %s2930_s15  ;;  %932 = vst.msk [vmem:[#allocation6 + $0x8] sm:$0x1] %vm422_vm12, %v909_v9  ;;  %v1174_v9 = vrot.slane %v3585_v46, %v3241_v38 }
 0x224   :  { %v594_v63 = vpop.permute.xlu1 %593  ;;  %1044 = vrot.lane.b32.xlu0 %v3418_v28, %s2935_s20 }
 0x225   :  { %616 = vst.msk [vmem:[#allocation6 + $0x15] sm:$0x1] %vm422_vm12, %v594_v63  ;;  %v3595_v63 = vrot.slane %v1118_v15, %v3116_v37  ;;  %v1170_v15 = vrot.slane %v3585_v46, %v3140_v31 }
 0x226   :  { %v941_v22 = vpop.permute.xlu0 %940 }
 0x227   :  { %918 = vrot.lane.b32.xlu1 %v3502_v21, %s2930_s15  ;;  %964 = vst.msk [vmem:[#allocation6 + $0x9] sm:$0x1] %vm422_vm12, %v941_v22  ;;  %v1198_v22 = vrot.slane %v3595_v63, %v3241_v38 }
 0x228   :  { %v626_v23 = vpop.permute.xlu1 %625  ;;  %1072 = vrot.lane.b32.xlu0 %v3405_v24, %s2936_s21  ;;  %v1154_v24 = vrot.slane %v3352_v57, %v3140_v31 }
 0x229   :  { %648 = vst.msk [vmem:[#allocation6 + $0x16] sm:$0x1] %vm422_vm12, %v626_v23  ;;  %v3607_v23 = vcombine.high %v3366_v19, %v3366_v19 }
 0x22a   :  { %v973_v40 = vpop.permute.xlu0 %972 }
 0x22b   :  { %946 = vrot.lane.b32.xlu1 %v3489_v20, %s2931_s16  ;;  %996 = vst.msk [vmem:[#allocation6 + $0xa] sm:$0x1] %vm422_vm12, %v973_v40 }
 0x22c   :  { %1076 = vrot.lane.b32.xlu0 %v3418_v28, %s2936_s21  ;;  %v1186_v28 = vrot.slane %v3366_v19, %v3140_v31  ;;  %v1206_v19 = vrot.slane %v3607_v23, %v3241_v38 }
 0x22d   :  { %v3514_v26 = vpop.permute.xlu1 %772 }
 0x22e   :  { %v1005_v27 = vpop.permute.xlu0 %1004 }
 0x22f   :  { %950 = vrot.lane.b32.xlu1 %v3502_v21, %s2931_s16  ;;  %1028 = vst.msk [vmem:[#allocation6 + $0xb] sm:$0x1] %vm422_vm12, %v1005_v27  ;;  %v757_v27 = vrot.slane %v3470_v8, %v3140_v31  ;;  %v462_v8 = vrot.slane %v3171_v7, %v3140_v31 }
 0x230   :  { %1215 = vrot.lane.b32.xlu0 %v1154_v24, %s2937_s22  ;;  %v873_v24 = vcombine.high %v3409_v25, %v3409_v25 }
 0x231   :  { %v3523_v30 = vpop.permute.xlu1 %788 }
 0x232   :  { %v1037_v32 = vpop.permute.xlu0 %1036 }
 0x233   :  { %978 = vrot.lane.b32.xlu1 %v3489_v20, %s2932_s17  ;;  %1060 = vst.msk [vmem:[#allocation6 + $0xc] sm:$0x1] %vm422_vm12, %v1037_v32 }
 0x234   :  { %1231 = vrot.lane.b32.xlu0 %v1186_v28, %s2937_s22 }
 0x235   :  { %v911_v34 = vpop.permute.xlu1 %910 }
 0x236   :  { %933 = vst.msk [vmem:[#allocation6 + $0x18] sm:$0x1] %vm422_vm12, %v911_v34  ;;  %v1069_v41 = vpop.permute.xlu0 %1068  ;;  %v903_v34 = vrot.slane %v873_v24, %v3140_v31  ;;  %v1149_v24 = vcombine.high %v3569_v10, %v3569_v10 }
 0x237   :  { %982 = vrot.lane.b32.xlu1 %v3502_v21, %s2932_s17  ;;  %1092 = vst.msk [vmem:[#allocation6 + $0xd] sm:$0x1] %vm422_vm12, %v1069_v41 }
 0x238   :  { %475 = vrot.lane.b32.xlu0 %v458_v42, %s2917_s0 }
 0x239   :  { %v943_v43 = vpop.permute.xlu1 %942 }
 0x23a   :  { %965 = vst.msk [vmem:[#allocation6 + $0x19] sm:$0x1] %vm422_vm12, %v943_v43  ;;  %v468_v29 = vpop.permute.xlu0 %467 }
 0x23b   :  { %1010 = vrot.lane.b32.xlu1 %v3489_v20, %s2934_s19  ;;  %489 = vst.msk [vmem:[#allocation6 + $0x21] sm:$0x1] %vm422_vm12, %v468_v29 }
 0x23c   :  { %507 = vrot.lane.b32.xlu0 %v458_v42, %s2920_s30 }
 0x23d   :  { %v975_v45 = vpop.permute.xlu1 %974 }
 0x23e   :  { %997 = vst.msk [vmem:[#allocation6 + $0x1a] sm:$0x1] %vm422_vm12, %v975_v45  ;;  %v472_v47 = vpop.permute.xlu0 %471 }
 0x23f   :  { %1014 = vrot.lane.b32.xlu1 %v3502_v21, %s2934_s19  ;;  %491 = vst.msk [vmem:[#allocation6 + $0x41] sm:$0x1] %vm422_vm12, %v472_v47 }
 0x240   :  { %539 = vrot.lane.b32.xlu0 %v458_v42, %s2926_s11 }
 0x241   :  { %v1007_v1 = vpop.permute.xlu1 %1006 }
 0x242   :  { %1029 = vst.msk [vmem:[#allocation6 + $0x1b] sm:$0x1] %vm422_vm12, %v1007_v1  ;;  %v500_v0 = vpop.permute.xlu0 %499 }
 0x243   :  { %1042 = vrot.lane.b32.xlu1 %v3489_v20, %s2935_s20  ;;  %521 = vst.msk [vmem:[#allocation6 + $0x22] sm:$0x1] %vm422_vm12, %v500_v0 }
 0x244   :  { %571 = vrot.lane.b32.xlu0 %v458_v42, %s2927_s12 }
 0x245   :  { %v1039_v5 = vpop.permute.xlu1 %1038 }
 0x246   :  { %1061 = vst.msk [vmem:[#allocation6 + $0x1c] sm:$0x1] %vm422_vm12, %v1039_v5  ;;  %v504_v51 = vpop.permute.xlu0 %503 }
 0x247   :  { %1046 = vrot.lane.b32.xlu1 %v3502_v21, %s2935_s20  ;;  %523 = vst.msk [vmem:[#allocation6 + $0x42] sm:$0x1] %vm422_vm12, %v504_v51 }
 0x248   :  { %603 = vrot.lane.b32.xlu0 %v458_v42, %s2928_s13 }
 0x249   :  { %v1071_v35 = vpop.permute.xlu1 %1070 }
 0x24a   :  { %1093 = vst.msk [vmem:[#allocation6 + $0x1d] sm:$0x1] %vm422_vm12, %v1071_v35  ;;  %v532_v54 = vpop.permute.xlu0 %531  ;;  %v1162_v35 = vrot.slane %v3569_v10, %v3140_v31 }
 0x24b   :  { %1074 = vrot.lane.b32.xlu1 %v3489_v20, %s2936_s21  ;;  %553 = vst.msk [vmem:[#allocation6 + $0x23] sm:$0x1] %vm422_vm12, %v532_v54  ;;  %v725_v20 = vrot.slane %v3449_v48, %v3140_v31 }
 0x24c   :  { %635 = vrot.lane.b32.xlu0 %v458_v42, %s2929_s14 }
 0x24d   :  { %v3565_v55 = vpop.permute.xlu1 %1217 }
 0x24e   :  { %v536_v12 = vpop.permute.xlu0 %535 }
 0x24f   :  { %1078 = vrot.lane.b32.xlu1 %v3502_v21, %s2936_s21  ;;  %555 = vst.msk [vmem:[#allocation6 + $0x43] sm:$0x1] %vm422_vm12, %v536_v12  ;;  %v749_v21 = vrot.slane %v3459_v52, %v3140_v31  ;;  %v737_v12 = vrot.slane %v704_v39, %v3241_v38 }
 0x250   :  { %774 = vrot.lane.b32.xlu0 %v717_v59, %s2933_s18  ;;  %v705_v59 = vcombine.high %v3459_v52, %v3459_v52 }
 0x251   :  { %v3578_v16 = vpop.permute.xlu1 %1233 }
 0x252   :  { %v564_v17 = vpop.permute.xlu0 %563 }
 0x253   :  { %1221 = vrot.lane.b32.xlu1 %v1166_v53, %s2937_s22  ;;  %585 = vst.msk [vmem:[#allocation6 + $0x24] sm:$0x1] %vm422_vm12, %v564_v17  ;;  %v769_v17 = vrot.slane %v705_v59, %v3241_v38 }
 0x254   :  { %778 = vrot.lane.b32.xlu0 %v725_v20, %s2933_s18  ;;  %v875_v20 = vcombine.high %v3492_v3, %v3492_v3  ;;  %v1202_v3 = vrot.slane %v3607_v23, %v3140_v31  ;;  %v765_v23 = vrot.slane %v705_v59, %v3140_v31 }
 0x255   :  { %v470_v18 = vpop.permute.xlu1 %469 }
 0x256   :  { %490 = vst.msk [vmem:[#allocation6 + $0x31] sm:$0x1] %vm422_vm12, %v470_v18  ;;  %v568_v57 = vpop.permute.xlu0 %567  ;;  %v1194_v18 = vrot.slane %v3595_v63, %v3140_v31 }
 0x257   :  { %1225 = vrot.lane.b32.xlu1 %v1174_v9, %s2937_s22  ;;  %587 = vst.msk [vmem:[#allocation6 + $0x44] sm:$0x1] %vm422_vm12, %v568_v57  ;;  %v907_v9 = vrot.slane %v875_v20, %v3140_v31 }
 0x258   :  { %790 = vrot.lane.b32.xlu0 %v749_v21, %s2933_s18 }
 0x259   :  { %v474_v48 = vpop.permute.xlu1 %473 }
 0x25a   :  { %492 = vst.msk [vmem:[#allocation6 + $0x51] sm:$0x1] %vm422_vm12, %v474_v48  ;;  %v596_v40 = vpop.permute.xlu0 %595 }
 0x25b   :  { %1237 = vrot.lane.b32.xlu1 %v1198_v22, %s2937_s22  ;;  %617 = vst.msk [vmem:[#allocation6 + $0x25] sm:$0x1] %vm422_vm12, %v596_v40  ;;  %v733_v22 = vrot.slane %v704_v39, %v3140_v31  ;;  %v3749_v39 = vrot.slane %v3293_v4, %v3140_v31 }
 0x25c   :  { %794 = vrot.lane.b32.xlu0 %v757_v27, %s2933_s18 }
 0x25d   :  { %v502_v32 = vpop.permute.xlu1 %501 }
 0x25e   :  { %522 = vst.msk [vmem:[#allocation6 + $0x32] sm:$0x1] %vm422_vm12, %v502_v32  ;;  %v600_v28 = vpop.permute.xlu0 %599 }
 0x25f   :  { %1241 = vrot.lane.b32.xlu1 %v1206_v19, %s2937_s22  ;;  %619 = vst.msk [vmem:[#allocation6 + $0x45] sm:$0x1] %vm422_vm12, %v600_v28  ;;  %v1178_v28 = vrot.slane %v1149_v24, %v3140_v31 }
 0x260   :  { %920 = vrot.lane.b32.xlu0 %v903_v34, %s2930_s15 }
 0x261   :  { %v506_v25 = vpop.permute.xlu1 %505 }
 0x262   :  { %524 = vst.msk [vmem:[#allocation6 + $0x52] sm:$0x1] %vm422_vm12, %v506_v25  ;;  %v628_v41 = vpop.permute.xlu0 %627 }
 0x263   :  { %477 = vrot.lane.b32.xlu1 %v462_v8, %s2917_s0  ;;  %649 = vst.msk [vmem:[#allocation6 + $0x26] sm:$0x1] %vm422_vm12, %v628_v41 }
 0x264   :  { %952 = vrot.lane.b32.xlu0 %v903_v34, %s2931_s16 }
 0x265   :  { %v534_v42 = vpop.permute.xlu1 %533 }
 0x266   :  { %554 = vst.msk [vmem:[#allocation6 + $0x33] sm:$0x1] %vm422_vm12, %v534_v42  ;;  %v632_v43 = vpop.permute.xlu0 %631 }
 0x267   :  { %509 = vrot.lane.b32.xlu1 %v462_v8, %s2920_s30  ;;  %651 = vst.msk [vmem:[#allocation6 + $0x46] sm:$0x1] %vm422_vm12, %v632_v43 }
 0x268   :  { %984 = vrot.lane.b32.xlu0 %v903_v34, %s2932_s17 }
 0x269   :  { %v538_v7 = vpop.permute.xlu1 %537 }
 0x26a   :  { %556 = vst.msk [vmem:[#allocation6 + $0x53] sm:$0x1] %vm422_vm12, %v538_v7  ;;  %v771_v29 = vpop.permute.xlu0 %770  ;;  %v1182_v7 = vrot.slane %v1149_v24, %v3241_v38 }
 0x26b   :  { %541 = vrot.lane.b32.xlu1 %v462_v8, %s2926_s11  ;;  %v803_v45 = vsel %vm802_vm13, %v771_v29, %v3514_v26 }
 0x26c   :  { %819 = vst.msk [vmem:[#allocation6 + $0x7] sm:$0x1] %vm422_vm12, %v803_v45  ;;  %1016 = vrot.lane.b32.xlu0 %v903_v34, %s2934_s19 }
 0x26d   :  { %v566_v47 = vpop.permute.xlu1 %565 }
 0x26e   :  { %586 = vst.msk [vmem:[#allocation6 + $0x34] sm:$0x1] %vm422_vm12, %v566_v47  ;;  %v787_v1 = vpop.permute.xlu0 %786 }
 0x26f   :  { %573 = vrot.lane.b32.xlu1 %v462_v8, %s2927_s12  ;;  %v807_v0 = vsel %vm802_vm13, %v787_v1, %v3523_v30  ;;  %v3732_v1 = vrot.slane %v3259_v49, %v3140_v31 }
 0x270   :  { %823 = vst.msk [vmem:[#allocation6 + $0x47] sm:$0x1] %vm422_vm12, %v807_v0  ;;  %1048 = vrot.lane.b32.xlu0 %v903_v34, %s2935_s20 }
 0x271   :  { %v570_v5 = vpop.permute.xlu1 %569 }
 0x272   :  { %588 = vst.msk [vmem:[#allocation6 + $0x54] sm:$0x1] %vm422_vm12, %v570_v5  ;;  %v913_v26 = vpop.permute.xlu0 %912 }
 0x273   :  { %605 = vrot.lane.b32.xlu1 %v462_v8, %s2928_s13  ;;  %934 = vst.msk [vmem:[#allocation6 + $0x28] sm:$0x1] %vm422_vm12, %v913_v26 }
 0x274   :  { %1080 = vrot.lane.b32.xlu0 %v903_v34, %s2936_s21  ;;  %v1150_v34 = vcombine.high %v3595_v63, %v3595_v63  ;;  %v3714_v63 = vrot.slane %v3275_v58, %v3140_v31 }
 0x275   :  { %v598_v51 = vpop.permute.xlu1 %597 }
 0x276   :  { %618 = vst.msk [vmem:[#allocation6 + $0x35] sm:$0x1] %vm422_vm12, %v598_v51  ;;  %v917_v30 = vpop.permute.xlu0 %916  ;;  %v1214_v45 = vrot.slane %v1150_v34, %v3241_v38 }
 0x277   :  { %637 = vrot.lane.b32.xlu1 %v462_v8, %s2929_s14  ;;  %936 = vst.msk [vmem:[#allocation6 + $0x48] sm:$0x1] %vm422_vm12, %v917_v30  ;;  %v1210_v8 = vrot.slane %v1150_v34, %v3140_v31 }
 0x278   :  { %1219 = vrot.lane.b32.xlu0 %v1162_v35, %s2937_s22 }
 0x279   :  { %v602_v54 = vpop.permute.xlu1 %601 }
 0x27a   :  { %620 = vst.msk [vmem:[#allocation6 + $0x55] sm:$0x1] %vm422_vm12, %v602_v54  ;;  %v945_v44 = vpop.permute.xlu0 %944  ;;  %v3761_v54 = vrot.slane %v3285_v61, %v3140_v31 }
 0x27b   :  { %784 = vrot.lane.b32.xlu1 %v737_v12, %s2933_s18  ;;  %966 = vst.msk [vmem:[#allocation6 + $0x29] sm:$0x1] %vm422_vm12, %v945_v44  ;;  %v3772_v12 = vrot.slane %v3279_v60, %v3140_v31  ;;  %v3782_v44 = vrot.slane %v3272_v56, %v3140_v31 }
 0x27c   :  { %1223 = vrot.lane.b32.xlu0 %v1170_v15, %s2937_s22 }
 0x27d   :  { %v630_v53 = vpop.permute.xlu1 %629 }
 0x27e   :  { %650 = vst.msk [vmem:[#allocation6 + $0x36] sm:$0x1] %vm422_vm12, %v630_v53  ;;  %v949_v52 = vpop.permute.xlu0 %948 }
 0x27f   :  { %800 = vrot.lane.b32.xlu1 %v769_v17, %s2933_s18  ;;  %968 = vst.msk [vmem:[#allocation6 + $0x49] sm:$0x1] %vm422_vm12, %v949_v52 }
 0x280   :  { %1235 = vrot.lane.b32.xlu0 %v1194_v18, %s2937_s22 }
 0x281   :  { %v634_v46 = vpop.permute.xlu1 %633 }
 0x282   :  { %652 = vst.msk [vmem:[#allocation6 + $0x56] sm:$0x1] %vm422_vm12, %v634_v46  ;;  %v977_v57 = vpop.permute.xlu0 %976 }
 0x283   :  { %922 = vrot.lane.b32.xlu1 %v907_v9, %s2930_s15  ;;  %998 = vst.msk [vmem:[#allocation6 + $0x2a] sm:$0x1] %vm422_vm12, %v977_v57 }
 0x284   :  { %1239 = vrot.lane.b32.xlu0 %v1202_v3, %s2937_s22  ;;  %v3816_v3 = vrot.slane %v3304_v6, %v3140_v31 }
 0x285   :  { %v3683_v21 = vpop.permute.xlu1 %776 }
 0x286   :  { %v981_v48 = vpop.permute.xlu0 %980 }
 0x287   :  { %954 = vrot.lane.b32.xlu1 %v907_v9, %s2931_s16  ;;  %1000 = vst.msk [vmem:[#allocation6 + $0x4a] sm:$0x1] %vm422_vm12, %v981_v48 }
 0x288   :  { %782 = vrot.lane.b32.xlu0 %v733_v22, %s2933_s18 }
 0x289   :  { %v3689_v40 = vpop.permute.xlu1 %780 }
 0x28a   :  { %v1009_v27 = vpop.permute.xlu0 %1008 }
 0x28b   :  { %986 = vrot.lane.b32.xlu1 %v907_v9, %s2932_s17  ;;  %1030 = vst.msk [vmem:[#allocation6 + $0x2b] sm:$0x1] %vm422_vm12, %v1009_v27 }
 0x28c   :  { %798 = vrot.lane.b32.xlu0 %v765_v23, %s2933_s18 }
 0x28d   :  { %v3697_v32 = vpop.permute.xlu1 %792 }
 0x28e   :  { %v1013_v19 = vpop.permute.xlu0 %1012 }
 0x28f   :  { %1018 = vrot.lane.b32.xlu1 %v907_v9, %s2934_s19  ;;  %1032 = vst.msk [vmem:[#allocation6 + $0x4b] sm:$0x1] %vm422_vm12, %v1013_v19 }
 0x290   :  { %1227 = vrot.lane.b32.xlu0 %v1178_v28, %s2937_s22 }
 0x291   :  { %v3705_v25 = vpop.permute.xlu1 %796 }
 0x292   :  { %v1041_v10 = vpop.permute.xlu0 %1040 }
 0x293   :  { %1050 = vrot.lane.b32.xlu1 %v907_v9, %s2935_s20  ;;  %1062 = vst.msk [vmem:[#allocation6 + $0x2c] sm:$0x1] %vm422_vm12, %v1041_v10 }
 0x294   :  { %1243 = vrot.lane.b32.xlu0 %v1210_v8, %s2937_s22 }
 0x295   :  { %v915_v41 = vpop.permute.xlu1 %914 }
 0x296   :  { %935 = vst.msk [vmem:[#allocation6 + $0x38] sm:$0x1] %vm422_vm12, %v915_v41  ;;  %v1045_v42 = vpop.permute.xlu0 %1044 }
 0x297   :  { %1082 = vrot.lane.b32.xlu1 %v907_v9, %s2936_s21  ;;  %1064 = vst.msk [vmem:[#allocation6 + $0x4c] sm:$0x1] %vm422_vm12, %v1045_v42 }
 0x298   :  { %1809 = vrot.lane.b32.xlu0 %v3714_v63, %s2917_s0 }
 0x299   :  { %v919_v43 = vpop.permute.xlu1 %918 }
 0x29a   :  { %937 = vst.msk [vmem:[#allocation6 + $0x58] sm:$0x1] %vm422_vm12, %v919_v43  ;;  %v1073_v29 = vpop.permute.xlu0 %1072 }
 0x29b   :  { %1229 = vrot.lane.b32.xlu1 %v1182_v7, %s2937_s22  ;;  %1094 = vst.msk [vmem:[#allocation6 + $0x2d] sm:$0x1] %vm422_vm12, %v1073_v29 }
 0x29c   :  { %1841 = vrot.lane.b32.xlu0 %v3714_v63, %s2920_s30 }
 0x29d   :  { %v947_v58 = vpop.permute.xlu1 %946 }
 0x29e   :  { %967 = vst.msk [vmem:[#allocation6 + $0x39] sm:$0x1] %vm422_vm12, %v947_v58  ;;  %v1077_v47 = vpop.permute.xlu0 %1076 }
 0x29f   :  { %1245 = vrot.lane.b32.xlu1 %v1214_v45, %s2937_s22  ;;  %1096 = vst.msk [vmem:[#allocation6 + $0x4d] sm:$0x1] %vm422_vm12, %v1077_v47 }
 0x2a0   :  { %1873 = vrot.lane.b32.xlu0 %v3714_v63, %s2926_s11 }
 0x2a1   :  { %v951_v0 = vpop.permute.xlu1 %950 }
 0x2a2   :  { %969 = vst.msk [vmem:[#allocation6 + $0x59] sm:$0x1] %vm422_vm12, %v951_v0  ;;  %v1216_v5 = vpop.permute.xlu0 %1215 }
 0x2a3   :  { %1807 = vrot.lane.b32.xlu1 %v3732_v1, %s2917_s0  ;;  %v1248_v26 = vsel %vm1247_vm14, %v1216_v5, %v3565_v55 }
 0x2a4   :  { %1264 = vst.msk [vmem:[#allocation6 + $0xe] sm:$0x1] %vm422_vm12, %v1248_v26  ;;  %1905 = vrot.lane.b32.xlu0 %v3714_v63, %s2927_s12 }
 0x2a5   :  { %v979_v49 = vpop.permute.xlu1 %978 }
 0x2a6   :  { %999 = vst.msk [vmem:[#allocation6 + $0x3a] sm:$0x1] %vm422_vm12, %v979_v49  ;;  %v1232_v51 = vpop.permute.xlu0 %1231 }
 0x2a7   :  { %1839 = vrot.lane.b32.xlu1 %v3732_v1, %s2920_s30  ;;  %v1252_v30 = vsel %vm1247_vm14, %v1232_v51, %v3578_v16 }
 0x2a8   :  { %1268 = vst.msk [vmem:[#allocation6 + $0x4e] sm:$0x1] %vm422_vm12, %v1252_v30  ;;  %1813 = vrot.lane.b32.xlu0 %v3749_v39, %s2917_s0 }
 0x2a9   :  { %v983_v55 = vpop.permute.xlu1 %982 }
 0x2aa   :  { %1001 = vst.msk [vmem:[#allocation6 + $0x5a] sm:$0x1] %vm422_vm12, %v983_v55  ;;  %v476_v35 = vpop.permute.xlu0 %475 }
 0x2ab   :  { %1871 = vrot.lane.b32.xlu1 %v3732_v1, %s2926_s11  ;;  %493 = vst.msk [vmem:[#allocation6 + $0x61] sm:$0x1] %vm422_vm12, %v476_v35 }
 0x2ac   :  { %1817 = vrot.lane.b32.xlu0 %v3761_v54, %s2917_s0 }
 0x2ad   :  { %v1011_v4 = vpop.permute.xlu1 %1010 }
 0x2ae   :  { %1031 = vst.msk [vmem:[#allocation6 + $0x3b] sm:$0x1] %vm422_vm12, %v1011_v4  ;;  %v508_v16 = vpop.permute.xlu0 %507 }
 0x2af   :  { %1903 = vrot.lane.b32.xlu1 %v3732_v1, %s2927_s12  ;;  %525 = vst.msk [vmem:[#allocation6 + $0x62] sm:$0x1] %vm422_vm12, %v508_v16 }
 0x2b0   :  { %1845 = vrot.lane.b32.xlu0 %v3749_v39, %s2920_s30 }
 0x2b1   :  { %v1015_v61 = vpop.permute.xlu1 %1014 }
 0x2b2   :  { %1033 = vst.msk [vmem:[#allocation6 + $0x5b] sm:$0x1] %vm422_vm12, %v1015_v61  ;;  %v540_v59 = vpop.permute.xlu0 %539 }
 0x2b3   :  { %1811 = vrot.lane.b32.xlu1 %v3772_v12, %s2917_s0  ;;  %557 = vst.msk [vmem:[#allocation6 + $0x63] sm:$0x1] %vm422_vm12, %v540_v59 }
 0x2b4   :  { %1849 = vrot.lane.b32.xlu0 %v3761_v54, %s2920_s30 }
 0x2b5   :  { %v1043_v60 = vpop.permute.xlu1 %1042 }
 0x2b6   :  { %1063 = vst.msk [vmem:[#allocation6 + $0x3c] sm:$0x1] %vm422_vm12, %v1043_v60  ;;  %v572_v15 = vpop.permute.xlu0 %571 }
 0x2b7   :  { %1815 = vrot.lane.b32.xlu1 %v3782_v44, %s2917_s0  ;;  %589 = vst.msk [vmem:[#allocation6 + $0x64] sm:$0x1] %vm422_vm12, %v572_v15 }
 0x2b8   :  { %1877 = vrot.lane.b32.xlu0 %v3749_v39, %s2926_s11 }
 0x2b9   :  { %v1047_v53 = vpop.permute.xlu1 %1046 }
 0x2ba   :  { %1065 = vst.msk [vmem:[#allocation6 + $0x5c] sm:$0x1] %vm422_vm12, %v1047_v53  ;;  %v604_v56 = vpop.permute.xlu0 %603 }
 0x2bb   :  { %1843 = vrot.lane.b32.xlu1 %v3772_v12, %s2920_s30  ;;  %621 = vst.msk [vmem:[#allocation6 + $0x65] sm:$0x1] %vm422_vm12, %v604_v56 }
 0x2bc   :  { %1881 = vrot.lane.b32.xlu0 %v3761_v54, %s2926_s11 }
 0x2bd   :  { %v1075_v17 = vpop.permute.xlu1 %1074 }
 0x2be   :  { %1095 = vst.msk [vmem:[#allocation6 + $0x3d] sm:$0x1] %vm422_vm12, %v1075_v17  ;;  %v636_v20 = vpop.permute.xlu0 %635 }
 0x2bf   :  { %1847 = vrot.lane.b32.xlu1 %v3782_v44, %s2920_s30  ;;  %653 = vst.msk [vmem:[#allocation6 + $0x66] sm:$0x1] %vm422_vm12, %v636_v20 }
 0x2c0   :  { %1909 = vrot.lane.b32.xlu0 %v3749_v39, %s2927_s12 }
 0x2c1   :  { %v1079_v52 = vpop.permute.xlu1 %1078 }
 0x2c2   :  { %1097 = vst.msk [vmem:[#allocation6 + $0x5d] sm:$0x1] %vm422_vm12, %v1079_v52  ;;  %v775_v18 = vpop.permute.xlu0 %774 }
 0x2c3   :  { %1875 = vrot.lane.b32.xlu1 %v3772_v12, %s2926_s11  ;;  %v804_v46 = vsel %vm802_vm13, %v775_v18, %v3683_v21 }
 0x2c4   :  { %820 = vst.msk [vmem:[#allocation6 + $0x17] sm:$0x1] %vm422_vm12, %v804_v46  ;;  %1913 = vrot.lane.b32.xlu0 %v3761_v54, %s2927_s12 }
 0x2c5   :  { %v1222_v9 = vpop.permute.xlu1 %1221 }
 0x2c6   :  { %v779_v57 = vpop.permute.xlu0 %778 }
 0x2c7   :  { %1879 = vrot.lane.b32.xlu1 %v3782_v44, %s2926_s11  ;;  %v805_v48 = vsel %vm802_vm13, %v779_v57, %v3689_v40 }
 0x2c8   :  { %821 = vst.msk [vmem:[#allocation6 + $0x27] sm:$0x1] %vm422_vm12, %v805_v48  ;;  %1821 = vrot.lane.b32.xlu0 %v3816_v3, %s2917_s0 }
 0x2c9   :  { %v1226_v21 = vpop.permute.xlu1 %1225 }
 0x2ca   :  { %v791_v22 = vpop.permute.xlu0 %790 }
 0x2cb   :  { %1907 = vrot.lane.b32.xlu1 %v3772_v12, %s2927_s12  ;;  %v808_v27 = vsel %vm802_vm13, %v791_v22, %v3697_v32  ;;  %v3841_v32 = vrot.slane %v3289_v62, %v3140_v31 }
 0x2cc   :  { %824 = vst.msk [vmem:[#allocation6 + $0x57] sm:$0x1] %vm422_vm12, %v808_v27  ;;  %1853 = vrot.lane.b32.xlu0 %v3816_v3, %s2920_s30 }
 0x2cd   :  { %v1238_v6 = vpop.permute.xlu1 %1237 }
 0x2ce   :  { %v795_v40 = vpop.permute.xlu0 %794 }
 0x2cf   :  { %1911 = vrot.lane.b32.xlu1 %v3782_v44, %s2927_s12  ;;  %v809_v23 = vsel %vm802_vm13, %v795_v40, %v3705_v25 }
 0x2d0   :  { %825 = vst.msk [vmem:[#allocation6 + $0x67] sm:$0x1] %vm422_vm12, %v809_v23  ;;  %1885 = vrot.lane.b32.xlu0 %v3816_v3, %s2926_s11 }
 0x2d1   :  { %v3837_v24 = vpop.permute.xlu1 %1241 }
 0x2d2   :  { %v921_v19 = vpop.permute.xlu0 %920 }
 0x2d3   :  { %1819 = vrot.lane.b32.xlu1 %v3841_v32, %s2917_s0  ;;  %938 = vst.msk [vmem:[#allocation6 + $0x68] sm:$0x1] %vm422_vm12, %v921_v19 }
 0x2d4   :  { %1917 = vrot.lane.b32.xlu0 %v3816_v3, %s2927_s12 }
 0x2d5   :  { %v478_v28 = vpop.permute.xlu1 %477 }
 0x2d6   :  { %494 = vst.msk [vmem:[#allocation6 + $0x71] sm:$0x1] %vm422_vm12, %v478_v28  ;;  %v953_v34 = vpop.permute.xlu0 %952 }
 0x2d7   :  { %1851 = vrot.lane.b32.xlu1 %v3841_v32, %s2920_s30  ;;  %970 = vst.msk [vmem:[#allocation6 + $0x69] sm:$0x1] %vm422_vm12, %v953_v34  ;;  %v2170_v34 = vcombine.high %v3234_v2, %v3234_v2 }
 0x2d8   :  { %1937 = vrot.lane.b32.xlu0 %v3714_v63, %s2928_s13 }
 0x2d9   :  { %v510_v62 = vpop.permute.xlu1 %509 }
 0x2da   :  { %526 = vst.msk [vmem:[#allocation6 + $0x72] sm:$0x1] %vm422_vm12, %v510_v62  ;;  %v985_v25 = vpop.permute.xlu0 %984 }
 0x2db   :  { %1883 = vrot.lane.b32.xlu1 %v3841_v32, %s2926_s11  ;;  %1002 = vst.msk [vmem:[#allocation6 + $0x6a] sm:$0x1] %vm422_vm12, %v985_v25 }
 0x2dc   :  { %1941 = vrot.lane.b32.xlu0 %v3749_v39, %s2928_s13 }
 0x2dd   :  { %v542_v10 = vpop.permute.xlu1 %541 }
 0x2de   :  { %558 = vst.msk [vmem:[#allocation6 + $0x73] sm:$0x1] %vm422_vm12, %v542_v10  ;;  %v1017_v8 = vpop.permute.xlu0 %1016 }
 0x2df   :  { %1915 = vrot.lane.b32.xlu1 %v3841_v32, %s2927_s12  ;;  %1034 = vst.msk [vmem:[#allocation6 + $0x6b] sm:$0x1] %vm422_vm12, %v1017_v8 }
 0x2e0   :  { %1945 = vrot.lane.b32.xlu0 %v3761_v54, %s2928_s13 }
 0x2e1   :  { %v574_v41 = vpop.permute.xlu1 %573 }
 0x2e2   :  { %590 = vst.msk [vmem:[#allocation6 + $0x74] sm:$0x1] %vm422_vm12, %v574_v41  ;;  %v1049_v42 = vpop.permute.xlu0 %1048 }
 0x2e3   :  { %1935 = vrot.lane.b32.xlu1 %v3732_v1, %s2928_s13  ;;  %1066 = vst.msk [vmem:[#allocation6 + $0x6c] sm:$0x1] %vm422_vm12, %v1049_v42 }
 0x2e4   :  { %1949 = vrot.lane.b32.xlu0 %v3816_v3, %s2928_s13 }
 0x2e5   :  { %v606_v43 = vpop.permute.xlu1 %605 }
 0x2e6   :  { %622 = vst.msk [vmem:[#allocation6 + $0x75] sm:$0x1] %vm422_vm12, %v606_v43  ;;  %v1081_v7 = vpop.permute.xlu0 %1080 }
 0x2e7   :  { %1939 = vrot.lane.b32.xlu1 %v3772_v12, %s2928_s13  ;;  %1098 = vst.msk [vmem:[#allocation6 + $0x6d] sm:$0x1] %vm422_vm12, %v1081_v7  ;;  %v2184_v7 = vrot.slane %v2170_v34, %v3116_v37 }
 0x2e8   :  { %1969 = vrot.lane.b32.xlu0 %v3714_v63, %s2929_s14  ;;  %v2008_v63 = vrot.slane %v2000_v36, %v3116_v37 }
 0x2e9   :  { %v638_v29 = vpop.permute.xlu1 %637 }
 0x2ea   :  { %654 = vst.msk [vmem:[#allocation6 + $0x76] sm:$0x1] %vm422_vm12, %v638_v29  ;;  %v1220_v58 = vpop.permute.xlu0 %1219  ;;  %v2024_v51 = vrot.slane %v2008_v63, %v3116_v37 }
 0x2eb   :  { %1943 = vrot.lane.b32.xlu1 %v3782_v44, %s2928_s13  ;;  %v1249_v45 = vsel %vm1247_vm14, %v1220_v58, %v1222_v9 }
 0x2ec   :  { %1265 = vst.msk [vmem:[#allocation6 + $0x1e] sm:$0x1] %vm422_vm12, %v1249_v45  ;;  %1973 = vrot.lane.b32.xlu0 %v3749_v39, %s2929_s14  ;;  %v2016_v39 = vcombine.high %v2008_v63, %v2008_v63  ;;  %v2057_v35 = vrot.slane %v2024_v51, %v3241_v38  ;;  %v2046_v61 = vcombine.high %v2024_v51, %v2024_v51 }
 0x2ed   :  { %v785_v47 = vpop.permute.xlu1 %784  ;;  %v2053_v52 = vrot.slane %v2024_v51, %v3140_v31 }
 0x2ee   :  { %v1224_v0 = vpop.permute.xlu0 %1223  ;;  %v2073_v53 = vrot.slane %v2046_v61, %v3241_v38  ;;  %v2069_v27 = vrot.slane %v2046_v61, %v3140_v31 }
 0x2ef   :  { %1947 = vrot.lane.b32.xlu1 %v3841_v32, %s2928_s13  ;;  %v1250_v5 = vsel %vm1247_vm14, %v1224_v0, %v1226_v21 }
 0x2f0   :  { %1266 = vst.msk [vmem:[#allocation6 + $0x2e] sm:$0x1] %vm422_vm12, %v1250_v5  ;;  %1977 = vrot.lane.b32.xlu0 %v3761_v54, %s2929_s14 }
 0x2f1   :  { %v801_v26 = vpop.permute.xlu1 %800 }
 0x2f2   :  { %v1236_v49 = vpop.permute.xlu0 %1235 }
 0x2f3   :  { %1967 = vrot.lane.b32.xlu1 %v3732_v1, %s2929_s14  ;;  %v1253_v30 = vsel %vm1247_vm14, %v1236_v49, %v1238_v6  ;;  %v2038_v1 = vrot.slane %v2016_v39, %v3116_v37  ;;  %v2177_v6 = vrot.slane %v3234_v2, %v3116_v37  ;;  %v2186_v49 = vcombine.high %v2184_v7, %v2184_v7 }
 0x2f4   :  { %1269 = vst.msk [vmem:[#allocation6 + $0x5e] sm:$0x1] %vm422_vm12, %v1253_v30  ;;  %1981 = vrot.lane.b32.xlu0 %v3816_v3, %s2929_s14 }
 0x2f5   :  { %v923_v36 = vpop.permute.xlu1 %922  ;;  %v2048_v56 = vcombine.high %v2038_v1, %v2038_v1  ;;  %v2061_v57 = vrot.slane %v2038_v1, %v3140_v31  ;;  %v2185_v62 = vcombine.high %v2177_v6, %v2177_v6 }
 0x2f6   :  { %939 = vst.msk [vmem:[#allocation6 + $0x78] sm:$0x1] %vm422_vm12, %v923_v36  ;;  %v1240_v55 = vpop.permute.xlu0 %1239 }
 0x2f7   :  { %1971 = vrot.lane.b32.xlu1 %v3772_v12, %s2929_s14  ;;  %v1254_v54 = vsel %vm1247_vm14, %v1240_v55, %v3837_v24  ;;  %v2065_v12 = vrot.slane %v2038_v1, %v3241_v38  ;;  %v2081_v46 = vrot.slane %v2048_v56, %v3241_v38  ;;  %v2077_v19 = vrot.slane %v2048_v56, %v3140_v31 }
 0x2f8   :  { %1270 = vst.msk [vmem:[#allocation6 + $0x6e] sm:$0x1] %vm422_vm12, %v1254_v54  ;;  %2116 = vrot.lane.b32.xlu0 %v2057_v35, %s2933_s18  ;;  %v2207_v45 = vrot.slane %v2185_v62, %v3116_v37  ;;  %v2214_v55 = vrot.slane %v2186_v49, %v3116_v37  ;;  %v2193_v54 = vrot.slane %v2177_v6, %v3116_v37 }
 0x2f9   :  { %v955_v4 = vpop.permute.xlu1 %954 }
 0x2fa   :  { %971 = vst.msk [vmem:[#allocation6 + $0x79] sm:$0x1] %vm422_vm12, %v955_v4  ;;  %v783_v16 = vpop.permute.xlu0 %782  ;;  %v3971_v5 = vrot.slane %v2207_v45, %v3140_v31 }
 0x2fb   :  { %1975 = vrot.lane.b32.xlu1 %v3782_v44, %s2929_s14  ;;  %v806_v59 = vsel %vm802_vm13, %v783_v16, %v785_v47  ;;  %v2015_v44 = vrot.slane %v2001_v50, %v3116_v37  ;;  %v3991_v16 = vrot.slane %v2214_v55, %v3140_v31 }
 0x2fc   :  { %822 = vst.msk [vmem:[#allocation6 + $0x37] sm:$0x1] %vm422_vm12, %v806_v59  ;;  %2120 = vrot.lane.b32.xlu0 %v2065_v12, %s2933_s18  ;;  %v2218_v12 = vcombine.high %v2214_v55, %v2214_v55  ;;  %v3997_v59 = vrot.slane %v2193_v54, %v3140_v31 }
 0x2fd   :  { %v987_v60 = vpop.permute.xlu1 %986  ;;  %v2031_v9 = vrot.slane %v2015_v44, %v3116_v37  ;;  %v2017_v33 = vcombine.high %v2015_v44, %v2015_v44 }
 0x2fe   :  { %1003 = vst.msk [vmem:[#allocation6 + $0x7a] sm:$0x1] %vm422_vm12, %v987_v60  ;;  %v799_v15 = vpop.permute.xlu0 %798  ;;  %v2215_v60 = vcombine.high %v2193_v54, %v2193_v54 }
 0x2ff   :  { %1979 = vrot.lane.b32.xlu1 %v3841_v32, %s2929_s14  ;;  %v810_v17 = vsel %vm802_vm13, %v799_v15, %v801_v26  ;;  %v2089_v48 = vrot.slane %v2031_v9, %v3241_v38  ;;  %v2045_v21 = vrot.slane %v2017_v33, %v3116_v37  ;;  %v2047_v24 = vcombine.high %v2031_v9, %v2031_v9 }
 0x300   :  { %826 = vst.msk [vmem:[#allocation6 + $0x77] sm:$0x1] %vm422_vm12, %v810_v17  ;;  %2124 = vrot.lane.b32.xlu0 %v2073_v53, %s2933_s18  ;;  %v2085_v42 = vrot.slane %v2031_v9, %v3140_v31  ;;  %v2217_v26 = vcombine.high %v2207_v45, %v2207_v45  ;;  %v4003_v53 = vrot.slane %v2218_v12, %v3140_v31 }
 0x301   :  { %v1019_v20 = vpop.permute.xlu1 %1018  ;;  %v2097_v23 = vrot.slane %v2045_v21, %v3241_v38  ;;  %v2105_v10 = vrot.slane %v2047_v24, %v3241_v38  ;;  %v2049_v8 = vcombine.high %v2045_v21, %v2045_v21  ;;  %v2093_v0 = vrot.slane %v2045_v21, %v3140_v31 }
 0x302   :  { %1035 = vst.msk [vmem:[#allocation6 + $0x7b] sm:$0x1] %vm422_vm12, %v1019_v20  ;;  %v1228_v18 = vpop.permute.xlu0 %1227  ;;  %v2101_v39 = vrot.slane %v2047_v24, %v3140_v31  ;;  %v3980_v36 = vrot.slane %v2217_v26, %v3140_v31  ;;  %v4009_v44 = vrot.slane %v2215_v60, %v3140_v31  ;;  %v2200_v17 = vrot.slane %v2184_v7, %v3116_v37 }
 0x303   :  { %2114 = vrot.lane.b32.xlu1 %v2053_v52, %s2933_s18  ;;  %v2113_v58 = vrot.slane %v2049_v8, %v3241_v38  ;;  %v2109_v1 = vrot.slane %v2049_v8, %v3140_v31 }
 0x304   :  { %2128 = vrot.lane.b32.xlu0 %v2081_v46, %s2933_s18  ;;  %v2216_v46 = vcombine.high %v2200_v17, %v2200_v17 }
 0x305   :  { %v1051_v50 = vpop.permute.xlu1 %1050 }
 0x306   :  { %1067 = vst.msk [vmem:[#allocation6 + $0x7c] sm:$0x1] %vm422_vm12, %v1051_v50  ;;  %v1244_v3 = vpop.permute.xlu0 %1243  ;;  %v4028_v50 = vrot.slane %v2216_v46, %v3140_v31 }
 0x307   :  { %2118 = vrot.lane.b32.xlu1 %v2061_v57, %s2933_s18 }
 0x308   :  { %2132 = vrot.lane.b32.xlu0 %v2089_v48, %s2933_s18 }
 0x309   :  { %v1083_v22 = vpop.permute.xlu1 %1082 }
 0x30a   :  { %1099 = vst.msk [vmem:[#allocation6 + $0x7d] sm:$0x1] %vm422_vm12, %v1083_v22  ;;  %v1810_v40 = vpop.permute.xlu0 %1809 }
 0x30b   :  { %2122 = vrot.lane.b32.xlu1 %v2069_v27, %s2933_s18  ;;  %1832 = vst.msk [vmem:[#allocation6 + $0x91] sm:$0x1] %vm422_vm12, %v1810_v40 }
 0x30c   :  { %2136 = vrot.lane.b32.xlu0 %v2097_v23, %s2933_s18 }
 0x30d   :  { %v1230_v32 = vpop.permute.xlu1 %1229 }
 0x30e   :  { %v1251_v28 = vsel %vm1247_vm14, %v1228_v18, %v1230_v32  ;;  %v1842_v25 = vpop.permute.xlu0 %1841  ;;  %v4019_v18 = vrot.slane %v2200_v17, %v3140_v31 }
 0x30f   :  { %1267 = vst.msk [vmem:[#allocation6 + $0x3e] sm:$0x1] %vm422_vm12, %v1251_v28  ;;  %2126 = vrot.lane.b32.xlu1 %v2077_v19, %s2933_s18  ;;  %1864 = vst.msk [vmem:[#allocation6 + $0x92] sm:$0x1] %vm422_vm12, %v1842_v25 }
 0x310   :  { %2140 = vrot.lane.b32.xlu0 %v2105_v10, %s2933_s18 }
 0x311   :  { %v1246_v41 = vpop.permute.xlu1 %1245 }
 0x312   :  { %v1255_v43 = vsel %vm1247_vm14, %v1244_v3, %v1246_v41  ;;  %v1874_v29 = vpop.permute.xlu0 %1873 }
 0x313   :  { %1271 = vst.msk [vmem:[#allocation6 + $0x7e] sm:$0x1] %vm422_vm12, %v1255_v43  ;;  %2130 = vrot.lane.b32.xlu1 %v2085_v42, %s2933_s18  ;;  %1896 = vst.msk [vmem:[#allocation6 + $0x93] sm:$0x1] %vm422_vm12, %v1874_v29 }
 0x314   :  { %2144 = vrot.lane.b32.xlu0 %v2113_v58, %s2933_s18 }
 0x315   :  { %v1808_v47 = vpop.permute.xlu1 %1807 }
 0x316   :  { %1831 = vst.msk [vmem:[#allocation6 + $0x81] sm:$0x1] %vm422_vm12, %v1808_v47  ;;  %v1906_v63 = vpop.permute.xlu0 %1905 }
 0x317   :  { %2134 = vrot.lane.b32.xlu1 %v2093_v0, %s2933_s18  ;;  %1928 = vst.msk [vmem:[#allocation6 + $0x94] sm:$0x1] %vm422_vm12, %v1906_v63  ;;  %v2452_v63 = vrot.slane %v2444_v13, %v3116_v37 }
 0x318   :  { %2253 = vrot.lane.b32.xlu0 %v3971_v5, %s2930_s15 }
 0x319   :  { %v1840_v51 = vpop.permute.xlu1 %1839 }
 0x31a   :  { %1863 = vst.msk [vmem:[#allocation6 + $0x82] sm:$0x1] %vm422_vm12, %v1840_v51  ;;  %v1814_v30 = vpop.permute.xlu0 %1813  ;;  %v2468_v51 = vrot.slane %v2452_v63, %v3116_v37 }
 0x31b   :  { %2138 = vrot.lane.b32.xlu1 %v2101_v39, %s2933_s18  ;;  %1834 = vst.msk [vmem:[#allocation6 + $0xb1] sm:$0x1] %vm422_vm12, %v1814_v30  ;;  %v2460_v39 = vcombine.high %v2452_v63, %v2452_v63 }
 0x31c   :  { %2257 = vrot.lane.b32.xlu0 %v3980_v36, %s2930_s15  ;;  %v2501_v55 = vrot.slane %v2468_v51, %v3241_v38 }
 0x31d   :  { %v1872_v35 = vpop.permute.xlu1 %1871 }
 0x31e   :  { %1895 = vst.msk [vmem:[#allocation6 + $0x83] sm:$0x1] %vm422_vm12, %v1872_v35  ;;  %v1818_v4 = vpop.permute.xlu0 %1817  ;;  %v2482_v35 = vrot.slane %v2460_v39, %v3116_v37 }
 0x31f   :  { %2142 = vrot.lane.b32.xlu1 %v2109_v1, %s2933_s18  ;;  %1836 = vst.msk [vmem:[#allocation6 + $0xd1] sm:$0x1] %vm422_vm12, %v1818_v4  ;;  %v2490_v4 = vcombine.high %v2468_v51, %v2468_v51 }
 0x320   :  { %2261 = vrot.lane.b32.xlu0 %v3991_v16, %s2930_s15 }
 0x321   :  { %v1904_v61 = vpop.permute.xlu1 %1903  ;;  %v2517_v60 = vrot.slane %v2490_v4, %v3241_v38 }
 0x322   :  { %1927 = vst.msk [vmem:[#allocation6 + $0x84] sm:$0x1] %vm422_vm12, %v1904_v61  ;;  %v1846_v15 = vpop.permute.xlu0 %1845 }
 0x323   :  { %2251 = vrot.lane.b32.xlu1 %v3997_v59, %s2930_s15  ;;  %1866 = vst.msk [vmem:[#allocation6 + $0xb2] sm:$0x1] %vm422_vm12, %v1846_v15  ;;  %v2492_v15 = vcombine.high %v2482_v35, %v2482_v35 }
 0x324   :  { %2265 = vrot.lane.b32.xlu0 %v4003_v53, %s2930_s15 }
 0x325   :  { %v1812_v56 = vpop.permute.xlu1 %1811 }
 0x326   :  { %1833 = vst.msk [vmem:[#allocation6 + $0xa1] sm:$0x1] %vm422_vm12, %v1812_v56  ;;  %v1850_v20 = vpop.permute.xlu0 %1849  ;;  %v2459_v56 = vrot.slane %v2445_v14, %v3116_v37  ;;  %v2505_v14 = vrot.slane %v2482_v35, %v3140_v31 }
 0x327   :  { %2255 = vrot.lane.b32.xlu1 %v4009_v44, %s2930_s15  ;;  %1868 = vst.msk [vmem:[#allocation6 + $0xd2] sm:$0x1] %vm422_vm12, %v1850_v20  ;;  %v2497_v20 = vrot.slane %v2468_v51, %v3140_v31 }
 0x328   :  { %2285 = vrot.lane.b32.xlu0 %v3971_v5, %s2931_s16 }
 0x329   :  { %v1816_v52 = vpop.permute.xlu1 %1815 }
 0x32a   :  { %1835 = vst.msk [vmem:[#allocation6 + $0xc1] sm:$0x1] %vm422_vm12, %v1816_v52  ;;  %v1878_v9 = vpop.permute.xlu0 %1877 }
 0x32b   :  { %2259 = vrot.lane.b32.xlu1 %v4019_v18, %s2930_s15  ;;  %1898 = vst.msk [vmem:[#allocation6 + $0xb3] sm:$0x1] %vm422_vm12, %v1878_v9  ;;  %v2475_v9 = vrot.slane %v2459_v56, %v3116_v37 }
 0x32c   :  { %2289 = vrot.lane.b32.xlu0 %v3980_v36, %s2931_s16 }
 0x32d   :  { %v1844_v33 = vpop.permute.xlu1 %1843 }
 0x32e   :  { %1865 = vst.msk [vmem:[#allocation6 + $0xa2] sm:$0x1] %vm422_vm12, %v1844_v33  ;;  %v1882_v57 = vpop.permute.xlu0 %1881  ;;  %v2461_v33 = vcombine.high %v2459_v56, %v2459_v56 }
 0x32f   :  { %2263 = vrot.lane.b32.xlu1 %v4028_v50, %s2930_s15  ;;  %1900 = vst.msk [vmem:[#allocation6 + $0xd3] sm:$0x1] %vm422_vm12, %v1882_v57 }
 0x330   :  { %2293 = vrot.lane.b32.xlu0 %v3991_v16, %s2931_s16 }
 0x331   :  { %v1848_v3 = vpop.permute.xlu1 %1847 }
 0x332   :  { %1867 = vst.msk [vmem:[#allocation6 + $0xc2] sm:$0x1] %vm422_vm12, %v1848_v3  ;;  %v1910_v48 = vpop.permute.xlu0 %1909 }
 0x333   :  { %2283 = vrot.lane.b32.xlu1 %v3997_v59, %s2931_s16  ;;  %1930 = vst.msk [vmem:[#allocation6 + $0xb4] sm:$0x1] %vm422_vm12, %v1910_v48  ;;  %v2533_v48 = vrot.slane %v2475_v9, %v3241_v38 }
 0x334   :  { %2297 = vrot.lane.b32.xlu0 %v4003_v53, %s2931_s16 }
 0x335   :  { %v1876_v21 = vpop.permute.xlu1 %1875 }
 0x336   :  { %1897 = vst.msk [vmem:[#allocation6 + $0xa3] sm:$0x1] %vm422_vm12, %v1876_v21  ;;  %v1914_v22 = vpop.permute.xlu0 %1913  ;;  %v2489_v21 = vrot.slane %v2461_v33, %v3116_v37 }
 0x337   :  { %2287 = vrot.lane.b32.xlu1 %v4009_v44, %s2931_s16  ;;  %1932 = vst.msk [vmem:[#allocation6 + $0xd4] sm:$0x1] %vm422_vm12, %v1914_v22 }
 0x338   :  { %2317 = vrot.lane.b32.xlu0 %v3971_v5, %s2932_s17 }
 0x339   :  { %v1880_v27 = vpop.permute.xlu1 %1879 }
 0x33a   :  { %1899 = vst.msk [vmem:[#allocation6 + $0xc3] sm:$0x1] %vm422_vm12, %v1880_v27  ;;  %v1822_v6 = vpop.permute.xlu0 %1821  ;;  %v2513_v27 = vrot.slane %v2490_v4, %v3140_v31 }
 0x33b   :  { %2291 = vrot.lane.b32.xlu1 %v4019_v18, %s2931_s16  ;;  %1838 = vst.msk [vmem:[#allocation6 + $0xf1] sm:$0x1] %vm422_vm12, %v1822_v6 }
 0x33c   :  { %2321 = vrot.lane.b32.xlu0 %v3980_v36, %s2932_s17 }
 0x33d   :  { %v1908_v40 = vpop.permute.xlu1 %1907 }
 0x33e   :  { %1929 = vst.msk [vmem:[#allocation6 + $0xa4] sm:$0x1] %vm422_vm12, %v1908_v40  ;;  %v1854_v23 = vpop.permute.xlu0 %1853 }
 0x33f   :  { %2295 = vrot.lane.b32.xlu1 %v4028_v50, %s2931_s16  ;;  %1870 = vst.msk [vmem:[#allocation6 + $0xf2] sm:$0x1] %vm422_vm12, %v1854_v23  ;;  %v2541_v23 = vrot.slane %v2489_v21, %v3241_v38 }
 0x340   :  { %2325 = vrot.lane.b32.xlu0 %v3991_v16, %s2932_s17 }
 0x341   :  { %v1912_v24 = vpop.permute.xlu1 %1911 }
 0x342   :  { %1931 = vst.msk [vmem:[#allocation6 + $0xc4] sm:$0x1] %vm422_vm12, %v1912_v24  ;;  %v1886_v32 = vpop.permute.xlu0 %1885  ;;  %v2491_v24 = vcombine.high %v2475_v9, %v2475_v9 }
 0x343   :  { %2315 = vrot.lane.b32.xlu1 %v3997_v59, %s2932_s17  ;;  %1902 = vst.msk [vmem:[#allocation6 + $0xf3] sm:$0x1] %vm422_vm12, %v1886_v32 }
 0x344   :  { %2329 = vrot.lane.b32.xlu0 %v4003_v53, %s2932_s17 }
 0x345   :  { %v1820_v19 = vpop.permute.xlu1 %1819 }
 0x346   :  { %1837 = vst.msk [vmem:[#allocation6 + $0xe1] sm:$0x1] %vm422_vm12, %v1820_v19  ;;  %v1918_v28 = vpop.permute.xlu0 %1917  ;;  %v2521_v19 = vrot.slane %v2492_v15, %v3140_v31 }
 0x347   :  { %2319 = vrot.lane.b32.xlu1 %v4009_v44, %s2932_s17  ;;  %1934 = vst.msk [vmem:[#allocation6 + $0xf4] sm:$0x1] %vm422_vm12, %v1918_v28 }
 0x348   :  { %2349 = vrot.lane.b32.xlu0 %v3971_v5, %s2934_s19 }
 0x349   :  { %v1852_v34 = vpop.permute.xlu1 %1851 }
 0x34a   :  { %1869 = vst.msk [vmem:[#allocation6 + $0xe2] sm:$0x1] %vm422_vm12, %v1852_v34  ;;  %v1938_v62 = vpop.permute.xlu0 %1937 }
 0x34b   :  { %2323 = vrot.lane.b32.xlu1 %v4019_v18, %s2932_s17  ;;  %1960 = vst.msk [vmem:[#allocation6 + $0x95] sm:$0x1] %vm422_vm12, %v1938_v62  ;;  %v2549_v62 = vrot.slane %v2491_v24, %v3241_v38 }
 0x34c   :  { %2353 = vrot.lane.b32.xlu0 %v3980_v36, %s2934_s19 }
 0x34d   :  { %v1884_v25 = vpop.permute.xlu1 %1883 }
 0x34e   :  { %1901 = vst.msk [vmem:[#allocation6 + $0xe3] sm:$0x1] %vm422_vm12, %v1884_v25  ;;  %v1942_v10 = vpop.permute.xlu0 %1941  ;;  %v2493_v25 = vcombine.high %v2489_v21, %v2489_v21 }
 0x34f   :  { %2327 = vrot.lane.b32.xlu1 %v4028_v50, %s2932_s17  ;;  %1962 = vst.msk [vmem:[#allocation6 + $0xb5] sm:$0x1] %vm422_vm12, %v1942_v10 }
 0x350   :  { %2357 = vrot.lane.b32.xlu0 %v3991_v16, %s2934_s19  ;;  %v2553_v39 = vrot.slane %v2493_v25, %v3140_v31 }
 0x351   :  { %v1916_v8 = vpop.permute.xlu1 %1915 }
 0x352   :  { %1933 = vst.msk [vmem:[#allocation6 + $0xe4] sm:$0x1] %vm422_vm12, %v1916_v8  ;;  %v1946_v41 = vpop.permute.xlu0 %1945  ;;  %v2529_v8 = vrot.slane %v2475_v9, %v3140_v31 }
 0x353   :  { %2347 = vrot.lane.b32.xlu1 %v3997_v59, %s2934_s19  ;;  %1964 = vst.msk [vmem:[#allocation6 + $0xd5] sm:$0x1] %vm422_vm12, %v1946_v41 }
 0x354   :  { %2361 = vrot.lane.b32.xlu0 %v4003_v53, %s2934_s19 }
 0x355   :  { %v1936_v42 = vpop.permute.xlu1 %1935 }
 0x356   :  { %1959 = vst.msk [vmem:[#allocation6 + $0x85] sm:$0x1] %vm422_vm12, %v1936_v42  ;;  %v1950_v43 = vpop.permute.xlu0 %1949 }
 0x357   :  { %2351 = vrot.lane.b32.xlu1 %v4009_v44, %s2934_s19  ;;  %1966 = vst.msk [vmem:[#allocation6 + $0xf5] sm:$0x1] %vm422_vm12, %v1950_v43  ;;  %v2557_v43 = vrot.slane %v2493_v25, %v3241_v38 }
 0x358   :  { %2381 = vrot.lane.b32.xlu0 %v3971_v5, %s2935_s20 }
 0x359   :  { %v1940_v7 = vpop.permute.xlu1 %1939 }
 0x35a   :  { %1961 = vst.msk [vmem:[#allocation6 + $0xa5] sm:$0x1] %vm422_vm12, %v1940_v7  ;;  %v1970_v29 = vpop.permute.xlu0 %1969 }
 0x35b   :  { %2355 = vrot.lane.b32.xlu1 %v4019_v18, %s2934_s19  ;;  %1992 = vst.msk [vmem:[#allocation6 + $0x96] sm:$0x1] %vm422_vm12, %v1970_v29  ;;  %v2537_v29 = vrot.slane %v2489_v21, %v3140_v31 }
 0x35c   :  { %2385 = vrot.lane.b32.xlu0 %v3980_v36, %s2935_s20 }
 0x35d   :  { %v1944_v58 = vpop.permute.xlu1 %1943 }
 0x35e   :  { %1963 = vst.msk [vmem:[#allocation6 + $0xc5] sm:$0x1] %vm422_vm12, %v1944_v58  ;;  %v1974_v45 = vpop.permute.xlu0 %1973 }
 0x35f   :  { %2359 = vrot.lane.b32.xlu1 %v4028_v50, %s2934_s19  ;;  %1994 = vst.msk [vmem:[#allocation6 + $0xb6] sm:$0x1] %vm422_vm12, %v1974_v45  ;;  %v2621_v45 = vrot.slane %v3324_v11, %v3116_v37 }
 0x360   :  { %2389 = vrot.lane.b32.xlu0 %v3991_v16, %s2935_s20 }
 0x361   :  { %v1948_v47 = vpop.permute.xlu1 %1947 }
 0x362   :  { %1965 = vst.msk [vmem:[#allocation6 + $0xe5] sm:$0x1] %vm422_vm12, %v1948_v47  ;;  %v1978_v0 = vpop.permute.xlu0 %1977 }
 0x363   :  { %2379 = vrot.lane.b32.xlu1 %v3997_v59, %s2935_s20  ;;  %1996 = vst.msk [vmem:[#allocation6 + $0xd6] sm:$0x1] %vm422_vm12, %v1978_v0  ;;  %v2545_v0 = vrot.slane %v2491_v24, %v3140_v31 }
 0x364   :  { %2393 = vrot.lane.b32.xlu0 %v4003_v53, %s2935_s20 }
 0x365   :  { %v1968_v26 = vpop.permute.xlu1 %1967 }
 0x366   :  { %1991 = vst.msk [vmem:[#allocation6 + $0x86] sm:$0x1] %vm422_vm12, %v1968_v26  ;;  %v1982_v49 = vpop.permute.xlu0 %1981  ;;  %v2614_v26 = vcombine.high %v3324_v11, %v3324_v11 }
 0x367   :  { %2383 = vrot.lane.b32.xlu1 %v4009_v44, %s2935_s20  ;;  %1998 = vst.msk [vmem:[#allocation6 + $0xf6] sm:$0x1] %vm422_vm12, %v1982_v49  ;;  %v2629_v49 = vcombine.high %v2621_v45, %v2621_v45 }
 0x368   :  { %2413 = vrot.lane.b32.xlu0 %v3971_v5, %s2936_s21  ;;  %v2509_v5 = vrot.slane %v2482_v35, %v3241_v38 }
 0x369   :  { %v1972_v13 = vpop.permute.xlu1 %1971 }
 0x36a   :  { %1993 = vst.msk [vmem:[#allocation6 + $0xa6] sm:$0x1] %vm422_vm12, %v1972_v13  ;;  %v2117_v30 = vpop.permute.xlu0 %2116 }
 0x36b   :  { %2387 = vrot.lane.b32.xlu1 %v4019_v18, %s2935_s20 }
 0x36c   :  { %2560 = vrot.lane.b32.xlu0 %v2501_v55, %s2937_s22  ;;  %v2651_v55 = vrot.slane %v2629_v49, %v3116_v37 }
 0x36d   :  { %v1976_v1 = vpop.permute.xlu1 %1975 }
 0x36e   :  { %1995 = vst.msk [vmem:[#allocation6 + $0xc6] sm:$0x1] %vm422_vm12, %v1976_v1  ;;  %v2121_v54 = vpop.permute.xlu0 %2120  ;;  %v2670_v1 = vrot.slane %v2651_v55, %v3140_v31 }
 0x36f   :  { %2391 = vrot.lane.b32.xlu1 %v4028_v50, %s2935_s20 }
 0x370   :  { %2564 = vrot.lane.b32.xlu0 %v2509_v5, %s2937_s22 }
 0x371   :  { %v1980_v12 = vpop.permute.xlu1 %1979 }
 0x372   :  { %1997 = vst.msk [vmem:[#allocation6 + $0xe6] sm:$0x1] %vm422_vm12, %v1980_v12  ;;  %v2125_v61 = vpop.permute.xlu0 %2124 }
 0x373   :  { %2411 = vrot.lane.b32.xlu1 %v3997_v59, %s2936_s21  ;;  %v2525_v59 = vrot.slane %v2492_v15, %v3241_v38 }
 0x374   :  { %2568 = vrot.lane.b32.xlu0 %v2517_v60, %s2937_s22  ;;  %v2637_v60 = vrot.slane %v2621_v45, %v3116_v37 }
 0x375   :  { %v2115_v17 = vpop.permute.xlu1 %2114 }
 0x376   :  { %v2146_v52 = vsel %vm802_vm13, %v2115_v17, %v2117_v30  ;;  %v2129_v46 = vpop.permute.xlu0 %2128  ;;  %v2628_v30 = vrot.slane %v2614_v26, %v3116_v37 }
 0x377   :  { %2162 = vst.msk [vmem:[#allocation6 + $0x87] sm:$0x1] %vm422_vm12, %v2146_v52  ;;  %2558 = vrot.lane.b32.xlu1 %v2497_v20, %s2937_s22  ;;  %v2666_v20 = vrot.slane %v2637_v60, %v3140_v31  ;;  %v2659_v52 = vcombine.high %v2637_v60, %v2637_v60 }
 0x378   :  { %2572 = vrot.lane.b32.xlu0 %v2525_v59, %s2937_s22  ;;  %v2630_v5 = vcombine.high %v2628_v30, %v2628_v30  ;;  %v2644_v33 = vrot.slane %v2628_v30, %v3116_v37 }
 0x379   :  { %v2119_v2 = vpop.permute.xlu1 %2118  ;;  %v2674_v9 = vrot.slane %v2659_v52, %v3140_v31 }
 0x37a   :  { %v2147_v57 = vsel %vm802_vm13, %v2119_v2, %v2121_v54  ;;  %v2133_v3 = vpop.permute.xlu0 %2132  ;;  %v2661_v54 = vcombine.high %v2651_v55, %v2651_v55 }
 0x37b   :  { %2163 = vst.msk [vmem:[#allocation6 + $0x97] sm:$0x1] %vm422_vm12, %v2147_v57  ;;  %2562 = vrot.lane.b32.xlu1 %v2505_v14, %s2937_s22  ;;  %v2682_v57 = vrot.slane %v2644_v33, %v3140_v31 }
 0x37c   :  { %2576 = vrot.lane.b32.xlu0 %v2533_v48, %s2937_s22 }
 0x37d   :  { %v2123_v22 = vpop.permute.xlu1 %2122 }
 0x37e   :  { %v2148_v6 = vsel %vm802_vm13, %v2123_v22, %v2125_v61  ;;  %v2137_v40 = vpop.permute.xlu0 %2136  ;;  %v2658_v61 = vrot.slane %v2630_v5, %v3116_v37 }
 0x37f   :  { %2164 = vst.msk [vmem:[#allocation6 + $0xa7] sm:$0x1] %vm422_vm12, %v2148_v6  ;;  %2566 = vrot.lane.b32.xlu1 %v2513_v27, %s2937_s22 }
 0x380   :  { %2580 = vrot.lane.b32.xlu0 %v2541_v23, %s2937_s22  ;;  %v2686_v56 = vrot.slane %v2658_v61, %v3140_v31 }
 0x381   :  { %v2127_v32 = vpop.permute.xlu1 %2126 }
 0x382   :  { %v2149_v28 = vsel %vm802_vm13, %v2127_v32, %v2129_v46  ;;  %v2141_v34 = vpop.permute.xlu0 %2140 }
 0x383   :  { %2165 = vst.msk [vmem:[#allocation6 + $0xb7] sm:$0x1] %vm422_vm12, %v2149_v28  ;;  %2570 = vrot.lane.b32.xlu1 %v2521_v19, %s2937_s22 }
 0x384   :  { %2584 = vrot.lane.b32.xlu0 %v2549_v62, %s2937_s22 }
 0x385   :  { %v2131_v10 = vpop.permute.xlu1 %2130 }
 0x386   :  { %v2150_v41 = vsel %vm802_vm13, %v2131_v10, %v2133_v3  ;;  %v2145_v42 = vpop.permute.xlu0 %2144  ;;  %v2660_v3 = vcombine.high %v2644_v33, %v2644_v33 }
 0x387   :  { %2166 = vst.msk [vmem:[#allocation6 + $0xc7] sm:$0x1] %vm422_vm12, %v2150_v41  ;;  %2574 = vrot.lane.b32.xlu1 %v2529_v8, %s2937_s22 }
 0x388   :  { %2588 = vrot.lane.b32.xlu0 %v2557_v43, %s2937_s22  ;;  %v2690_v37 = vrot.slane %v2660_v3, %v3140_v31 }
 0x389   :  { %v2135_v7 = vpop.permute.xlu1 %2134 }
 0x38a   :  { %v2151_v58 = vsel %vm802_vm13, %v2135_v7, %v2137_v40  ;;  %v2254_v47 = vpop.permute.xlu0 %2253 }
 0x38b   :  { %2167 = vst.msk [vmem:[#allocation6 + $0xd7] sm:$0x1] %vm422_vm12, %v2151_v58  ;;  %2578 = vrot.lane.b32.xlu1 %v2537_v29, %s2937_s22  ;;  %2276 = vst.msk [vmem:[#allocation6 + $0x98] sm:$0x1] %vm422_vm12, %v2254_v47 }
 0x38c   :  { %2417 = vrot.lane.b32.xlu0 %v3980_v36, %s2936_s21 }
 0x38d   :  { %v2139_v38 = vpop.permute.xlu1 %2138 }
 0x38e   :  { %v2152_v63 = vsel %vm802_vm13, %v2139_v38, %v2141_v34  ;;  %v2258_v51 = vpop.permute.xlu0 %2257 }
 0x38f   :  { %2168 = vst.msk [vmem:[#allocation6 + $0xe7] sm:$0x1] %vm422_vm12, %v2152_v63  ;;  %2582 = vrot.lane.b32.xlu1 %v2545_v0, %s2937_s22  ;;  %2278 = vst.msk [vmem:[#allocation6 + $0xb8] sm:$0x1] %vm422_vm12, %v2258_v51 }
 0x390   :  { %2421 = vrot.lane.b32.xlu0 %v3991_v16, %s2936_s21 }
 0x391   :  { %v2143_v36 = vpop.permute.xlu1 %2142 }
 0x392   :  { %v2153_v13 = vsel %vm802_vm13, %v2143_v36, %v2145_v42  ;;  %v2262_v11 = vpop.permute.xlu0 %2261 }
 0x393   :  { %2169 = vst.msk [vmem:[#allocation6 + $0xf7] sm:$0x1] %vm422_vm12, %v2153_v13  ;;  %2586 = vrot.lane.b32.xlu1 %v2553_v39, %s2937_s22  ;;  %2280 = vst.msk [vmem:[#allocation6 + $0xd8] sm:$0x1] %vm422_vm12, %v2262_v11 }
 0x394   :  { %2425 = vrot.lane.b32.xlu0 %v4003_v53, %s2936_s21  ;;  %v2678_v53 = vrot.slane %v2661_v54, %v3140_v31 }
 0x395   :  { %v2252_v16 = vpop.permute.xlu1 %2251 }
 0x396   :  { %2275 = vst.msk [vmem:[#allocation6 + $0x88] sm:$0x1] %vm422_vm12, %v2252_v16  ;;  %v2266_v35 = vpop.permute.xlu0 %2265 }
 0x397   :  { %2415 = vrot.lane.b32.xlu1 %v4009_v44, %s2936_s21  ;;  %2282 = vst.msk [vmem:[#allocation6 + $0xf8] sm:$0x1] %vm422_vm12, %v2266_v35 }
 0x398   :  { %2697 = vrot.lane.b32.xlu0 %v2670_v1, %s2925_s1 }
 0x399   :  { %v2256_v4 = vpop.permute.xlu1 %2255 }
 0x39a   :  { %2277 = vst.msk [vmem:[#allocation6 + $0xa8] sm:$0x1] %vm422_vm12, %v2256_v4  ;;  %v2286_v12 = vpop.permute.xlu0 %2285 }
 0x39b   :  { %2419 = vrot.lane.b32.xlu1 %v4019_v18, %s2936_s21  ;;  %2308 = vst.msk [vmem:[#allocation6 + $0x99] sm:$0x1] %vm422_vm12, %v2286_v12  ;;  %v2662_v18 = vcombine.high %v2658_v61, %v2658_v61 }
 0x39c   :  { %2701 = vrot.lane.b32.xlu0 %v2678_v53, %s2925_s1 }
 0x39d   :  { %v2260_v44 = vpop.permute.xlu1 %2259  ;;  %v2694_v59 = vrot.slane %v2662_v18, %v3140_v31 }
 0x39e   :  { %2279 = vst.msk [vmem:[#allocation6 + $0xc8] sm:$0x1] %vm422_vm12, %v2260_v44  ;;  %v2290_v15 = vpop.permute.xlu0 %2289 }
 0x39f   :  { %2423 = vrot.lane.b32.xlu1 %v4028_v50, %s2936_s21  ;;  %2310 = vst.msk [vmem:[#allocation6 + $0xb9] sm:$0x1] %vm422_vm12, %v2290_v15 }
 0x3a0   :  { %2705 = vrot.lane.b32.xlu0 %v2686_v56, %s2925_s1 }
 0x3a1   :  { %v2264_v17 = vpop.permute.xlu1 %2263 }
 0x3a2   :  { %2281 = vst.msk [vmem:[#allocation6 + $0xe8] sm:$0x1] %vm422_vm12, %v2264_v17  ;;  %v2294_v46 = vpop.permute.xlu0 %2293 }
 0x3a3   :  { %2695 = vrot.lane.b32.xlu1 %v2666_v20, %s2925_s1  ;;  %2312 = vst.msk [vmem:[#allocation6 + $0xd9] sm:$0x1] %vm422_vm12, %v2294_v46 }
 0x3a4   :  { %2709 = vrot.lane.b32.xlu0 %v2694_v59, %s2925_s1 }
 0x3a5   :  { %v2284_v50 = vpop.permute.xlu1 %2283 }
 0x3a6   :  { %2307 = vst.msk [vmem:[#allocation6 + $0x89] sm:$0x1] %vm422_vm12, %v2284_v50  ;;  %v2298_v2 = vpop.permute.xlu0 %2297 }
 0x3a7   :  { %2699 = vrot.lane.b32.xlu1 %v2674_v9, %s2925_s1  ;;  %2314 = vst.msk [vmem:[#allocation6 + $0xf9] sm:$0x1] %vm422_vm12, %v2298_v2 }
 0x3a9   :  { %v2288_v14 = vpop.permute.xlu1 %2287 }
 0x3aa   :  { %2309 = vst.msk [vmem:[#allocation6 + $0xa9] sm:$0x1] %vm422_vm12, %v2288_v14  ;;  %v2318_v48 = vpop.permute.xlu0 %2317 }
 0x3ab   :  { %2703 = vrot.lane.b32.xlu1 %v2682_v57, %s2925_s1  ;;  %2340 = vst.msk [vmem:[#allocation6 + $0x9a] sm:$0x1] %vm422_vm12, %v2318_v48 }
 0x3ad   :  { %v2292_v21 = vpop.permute.xlu1 %2291 }
 0x3ae   :  { %2311 = vst.msk [vmem:[#allocation6 + $0xc9] sm:$0x1] %vm422_vm12, %v2292_v21  ;;  %v2322_v22 = vpop.permute.xlu0 %2321 }
 0x3af   :  { %2707 = vrot.lane.b32.xlu1 %v2690_v37, %s2925_s1  ;;  %2342 = vst.msk [vmem:[#allocation6 + $0xba] sm:$0x1] %vm422_vm12, %v2322_v22 }
 0x3b1   :  { %v2296_v27 = vpop.permute.xlu1 %2295 }
 0x3b2   :  { %2313 = vst.msk [vmem:[#allocation6 + $0xe9] sm:$0x1] %vm422_vm12, %v2296_v27  ;;  %v2326_v6 = vpop.permute.xlu0 %2325 }
 0x3b3   :  { %2344 = vst.msk [vmem:[#allocation6 + $0xda] sm:$0x1] %vm422_vm12, %v2326_v6 }
 0x3b5   :  { %v2316_v40 = vpop.permute.xlu1 %2315 }
 0x3b6   :  { %2339 = vst.msk [vmem:[#allocation6 + $0x8a] sm:$0x1] %vm422_vm12, %v2316_v40  ;;  %v2330_v23 = vpop.permute.xlu0 %2329 }
 0x3b7   :  { %2346 = vst.msk [vmem:[#allocation6 + $0xfa] sm:$0x1] %vm422_vm12, %v2330_v23 }
 0x3b9   :  { %v2320_v31 = vpop.permute.xlu1 %2319 }
 0x3ba   :  { %2341 = vst.msk [vmem:[#allocation6 + $0xaa] sm:$0x1] %vm422_vm12, %v2320_v31  ;;  %v2350_v24 = vpop.permute.xlu0 %2349 }
 0x3bb   :  { %2372 = vst.msk [vmem:[#allocation6 + $0x9b] sm:$0x1] %vm422_vm12, %v2350_v24 }
 0x3bd   :  { %v2324_v32 = vpop.permute.xlu1 %2323 }
 0x3be   :  { %2343 = vst.msk [vmem:[#allocation6 + $0xca] sm:$0x1] %vm422_vm12, %v2324_v32  ;;  %v2354_v19 = vpop.permute.xlu0 %2353 }
 0x3bf   :  { %2374 = vst.msk [vmem:[#allocation6 + $0xbb] sm:$0x1] %vm422_vm12, %v2354_v19 }
 0x3c1   :  { %v2328_v28 = vpop.permute.xlu1 %2327 }
 0x3c2   :  { %2345 = vst.msk [vmem:[#allocation6 + $0xea] sm:$0x1] %vm422_vm12, %v2328_v28  ;;  %v2358_v34 = vpop.permute.xlu0 %2357 }
 0x3c3   :  { %2376 = vst.msk [vmem:[#allocation6 + $0xdb] sm:$0x1] %vm422_vm12, %v2358_v34 }
 0x3c5   :  { %v2348_v62 = vpop.permute.xlu1 %2347 }
 0x3c6   :  { %2371 = vst.msk [vmem:[#allocation6 + $0x8b] sm:$0x1] %vm422_vm12, %v2348_v62  ;;  %v2362_v25 = vpop.permute.xlu0 %2361 }
 0x3c7   :  { %2378 = vst.msk [vmem:[#allocation6 + $0xfb] sm:$0x1] %vm422_vm12, %v2362_v25 }
 0x3c9   :  { %v2352_v10 = vpop.permute.xlu1 %2351 }
 0x3ca   :  { %2373 = vst.msk [vmem:[#allocation6 + $0xab] sm:$0x1] %vm422_vm12, %v2352_v10  ;;  %v2382_v8 = vpop.permute.xlu0 %2381 }
 0x3cb   :  { %2404 = vst.msk [vmem:[#allocation6 + $0x9c] sm:$0x1] %vm422_vm12, %v2382_v8 }
 0x3cd   :  { %v2356_v41 = vpop.permute.xlu1 %2355 }
 0x3ce   :  { %2375 = vst.msk [vmem:[#allocation6 + $0xcb] sm:$0x1] %vm422_vm12, %v2356_v41  ;;  %v2386_v42 = vpop.permute.xlu0 %2385 }
 0x3cf   :  { %2406 = vst.msk [vmem:[#allocation6 + $0xbc] sm:$0x1] %vm422_vm12, %v2386_v42 }
 0x3d1   :  { %v2360_v43 = vpop.permute.xlu1 %2359 }
 0x3d2   :  { %2377 = vst.msk [vmem:[#allocation6 + $0xeb] sm:$0x1] %vm422_vm12, %v2360_v43  ;;  %v2390_v7 = vpop.permute.xlu0 %2389 }
 0x3d3   :  { %2408 = vst.msk [vmem:[#allocation6 + $0xdc] sm:$0x1] %vm422_vm12, %v2390_v7 }
 0x3d5   :  { %v2380_v29 = vpop.permute.xlu1 %2379 }
 0x3d6   :  { %2403 = vst.msk [vmem:[#allocation6 + $0x8c] sm:$0x1] %vm422_vm12, %v2380_v29  ;;  %v2394_v58 = vpop.permute.xlu0 %2393 }
 0x3d7   :  { %2410 = vst.msk [vmem:[#allocation6 + $0xfc] sm:$0x1] %vm422_vm12, %v2394_v58 }
 0x3d9   :  { %v2384_v45 = vpop.permute.xlu1 %2383 }
 0x3da   :  { %2405 = vst.msk [vmem:[#allocation6 + $0xac] sm:$0x1] %vm422_vm12, %v2384_v45  ;;  %v2414_v47 = vpop.permute.xlu0 %2413 }
 0x3db   :  { %2436 = vst.msk [vmem:[#allocation6 + $0x9d] sm:$0x1] %vm422_vm12, %v2414_v47 }
 0x3dd   :  { %v2388_v38 = vpop.permute.xlu1 %2387 }
 0x3de   :  { %2407 = vst.msk [vmem:[#allocation6 + $0xcc] sm:$0x1] %vm422_vm12, %v2388_v38  ;;  %v2561_v0 = vpop.permute.xlu0 %2560 }
 0x3e1   :  { %v2392_v63 = vpop.permute.xlu1 %2391 }
 0x3e2   :  { %2409 = vst.msk [vmem:[#allocation6 + $0xec] sm:$0x1] %vm422_vm12, %v2392_v63  ;;  %v2565_v26 = vpop.permute.xlu0 %2564 }
 0x3e5   :  { %v2412_v49 = vpop.permute.xlu1 %2411 }
 0x3e6   :  { %2435 = vst.msk [vmem:[#allocation6 + $0x8d] sm:$0x1] %vm422_vm12, %v2412_v49  ;;  %v2569_v51 = vpop.permute.xlu0 %2568 }
 0x3e9   :  { %v2559_v36 = vpop.permute.xlu1 %2558 }
 0x3ea   :  { %v2590_v39 = vsel %vm1247_vm14, %v2559_v36, %v2561_v0  ;;  %v2573_v13 = vpop.permute.xlu0 %2572 }
 0x3eb   :  { %2606 = vst.msk [vmem:[#allocation6 + $0x8e] sm:$0x1] %vm422_vm12, %v2590_v39 }
 0x3ed   :  { %v2563_v30 = vpop.permute.xlu1 %2562 }
 0x3ee   :  { %v2591_v11 = vsel %vm1247_vm14, %v2563_v30, %v2565_v26  ;;  %v2577_v55 = vpop.permute.xlu0 %2576 }
 0x3ef   :  { %2607 = vst.msk [vmem:[#allocation6 + $0x9e] sm:$0x1] %vm422_vm12, %v2591_v11 }
 0x3f1   :  { %v2567_v16 = vpop.permute.xlu1 %2566 }
 0x3f2   :  { %v2592_v35 = vsel %vm1247_vm14, %v2567_v16, %v2569_v51  ;;  %v2581_v1 = vpop.permute.xlu0 %2580 }
 0x3f3   :  { %2608 = vst.msk [vmem:[#allocation6 + $0xae] sm:$0x1] %vm422_vm12, %v2592_v35 }
 0x3f5   :  { %v2571_v54 = vpop.permute.xlu1 %2570 }
 0x3f6   :  { %v2593_v5 = vsel %vm1247_vm14, %v2571_v54, %v2573_v13  ;;  %v2585_v4 = vpop.permute.xlu0 %2584 }
 0x3f7   :  { %2609 = vst.msk [vmem:[#allocation6 + $0xbe] sm:$0x1] %vm422_vm12, %v2593_v5 }
 0x3f9   :  { %v2575_v12 = vpop.permute.xlu1 %2574 }
 0x3fa   :  { %v2594_v53 = vsel %vm1247_vm14, %v2575_v12, %v2577_v55  ;;  %v2589_v61 = vpop.permute.xlu0 %2588 }
 0x3fb   :  { %2610 = vst.msk [vmem:[#allocation6 + $0xce] sm:$0x1] %vm422_vm12, %v2594_v53 }
 0x3fd   :  { %v2579_v44 = vpop.permute.xlu1 %2578 }
 0x3fe   :  { %v2595_v60 = vsel %vm1247_vm14, %v2579_v44, %v2581_v1  ;;  %v2418_v15 = vpop.permute.xlu0 %2417 }
 0x3ff   :  { %2611 = vst.msk [vmem:[#allocation6 + $0xde] sm:$0x1] %vm422_vm12, %v2595_v60  ;;  %2438 = vst.msk [vmem:[#allocation6 + $0xbd] sm:$0x1] %vm422_vm12, %v2418_v15 }
 0x401   :  { %v2583_v56 = vpop.permute.xlu1 %2582 }
 0x402   :  { %v2596_v18 = vsel %vm1247_vm14, %v2583_v56, %v2585_v4  ;;  %v2422_v17 = vpop.permute.xlu0 %2421 }
 0x403   :  { %2612 = vst.msk [vmem:[#allocation6 + $0xee] sm:$0x1] %vm422_vm12, %v2596_v18  ;;  %2440 = vst.msk [vmem:[#allocation6 + $0xdd] sm:$0x1] %vm422_vm12, %v2422_v17 }
 0x405   :  { %v2587_v20 = vpop.permute.xlu1 %2586 }
 0x406   :  { %v2597_v52 = vsel %vm1247_vm14, %v2587_v20, %v2589_v61  ;;  %v2426_v46 = vpop.permute.xlu0 %2425 }
 0x407   :  { %2613 = vst.msk [vmem:[#allocation6 + $0xfe] sm:$0x1] %vm422_vm12, %v2597_v52  ;;  %2442 = vst.msk [vmem:[#allocation6 + $0xfd] sm:$0x1] %vm422_vm12, %v2426_v46 }
 0x409   :  { %v2416_v59 = vpop.permute.xlu1 %2415 }
 0x40a   :  { %2437 = vst.msk [vmem:[#allocation6 + $0xad] sm:$0x1] %vm422_vm12, %v2416_v59  ;;  %v2698_v50 = vpop.permute.xlu0 %2697 }
 0x40b   :  { %2720 = vst.msk [vmem:[#allocation6 + $0x9f] sm:$0x1] %vm422_vm12, %v2698_v50 }
 0x40d   :  { %v2420_v9 = vpop.permute.xlu1 %2419 }
 0x40e   :  { %2439 = vst.msk [vmem:[#allocation6 + $0xcd] sm:$0x1] %vm422_vm12, %v2420_v9  ;;  %v2702_v33 = vpop.permute.xlu0 %2701 }
 0x40f   :  { %2722 = vst.msk [vmem:[#allocation6 + $0xbf] sm:$0x1] %vm422_vm12, %v2702_v33 }
 0x411   :  { %v2424_v2 = vpop.permute.xlu1 %2423 }
 0x412   :  { %2441 = vst.msk [vmem:[#allocation6 + $0xed] sm:$0x1] %vm422_vm12, %v2424_v2  ;;  %v2706_v14 = vpop.permute.xlu0 %2705 }
 0x413   :  { %2724 = vst.msk [vmem:[#allocation6 + $0xdf] sm:$0x1] %vm422_vm12, %v2706_v14 }
 0x415   :  { %v2696_v57 = vpop.permute.xlu1 %2695 }
 0x416   :  { %2719 = vst.msk [vmem:[#allocation6 + $0x8f] sm:$0x1] %vm422_vm12, %v2696_v57  ;;  %v2710_v3 = vpop.permute.xlu0 %2709 }
 0x417   :  { %2726 = vst.msk [vmem:[#allocation6 + $0xff] sm:$0x1] %vm422_vm12, %v2710_v3 }
 0x419   :  { %v2700_v48 = vpop.permute.xlu1 %2699 }
 0x41a   :  { %2721 = vst.msk [vmem:[#allocation6 + $0xaf] sm:$0x1] %vm422_vm12, %v2700_v48 }
 0x41d   :  { %v2704_v21 = vpop.permute.xlu1 %2703 }
 0x41e   :  { %2723 = vst.msk [vmem:[#allocation6 + $0xcf] sm:$0x1] %vm422_vm12, %v2704_v21 }
 0x421   :  { %v2708_v37 = vpop.permute.xlu1 %2707 }
 0x422   :  { %2725 = vst.msk [vmem:[#allocation6 + $0xef] sm:$0x1] %vm422_vm12, %v2708_v37 }
 0x423   :  { %2895 = shalt.err (!%p2892_p12)
}
 0x424   :  { %s2896_s0 = scalar_lea.hbm %s4313_s3, 4096 }
 0x425   :  { %p2897_p13 = scmp.ne.s32.totalorder %s4313_s3, %s2896_s0  ;;  %p2900_p0 = scmp.lt.u32.totalorder %s2896_s0, %s4313_s3 }
 0x427   :  { %p2902_p1 = pnand %p2900_p0, %p2897_p13 }
 0x429   :  { %2905 = shalt.err (!%p2902_p1)
}
 0x42a   :  { %s2939_s5 = smov 128   ;;  %s2940_s6 = smov 8  }
 0x42b   :  { %2738 = dma.vmem_to_hbm [thread:$0]  %s2733_s24, 4096, %s4313_s3, [#allocation5], %s2939_s5, %s2939_s5, %s2940_s6  }
 0x42c   :  { %2908 = dma.done.wait [#allocation5], 4096  }
 0x42d   :  { %2909 = vsyncadd [#allocation5], 4294963200 }
 0x42e   :  { %2742 = vsyncpa [#allocation4], 1 }
 0x42f   :  { %2743 = vsyncpa [#allocation5], 1 }

</bundles_post_ra>
